<compile_context>
chip_gen: v7x
topology: tpu7x:2x2x1
jax: 0.10.0
libtpu: 0.0.40
codegen_flags: <defaults>
</compile_context>

<pallas_src>
import numpy as np
import jax
import jax.numpy as jnp
from jax import lax
from jax.experimental import pallas as pl
from jax.experimental.pallas import tpu as pltpu


# ---------------------------------------------------------------------------
# Fused stacked-LSTM kernel: grid over time blocks, state in VMEM scratch.
# ---------------------------------------------------------------------------
def _make_lstm_kernel(num_layers, hidden_dim, block_t, bp):
    H = hidden_dim
    L = num_layers

    def kernel(*refs):
        x_ref = refs[0]                         # (Tt, Bp, E) block
        wrefs = refs[1:1 + 3 * L]               # per layer: W_ih, W_hh, b
        out_ref = refs[1 + 3 * L]               # (Tt, Bp, H) block
        h_sc = refs[2 + 3 * L]                  # (L, Bp, H) VMEM scratch
        c_sc = refs[3 + 3 * L]                  # (L, Bp, H) VMEM scratch
        xp_sc = refs[4 + 3 * L]                 # (Tt, Bp, 4H) VMEM scratch

        @pl.when(pl.program_id(0) == 0)
        def _():
            h_sc[...] = jnp.zeros_like(h_sc)
            c_sc[...] = jnp.zeros_like(c_sc)

        # Hoisted layer-0 input projection for the whole time block:
        # one (Tt*Bp, E) @ (E, 4H) matmul (good MXU M-fill), and it removes
        # one matmul per timestep from the recurrence's critical path.
        xb = x_ref[...]                         # (Tt, Bp, E)
        xp = jnp.dot(xb.reshape(block_t * bp, xb.shape[-1]), wrefs[0][...],
                     preferred_element_type=jnp.float32) + wrefs[2][...]
        xp_sc[...] = xp.reshape(block_t, bp, 4 * H)

        def act(gates, c_prev):
            # columns pre-permuted to [i, f, o, g]: one contiguous sigmoid.
            sig = jax.nn.sigmoid(gates[:, :3 * H])
            i_g = sig[:, 0 * H:1 * H]
            f_g = sig[:, 1 * H:2 * H]
            o_g = sig[:, 2 * H:3 * H]
            g_g = jnp.tanh(gates[:, 3 * H:4 * H])
            c_new = f_g * c_prev + i_g * g_g
            h_new = o_g * jnp.tanh(c_new)
            return h_new, c_new

        def step(tt, carry):
            # layer 0: input projection already in xp_sc (includes bias).
            gates = xp_sc[tt] + jnp.dot(h_sc[0], wrefs[1][...],
                                        preferred_element_type=jnp.float32)
            h_new, c_new = act(gates, c_sc[0])
            h_sc[0] = h_new
            c_sc[0] = c_new
            inp = h_new
            for l in range(1, L):               # static unroll over layers
                gates = (jnp.dot(inp, wrefs[3 * l][...],
                                 preferred_element_type=jnp.float32)
                         + jnp.dot(h_sc[l], wrefs[3 * l + 1][...],
                                   preferred_element_type=jnp.float32)
                         + wrefs[3 * l + 2][...])
                h_new, c_new = act(gates, c_sc[l])
                h_sc[l] = h_new
                c_sc[l] = c_new
                inp = h_new
            out_ref[tt] = inp                   # last layer's h_t
            return carry

        lax.fori_loop(0, block_t, step, 0, unroll=(block_t <= 16))

    return kernel


def lstm_stack_forward(x_tbe, layer_weights, block_t):
    """x_tbe: (Tp, Bp, E) time-major, padded. Returns (Tp, Bp, H)."""
    Tp, Bp, E = x_tbe.shape
    H = layer_weights[0][1].shape[0]
    L = len(layer_weights)

    in_specs = [pl.BlockSpec((block_t, Bp, E), lambda tb: (tb, 0, 0))]
    flat_w = []
    for (w_ih, w_hh, b) in layer_weights:
        # Constant block index -> weights stay resident in VMEM across steps.
        in_specs.append(pl.BlockSpec(w_ih.shape, lambda tb: (0, 0)))
        in_specs.append(pl.BlockSpec(w_hh.shape, lambda tb: (0, 0)))
        in_specs.append(pl.BlockSpec(b.shape, lambda tb: (0, 0)))
        flat_w.extend([w_ih, w_hh, b])

    return pl.pallas_call(
        _make_lstm_kernel(L, H, block_t, Bp),
        out_shape=jax.ShapeDtypeStruct((Tp, Bp, H), jnp.float32),
        grid=(Tp // block_t,),
        in_specs=in_specs,
        out_specs=pl.BlockSpec((block_t, Bp, H), lambda tb: (tb, 0, 0)),
        scratch_shapes=[pltpu.VMEM((L, Bp, H), jnp.float32),
                        pltpu.VMEM((L, Bp, H), jnp.float32),
                        pltpu.VMEM((block_t, Bp, 4 * H), jnp.float32)],
        compiler_params=pltpu.CompilerParams(
            dimension_semantics=("arbitrary",)),   # sequential recurrence
    )(x_tbe, *flat_w)


# ---------------------------------------------------------------------------
# DAFusion kernel: fused projections + BAN attention, mask from SMEM lengths,
# diagonal-only attention accumulation, no (B, h_out, T, T) HBM writeback.
# ---------------------------------------------------------------------------
def _make_dafusion_kernel(h_out):
    def kernel(len_ref, code_ref, ctx_ref, wv_ref, bv_ref, wu_ref, bu_ref,
               hw_ref, fused_ref, w_ref):
        b = pl.program_id(0)
        L = len_ref[b]                               # scalar from SMEM
        code = code_ref[0]                           # (T, E)
        ctx = ctx_ref[0]                             # (T, H)
        T = code.shape[0]
        K = wv_ref.shape[1]

        # (T,1)/(1,T) validity vectors: no (T,T) f32 mask / iotas materialized.
        qi = lax.broadcasted_iota(jnp.int32, (T, 1), 0)
        ki = lax.broadcasted_iota(jnp.int32, (1, T), 1)
        valid_q = qi < L
        valid_k = ki < L
        valid = valid_q & valid_k
        on_diag = qi == ki

        # pad_packed_sequence pads LSTM outputs with zeros past the length.
        ctx = jnp.where(valid_q, ctx, 0.0)

        vx = (jnp.dot(code, wv_ref[...], preferred_element_type=jnp.float32)
              + bv_ref[...])                         # (T, K) global channel
        uq = (jnp.dot(ctx, wu_ref[...], preferred_element_type=jnp.float32)
              + bu_ref[...])                         # (T, K) local channel
        uq_t = uq.T                                  # transpose ONCE (hoisted)
        hw = hw_ref[...]                             # (h_out, K)

        fused_acc = jnp.zeros((1, K), jnp.float32)
        diag_acc = jnp.zeros((1, T), jnp.float32)
        for g in range(h_out):                       # h_out small & static
            a = vx * hw[g:g + 1, :]                  # (T, K)
            logits = jnp.dot(a, uq_t,
                             preferred_element_type=jnp.float32)     # (T, T)
            # f32 large-negative mask (would need finfo-aware value in bf16).
            logits = jnp.where(valid, logits, -1e30)
            m = jnp.max(logits, keepdims=True)
            p = jnp.exp(logits - m)
            p = p / jnp.sum(p, keepdims=True)        # softmax over masked T*T
            pu = jnp.dot(p, uq, preferred_element_type=jnp.float32)  # (T, K)
            fused_acc = fused_acc + jnp.sum(vx * pu, axis=0, keepdims=True)
            # only the diagonal is needed downstream: accumulate (1, T).
            diag_acc = diag_acc + jnp.sum(jnp.where(on_diag, p, 0.0),
                                          axis=0, keepdims=True)

        fused_ref[0] = fused_acc                     # (1, K)
        w_ref[0] = diag_acc / (jnp.sum(diag_acc, axis=1, keepdims=True) + 1e-12)

    return kernel


def dafusion(code_pad, contexts, lengths, params):
    B, T, E = code_pad.shape
    H = contexts.shape[-1]
    K = params["W_v"].shape[1]
    h_out = params["h_w"].shape[0]
    b_v = params["b_v"].reshape(1, K)
    b_u = params["b_u"].reshape(1, K)

    grid_spec = pltpu.PrefetchScalarGridSpec(
        num_scalar_prefetch=1,                        # lengths -> SMEM
        grid=(B,),
        in_specs=[pl.BlockSpec((1, T, E), lambda b, ln: (b, 0, 0)),
                  pl.BlockSpec((1, T, H), lambda b, ln: (b, 0, 0)),
                  pl.BlockSpec((E, K), lambda b, ln: (0, 0)),
                  pl.BlockSpec((1, K), lambda b, ln: (0, 0)),
                  pl.BlockSpec((H, K), lambda b, ln: (0, 0)),
                  pl.BlockSpec((1, K), lambda b, ln: (0, 0)),
                  pl.BlockSpec((h_out, K), lambda b, ln: (0, 0))],
        out_specs=(pl.BlockSpec((1, 1, K), lambda b, ln: (b, 0, 0)),
                   pl.BlockSpec((1, 1, T), lambda b, ln: (b, 0, 0))),
    )
    fused, w = pl.pallas_call(
        _make_dafusion_kernel(h_out),
        out_shape=(jax.ShapeDtypeStruct((B, 1, K), jnp.float32),
                   jax.ShapeDtypeStruct((B, 1, T), jnp.float32)),
        grid_spec=grid_spec,
        compiler_params=pltpu.CompilerParams(
            dimension_semantics=("parallel",)),       # both TCs on v7x
    )(lengths, code_pad, contexts,
      params["W_v"], b_v, params["W_u"], b_u, params["h_w"])
    return fused[:, 0, :], w[:, 0, :]


# ---------------------------------------------------------------------------
# Model glue
# ---------------------------------------------------------------------------
def please_forward(code_list, params):
    """code_list: list of (len_i, E) arrays. Returns (file_embeds, att_weights)."""
    B = len(code_list)
    lengths = jnp.array([c.shape[0] for c in code_list], dtype=jnp.int32)
    T = max(int(c.shape[0]) for c in code_list)
    E = code_list[0].shape[1]
    H = params["W_hh_0"].shape[0]
    L = params["num_layers"]

    code_pad = jnp.stack(
        [jnp.pad(c, ((0, T - c.shape[0]), (0, 0))) for c in code_list])   # (B,T,E)

    # Time-major, sublane-padded layout for the recurrence; time padded to a
    # multiple of the time block.
    Bp = ((B + 7) // 8) * 8
    block_t = T if T <= 64 else 64
    Tp = ((T + block_t - 1) // block_t) * block_t
    x_tbe = jnp.zeros((Tp, Bp, E), jnp.float32)
    x_tbe = x_tbe.at[:T, :B, :].set(code_pad.transpose(1, 0, 2))

    # Gate column permutation: PyTorch [i|f|g|o] -> [i|f|o|g] so the kernel
    # applies one contiguous sigmoid to the first 3H columns.
    perm = np.concatenate([np.arange(0, H), np.arange(H, 2 * H),
                           np.arange(3 * H, 4 * H), np.arange(2 * H, 3 * H)])
    layer_weights = []
    for l in range(L):
        w_ih = params[f"W_ih_{l}"][:, perm]
        w_hh = params[f"W_hh_{l}"][:, perm]
        b = (params[f"b_ih_{l}"] + params[f"b_hh_{l}"])[perm].reshape(1, 4 * H)
        layer_weights.append((w_ih, w_hh, b))

    out_tbh = lstm_stack_forward(x_tbe, layer_weights, block_t)   # (Tp, Bp, H)
    # TODO(synk): the (T,B,H)->(B,T,H) transpose is a tiny host-side XLA op;
    # it could be folded into the dafusion BlockSpec for very large T*B*H.
    contexts = out_tbh[:T].transpose(1, 0, 2)[:B]                 # (B, T, H)

    fused, att_weights = dafusion(code_pad, contexts, lengths, params)
    return fused, att_weights


def init_params(key, embed_dim, hidden_dim, num_layers, output_dim, h_out=2):
    params = {"num_layers": num_layers}
    keys = iter(jax.random.split(key, 4 * num_layers + 8))
    scale = 0.1
    for l in range(num_layers):
        d_in = embed_dim if l == 0 else hidden_dim
        params[f"W_ih_{l}"] = scale * jax.random.normal(
            next(keys), (d_in, 4 * hidden_dim), jnp.float32)
        params[f"W_hh_{l}"] = scale * jax.random.normal(
            next(keys), (hidden_dim, 4 * hidden_dim), jnp.float32)
        params[f"b_ih_{l}"] = scale * jax.random.normal(
            next(keys), (4 * hidden_dim,), jnp.float32)
        params[f"b_hh_{l}"] = scale * jax.random.normal(
            next(keys), (4 * hidden_dim,), jnp.float32)
    params["W_v"] = scale * jax.random.normal(
        next(keys), (embed_dim, output_dim), jnp.float32)
    params["b_v"] = scale * jax.random.normal(next(keys), (output_dim,), jnp.float32)
    params["W_u"] = scale * jax.random.normal(
        next(keys), (hidden_dim, output_dim), jnp.float32)
    params["b_u"] = scale * jax.random.normal(next(keys), (output_dim,), jnp.float32)
    params["h_w"] = scale * jax.random.normal(
        next(keys), (h_out, output_dim), jnp.float32)
    return params


if __name__ == "__main__":
    embed_dim, hidden_dim, num_layers, output_dim = 16, 32, 2, 32
    key = jax.random.PRNGKey(0)
    pkey, dkey = jax.random.split(key)
    params = init_params(pkey, embed_dim, hidden_dim, num_layers, output_dim)

    # variable-length "code" sequences (list of (len_i, embed_dim))
    seq_lengths = [8, 5, 6]
    dkeys = jax.random.split(dkey, len(seq_lengths))
    code_list = [jax.random.normal(k, (Ln, embed_dim), jnp.float32)
                 for k, Ln in zip(dkeys, seq_lengths)]

    file_embeds, att_weights = please_forward(code_list, params)
    jax.block_until_ready((file_embeds, att_weights))

    assert file_embeds.shape == (3, output_dim)
    assert att_weights.shape == (3, max(seq_lengths))
    assert bool(jnp.all(jnp.isfinite(file_embeds)))
    assert bool(jnp.all(jnp.isfinite(att_weights)))
    # attention weights rows should sum to ~1 over valid positions
    assert bool(jnp.all(jnp.abs(jnp.sum(att_weights, axis=1) - 1.0) < 1e-3))
    print("KERNEL_OK")
</pallas_src>

<mosaic_0001>
module attributes {stable_mosaic.version = 11 : i64} {
  func.func @kernel(%arg0: i32, %arg1: memref<8x8x16xf32, #tpu.memory_space<vmem>>, %arg2: memref<16x128xf32, #tpu.memory_space<vmem>>, %arg3: memref<32x128xf32, #tpu.memory_space<vmem>>, %arg4: memref<1x128xf32, #tpu.memory_space<vmem>>, %arg5: memref<32x128xf32, #tpu.memory_space<vmem>>, %arg6: memref<32x128xf32, #tpu.memory_space<vmem>>, %arg7: memref<1x128xf32, #tpu.memory_space<vmem>>, %arg8: memref<8x8x32xf32, #tpu.memory_space<vmem>>, %arg9: memref<2x8x32xf32, #tpu.memory_space<vmem>>, %arg10: memref<2x8x32xf32, #tpu.memory_space<vmem>>, %arg11: memref<8x8x128xf32, #tpu.memory_space<vmem>>) attributes {dimension_semantics = [#tpu.dimension_semantics<arbitrary>], iteration_bounds = array<i64: 1>, scalar_prefetch = 0 : i64, scratch_operands = 3 : i64, tpu.core_type = #tpu.core_type<tc>, window_params = [{transform_indices = @transform_0, window_bounds = array<i64: 8, 8, 16>}, {pipeline_mode = #tpu.pipeline_mode<synchronous>, transform_indices = @transform_1, window_bounds = array<i64: 16, 128>}, {pipeline_mode = #tpu.pipeline_mode<synchronous>, transform_indices = @transform_2, window_bounds = array<i64: 32, 128>}, {pipeline_mode = #tpu.pipeline_mode<synchronous>, transform_indices = @transform_3, window_bounds = array<i64: 1, 128>}, {pipeline_mode = #tpu.pipeline_mode<synchronous>, transform_indices = @transform_4, window_bounds = array<i64: 32, 128>}, {pipeline_mode = #tpu.pipeline_mode<synchronous>, transform_indices = @transform_5, window_bounds = array<i64: 32, 128>}, {pipeline_mode = #tpu.pipeline_mode<synchronous>, transform_indices = @transform_6, window_bounds = array<i64: 1, 128>}, {transform_indices = @transform_7, window_bounds = array<i64: 8, 8, 32>}]} {
    %c0_i32 = arith.constant 0 : i32
    %0 = arith.cmpi eq, %arg0, %c0_i32 : i32
    %1 = arith.extui %0 : i1 to i32
    %c0_i32_0 = arith.constant 0 : i32
    %2 = arith.cmpi ne, %1, %c0_i32_0 : i32
    scf.if %2 {
      %cst_338 = arith.constant 0.000000e+00 : f32
      %572 = vector.broadcast %cst_338 : f32 to vector<2x8x32xf32>
      %c0_339 = arith.constant 0 : index
      %c0_340 = arith.constant 0 : index
      %c0_341 = arith.constant 0 : index
      %573 = vector.load %arg9[%c0_339, %c0_340, %c0_341] : memref<2x8x32xf32, #tpu.memory_space<vmem>>, vector<2x8x32xf32>
      tpu.vector_store %arg9[%c0_339, %c0_340, %c0_341], %572 {strides = array<i32>} : memref<2x8x32xf32, #tpu.memory_space<vmem>>, vector<2x8x32xf32>,
      %cst_342 = arith.constant 0.000000e+00 : f32
      %574 = vector.broadcast %cst_342 : f32 to vector<2x8x32xf32>
      %c0_343 = arith.constant 0 : index
      %c0_344 = arith.constant 0 : index
      %c0_345 = arith.constant 0 : index
      %575 = vector.load %arg10[%c0_343, %c0_344, %c0_345] : memref<2x8x32xf32, #tpu.memory_space<vmem>>, vector<2x8x32xf32>
      tpu.vector_store %arg10[%c0_343, %c0_344, %c0_345], %574 {strides = array<i32>} : memref<2x8x32xf32, #tpu.memory_space<vmem>>, vector<2x8x32xf32>,
    } else {
    }
    %c0 = arith.constant 0 : index
    %c0_1 = arith.constant 0 : index
    %c0_2 = arith.constant 0 : index
    %3 = vector.load %arg1[%c0, %c0_1, %c0_2] : memref<8x8x16xf32, #tpu.memory_space<vmem>>, vector<8x8x16xf32>
    %4 = vector.shape_cast %3 : vector<8x8x16xf32> to vector<64x16xf32>
    %c0_3 = arith.constant 0 : index
    %c0_4 = arith.constant 0 : index
    %5 = vector.load %arg2[%c0_3, %c0_4] : memref<16x128xf32, #tpu.memory_space<vmem>>, vector<16x128xf32>
    %cst = arith.constant dense<0.000000e+00> : vector<64x128xf32>
    %6 = tpu.matmul %4, %5, %cst {dimension_numbers = #tpu.dot_dimension_numbers<[1], [0], [0], [1], [0, 0, 1, 1], [], []>} : vector<64x16xf32>, vector<16x128xf32>, vector<64x128xf32> -> vector<64x128xf32>
    %c0_5 = arith.constant 0 : index
    %c0_6 = arith.constant 0 : index
    %7 = vector.load %arg4[%c0_5, %c0_6] : memref<1x128xf32, #tpu.memory_space<vmem>>, vector<1x128xf32>
    %8 = vector.broadcast %7 : vector<1x128xf32> to vector<64x128xf32>
    %9 = arith.addf %6, %8 : vector<64x128xf32>
    %10 = vector.shape_cast %9 : vector<64x128xf32> to vector<8x8x128xf32>
    %c0_7 = arith.constant 0 : index
    %c0_8 = arith.constant 0 : index
    %c0_9 = arith.constant 0 : index
    %11 = vector.load %arg11[%c0_7, %c0_8, %c0_9] : memref<8x8x128xf32, #tpu.memory_space<vmem>>, vector<8x8x128xf32>
    tpu.vector_store %arg11[%c0_7, %c0_8, %c0_9], %10 {strides = array<i32>} : memref<8x8x128xf32, #tpu.memory_space<vmem>>, vector<8x8x128xf32>,
    %c0_i32_10 = arith.constant 0 : i32
    %12 = arith.index_cast %c0_i32_10 : i32 to index
    %c0_11 = arith.constant 0 : index
    %c0_12 = arith.constant 0 : index
    %13 = vector.load %arg11[%12, %c0_11, %c0_12] : memref<8x8x128xf32, #tpu.memory_space<vmem>>, vector<1x8x128xf32>
    %14 = vector.shape_cast %13 : vector<1x8x128xf32> to vector<8x128xf32>
    %c0_13 = arith.constant 0 : index
    %c0_14 = arith.constant 0 : index
    %c0_15 = arith.constant 0 : index
    %15 = vector.load %arg9[%c0_13, %c0_14, %c0_15] : memref<2x8x32xf32, #tpu.memory_space<vmem>>, vector<1x8x32xf32>
    %16 = vector.shape_cast %15 : vector<1x8x32xf32> to vector<8x32xf32>
    %c0_16 = arith.constant 0 : index
    %c0_17 = arith.constant 0 : index
    %17 = vector.load %arg3[%c0_16, %c0_17] : memref<32x128xf32, #tpu.memory_space<vmem>>, vector<32x128xf32>
    %cst_18 = arith.constant dense<0.000000e+00> : vector<8x128xf32>
    %18 = tpu.matmul %16, %17, %cst_18 {dimension_numbers = #tpu.dot_dimension_numbers<[1], [0], [0], [1], [0, 0, 1, 1], [], []>} : vector<8x32xf32>, vector<32x128xf32>, vector<8x128xf32> -> vector<8x128xf32>
    %19 = arith.addf %14, %18 : vector<8x128xf32>
    %c0_19 = arith.constant 0 : index
    %c0_20 = arith.constant 0 : index
    %c0_21 = arith.constant 0 : index
    %20 = vector.load %arg10[%c0_19, %c0_20, %c0_21] : memref<2x8x32xf32, #tpu.memory_space<vmem>>, vector<1x8x32xf32>
    %21 = vector.shape_cast %20 : vector<1x8x32xf32> to vector<8x32xf32>
    %22 = vector.extract_strided_slice %19 {offsets = [0, 0], sizes = [8, 96], strides = [1, 1]} : vector<8x128xf32> to vector<8x96xf32>
    %23 = arith.negf %22 : vector<8x96xf32>
    %24 = math.exp %23 : vector<8x96xf32>
    %cst_22 = arith.constant 1.000000e+00 : f32
    %25 = vector.broadcast %cst_22 : f32 to vector<8x96xf32>
    %26 = arith.addf %25, %24 : vector<8x96xf32>
    %27 = arith.divf %25, %26 : vector<8x96xf32>
    %28 = vector.extract_strided_slice %27 {offsets = [0, 0], sizes = [8, 32], strides = [1, 1]} : vector<8x96xf32> to vector<8x32xf32>
    %29 = vector.extract_strided_slice %27 {offsets = [0, 32], sizes = [8, 32], strides = [1, 1]} : vector<8x96xf32> to vector<8x32xf32>
    %30 = vector.extract_strided_slice %27 {offsets = [0, 64], sizes = [8, 32], strides = [1, 1]} : vector<8x96xf32> to vector<8x32xf32>
    %31 = vector.extract_strided_slice %19 {offsets = [0, 96], sizes = [8, 32], strides = [1, 1]} : vector<8x128xf32> to vector<8x32xf32>
    %32 = math.tanh %31 : vector<8x32xf32>
    %33 = arith.mulf %29, %21 : vector<8x32xf32>
    %34 = arith.mulf %28, %32 : vector<8x32xf32>
    %35 = arith.addf %33, %34 : vector<8x32xf32>
    %36 = math.tanh %35 : vector<8x32xf32>
    %37 = arith.mulf %30, %36 : vector<8x32xf32>
    %c0_23 = arith.constant 0 : index
    %c0_24 = arith.constant 0 : index
    %c0_25 = arith.constant 0 : index
    %38 = vector.load %arg9[%c0_23, %c0_24, %c0_25] : memref<2x8x32xf32, #tpu.memory_space<vmem>>, vector<1x8x32xf32>
    %39 = vector.shape_cast %38 : vector<1x8x32xf32> to vector<8x32xf32>
    %40 = vector.shape_cast %37 : vector<8x32xf32> to vector<1x8x32xf32>
    tpu.vector_store %arg9[%c0_23, %c0_24, %c0_25], %40 {strides = array<i32>} : memref<2x8x32xf32, #tpu.memory_space<vmem>>, vector<1x8x32xf32>,
    %c0_26 = arith.constant 0 : index
    %c0_27 = arith.constant 0 : index
    %c0_28 = arith.constant 0 : index
    %41 = vector.load %arg10[%c0_26, %c0_27, %c0_28] : memref<2x8x32xf32, #tpu.memory_space<vmem>>, vector<1x8x32xf32>
    %42 = vector.shape_cast %41 : vector<1x8x32xf32> to vector<8x32xf32>
    %43 = vector.shape_cast %35 : vector<8x32xf32> to vector<1x8x32xf32>
    tpu.vector_store %arg10[%c0_26, %c0_27, %c0_28], %43 {strides = array<i32>} : memref<2x8x32xf32, #tpu.memory_space<vmem>>, vector<1x8x32xf32>,
    %c0_29 = arith.constant 0 : index
    %c0_30 = arith.constant 0 : index
    %44 = vector.load %arg5[%c0_29, %c0_30] : memref<32x128xf32, #tpu.memory_space<vmem>>, vector<32x128xf32>
    %cst_31 = arith.constant dense<0.000000e+00> : vector<8x128xf32>
    %45 = tpu.matmul %37, %44, %cst_31 {dimension_numbers = #tpu.dot_dimension_numbers<[1], [0], [0], [1], [0, 0, 1, 1], [], []>} : vector<8x32xf32>, vector<32x128xf32>, vector<8x128xf32> -> vector<8x128xf32>
    %c1 = arith.constant 1 : index
    %c0_32 = arith.constant 0 : index
    %c0_33 = arith.constant 0 : index
    %46 = vector.load %arg9[%c1, %c0_32, %c0_33] : memref<2x8x32xf32, #tpu.memory_space<vmem>>, vector<1x8x32xf32>
    %47 = vector.shape_cast %46 : vector<1x8x32xf32> to vector<8x32xf32>
    %c0_34 = arith.constant 0 : index
    %c0_35 = arith.constant 0 : index
    %48 = vector.load %arg6[%c0_34, %c0_35] : memref<32x128xf32, #tpu.memory_space<vmem>>, vector<32x128xf32>
    %cst_36 = arith.constant dense<0.000000e+00> : vector<8x128xf32>
    %49 = tpu.matmul %47, %48, %cst_36 {dimension_numbers = #tpu.dot_dimension_numbers<[1], [0], [0], [1], [0, 0, 1, 1], [], []>} : vector<8x32xf32>, vector<32x128xf32>, vector<8x128xf32> -> vector<8x128xf32>
    %50 = arith.addf %45, %49 : vector<8x128xf32>
    %c0_37 = arith.constant 0 : index
    %c0_38 = arith.constant 0 : index
    %51 = vector.load %arg7[%c0_37, %c0_38] : memref<1x128xf32, #tpu.memory_space<vmem>>, vector<1x128xf32>
    %52 = vector.broadcast %51 : vector<1x128xf32> to vector<8x128xf32>
    %53 = arith.addf %50, %52 : vector<8x128xf32>
    %c1_39 = arith.constant 1 : index
    %c0_40 = arith.constant 0 : index
    %c0_41 = arith.constant 0 : index
    %54 = vector.load %arg10[%c1_39, %c0_40, %c0_41] : memref<2x8x32xf32, #tpu.memory_space<vmem>>, vector<1x8x32xf32>
    %55 = vector.shape_cast %54 : vector<1x8x32xf32> to vector<8x32xf32>
    %56 = vector.extract_strided_slice %53 {offsets = [0, 0], sizes = [8, 96], strides = [1, 1]} : vector<8x128xf32> to vector<8x96xf32>
    %57 = arith.negf %56 : vector<8x96xf32>
    %58 = math.exp %57 : vector<8x96xf32>
    %cst_42 = arith.constant 1.000000e+00 : f32
    %59 = vector.broadcast %cst_42 : f32 to vector<8x96xf32>
    %60 = arith.addf %59, %58 : vector<8x96xf32>
    %61 = arith.divf %59, %60 : vector<8x96xf32>
    %62 = vector.extract_strided_slice %61 {offsets = [0, 0], sizes = [8, 32], strides = [1, 1]} : vector<8x96xf32> to vector<8x32xf32>
    %63 = vector.extract_strided_slice %61 {offsets = [0, 32], sizes = [8, 32], strides = [1, 1]} : vector<8x96xf32> to vector<8x32xf32>
    %64 = vector.extract_strided_slice %61 {offsets = [0, 64], sizes = [8, 32], strides = [1, 1]} : vector<8x96xf32> to vector<8x32xf32>
    %65 = vector.extract_strided_slice %53 {offsets = [0, 96], sizes = [8, 32], strides = [1, 1]} : vector<8x128xf32> to vector<8x32xf32>
    %66 = math.tanh %65 : vector<8x32xf32>
    %67 = arith.mulf %63, %55 : vector<8x32xf32>
    %68 = arith.mulf %62, %66 : vector<8x32xf32>
    %69 = arith.addf %67, %68 : vector<8x32xf32>
    %70 = math.tanh %69 : vector<8x32xf32>
    %71 = arith.mulf %64, %70 : vector<8x32xf32>
    %c1_43 = arith.constant 1 : index
    %c0_44 = arith.constant 0 : index
    %c0_45 = arith.constant 0 : index
    %72 = vector.load %arg9[%c1_43, %c0_44, %c0_45] : memref<2x8x32xf32, #tpu.memory_space<vmem>>, vector<1x8x32xf32>
    %73 = vector.shape_cast %72 : vector<1x8x32xf32> to vector<8x32xf32>
    %74 = vector.shape_cast %71 : vector<8x32xf32> to vector<1x8x32xf32>
    tpu.vector_store %arg9[%c1_43, %c0_44, %c0_45], %74 {strides = array<i32>} : memref<2x8x32xf32, #tpu.memory_space<vmem>>, vector<1x8x32xf32>,
    %c1_46 = arith.constant 1 : index
    %c0_47 = arith.constant 0 : index
    %c0_48 = arith.constant 0 : index
    %75 = vector.load %arg10[%c1_46, %c0_47, %c0_48] : memref<2x8x32xf32, #tpu.memory_space<vmem>>, vector<1x8x32xf32>
    %76 = vector.shape_cast %75 : vector<1x8x32xf32> to vector<8x32xf32>
    %77 = vector.shape_cast %69 : vector<8x32xf32> to vector<1x8x32xf32>
    tpu.vector_store %arg10[%c1_46, %c0_47, %c0_48], %77 {strides = array<i32>} : memref<2x8x32xf32, #tpu.memory_space<vmem>>, vector<1x8x32xf32>,
    %78 = arith.index_cast %c0_i32_10 : i32 to index
    %c0_49 = arith.constant 0 : index
    %c0_50 = arith.constant 0 : index
    %79 = vector.load %arg8[%78, %c0_49, %c0_50] : memref<8x8x32xf32, #tpu.memory_space<vmem>>, vector<1x8x32xf32>
    %80 = vector.shape_cast %79 : vector<1x8x32xf32> to vector<8x32xf32>
    %81 = vector.shape_cast %71 : vector<8x32xf32> to vector<1x8x32xf32>
    tpu.vector_store %arg8[%78, %c0_49, %c0_50], %81 {strides = array<i32>} : memref<8x8x32xf32, #tpu.memory_space<vmem>>, vector<1x8x32xf32>,
    %c1_i32 = arith.constant 1 : i32
    %82 = arith.index_cast %c1_i32 : i32 to index
    %c0_51 = arith.constant 0 : index
    %c0_52 = arith.constant 0 : index
    %83 = vector.load %arg11[%82, %c0_51, %c0_52] : memref<8x8x128xf32, #tpu.memory_space<vmem>>, vector<1x8x128xf32>
    %84 = vector.shape_cast %83 : vector<1x8x128xf32> to vector<8x128xf32>
    %c0_53 = arith.constant 0 : index
    %c0_54 = arith.constant 0 : index
    %c0_55 = arith.constant 0 : index
    %85 = vector.load %arg9[%c0_53, %c0_54, %c0_55] : memref<2x8x32xf32, #tpu.memory_space<vmem>>, vector<1x8x32xf32>
    %86 = vector.shape_cast %85 : vector<1x8x32xf32> to vector<8x32xf32>
    %c0_56 = arith.constant 0 : index
    %c0_57 = arith.constant 0 : index
    %87 = vector.load %arg3[%c0_56, %c0_57] : memref<32x128xf32, #tpu.memory_space<vmem>>, vector<32x128xf32>
    %cst_58 = arith.constant dense<0.000000e+00> : vector<8x128xf32>
    %88 = tpu.matmul %86, %87, %cst_58 {dimension_numbers = #tpu.dot_dimension_numbers<[1], [0], [0], [1], [0, 0, 1, 1], [], []>} : vector<8x32xf32>, vector<32x128xf32>, vector<8x128xf32> -> vector<8x128xf32>
    %89 = arith.addf %84, %88 : vector<8x128xf32>
    %c0_59 = arith.constant 0 : index
    %c0_60 = arith.constant 0 : index
    %c0_61 = arith.constant 0 : index
    %90 = vector.load %arg10[%c0_59, %c0_60, %c0_61] : memref<2x8x32xf32, #tpu.memory_space<vmem>>, vector<1x8x32xf32>
    %91 = vector.shape_cast %90 : vector<1x8x32xf32> to vector<8x32xf32>
    %92 = vector.extract_strided_slice %89 {offsets = [0, 0], sizes = [8, 96], strides = [1, 1]} : vector<8x128xf32> to vector<8x96xf32>
    %93 = arith.negf %92 : vector<8x96xf32>
    %94 = math.exp %93 : vector<8x96xf32>
    %cst_62 = arith.constant 1.000000e+00 : f32
    %95 = vector.broadcast %cst_62 : f32 to vector<8x96xf32>
    %96 = arith.addf %95, %94 : vector<8x96xf32>
    %97 = arith.divf %95, %96 : vector<8x96xf32>
    %98 = vector.extract_strided_slice %97 {offsets = [0, 0], sizes = [8, 32], strides = [1, 1]} : vector<8x96xf32> to vector<8x32xf32>
    %99 = vector.extract_strided_slice %97 {offsets = [0, 32], sizes = [8, 32], strides = [1, 1]} : vector<8x96xf32> to vector<8x32xf32>
    %100 = vector.extract_strided_slice %97 {offsets = [0, 64], sizes = [8, 32], strides = [1, 1]} : vector<8x96xf32> to vector<8x32xf32>
    %101 = vector.extract_strided_slice %89 {offsets = [0, 96], sizes = [8, 32], strides = [1, 1]} : vector<8x128xf32> to vector<8x32xf32>
    %102 = math.tanh %101 : vector<8x32xf32>
    %103 = arith.mulf %99, %91 : vector<8x32xf32>
    %104 = arith.mulf %98, %102 : vector<8x32xf32>
    %105 = arith.addf %103, %104 : vector<8x32xf32>
    %106 = math.tanh %105 : vector<8x32xf32>
    %107 = arith.mulf %100, %106 : vector<8x32xf32>
    %c0_63 = arith.constant 0 : index
    %c0_64 = arith.constant 0 : index
    %c0_65 = arith.constant 0 : index
    %108 = vector.load %arg9[%c0_63, %c0_64, %c0_65] : memref<2x8x32xf32, #tpu.memory_space<vmem>>, vector<1x8x32xf32>
    %109 = vector.shape_cast %108 : vector<1x8x32xf32> to vector<8x32xf32>
    %110 = vector.shape_cast %107 : vector<8x32xf32> to vector<1x8x32xf32>
    tpu.vector_store %arg9[%c0_63, %c0_64, %c0_65], %110 {strides = array<i32>} : memref<2x8x32xf32, #tpu.memory_space<vmem>>, vector<1x8x32xf32>,
    %c0_66 = arith.constant 0 : index
    %c0_67 = arith.constant 0 : index
    %c0_68 = arith.constant 0 : index
    %111 = vector.load %arg10[%c0_66, %c0_67, %c0_68] : memref<2x8x32xf32, #tpu.memory_space<vmem>>, vector<1x8x32xf32>
    %112 = vector.shape_cast %111 : vector<1x8x32xf32> to vector<8x32xf32>
    %113 = vector.shape_cast %105 : vector<8x32xf32> to vector<1x8x32xf32>
    tpu.vector_store %arg10[%c0_66, %c0_67, %c0_68], %113 {strides = array<i32>} : memref<2x8x32xf32, #tpu.memory_space<vmem>>, vector<1x8x32xf32>,
    %c0_69 = arith.constant 0 : index
    %c0_70 = arith.constant 0 : index
    %114 = vector.load %arg5[%c0_69, %c0_70] : memref<32x128xf32, #tpu.memory_space<vmem>>, vector<32x128xf32>
    %cst_71 = arith.constant dense<0.000000e+00> : vector<8x128xf32>
    %115 = tpu.matmul %107, %114, %cst_71 {dimension_numbers = #tpu.dot_dimension_numbers<[1], [0], [0], [1], [0, 0, 1, 1], [], []>} : vector<8x32xf32>, vector<32x128xf32>, vector<8x128xf32> -> vector<8x128xf32>
    %c1_72 = arith.constant 1 : index
    %c0_73 = arith.constant 0 : index
    %c0_74 = arith.constant 0 : index
    %116 = vector.load %arg9[%c1_72, %c0_73, %c0_74] : memref<2x8x32xf32, #tpu.memory_space<vmem>>, vector<1x8x32xf32>
    %117 = vector.shape_cast %116 : vector<1x8x32xf32> to vector<8x32xf32>
    %c0_75 = arith.constant 0 : index
    %c0_76 = arith.constant 0 : index
    %118 = vector.load %arg6[%c0_75, %c0_76] : memref<32x128xf32, #tpu.memory_space<vmem>>, vector<32x128xf32>
    %cst_77 = arith.constant dense<0.000000e+00> : vector<8x128xf32>
    %119 = tpu.matmul %117, %118, %cst_77 {dimension_numbers = #tpu.dot_dimension_numbers<[1], [0], [0], [1], [0, 0, 1, 1], [], []>} : vector<8x32xf32>, vector<32x128xf32>, vector<8x128xf32> -> vector<8x128xf32>
    %120 = arith.addf %115, %119 : vector<8x128xf32>
    %c0_78 = arith.constant 0 : index
    %c0_79 = arith.constant 0 : index
    %121 = vector.load %arg7[%c0_78, %c0_79] : memref<1x128xf32, #tpu.memory_space<vmem>>, vector<1x128xf32>
    %122 = vector.broadcast %121 : vector<1x128xf32> to vector<8x128xf32>
    %123 = arith.addf %120, %122 : vector<8x128xf32>
    %c1_80 = arith.constant 1 : index
    %c0_81 = arith.constant 0 : index
    %c0_82 = arith.constant 0 : index
    %124 = vector.load %arg10[%c1_80, %c0_81, %c0_82] : memref<2x8x32xf32, #tpu.memory_space<vmem>>, vector<1x8x32xf32>
    %125 = vector.shape_cast %124 : vector<1x8x32xf32> to vector<8x32xf32>
    %126 = vector.extract_strided_slice %123 {offsets = [0, 0], sizes = [8, 96], strides = [1, 1]} : vector<8x128xf32> to vector<8x96xf32>
    %127 = arith.negf %126 : vector<8x96xf32>
    %128 = math.exp %127 : vector<8x96xf32>
    %cst_83 = arith.constant 1.000000e+00 : f32
    %129 = vector.broadcast %cst_83 : f32 to vector<8x96xf32>
    %130 = arith.addf %129, %128 : vector<8x96xf32>
    %131 = arith.divf %129, %130 : vector<8x96xf32>
    %132 = vector.extract_strided_slice %131 {offsets = [0, 0], sizes = [8, 32], strides = [1, 1]} : vector<8x96xf32> to vector<8x32xf32>
    %133 = vector.extract_strided_slice %131 {offsets = [0, 32], sizes = [8, 32], strides = [1, 1]} : vector<8x96xf32> to vector<8x32xf32>
    %134 = vector.extract_strided_slice %131 {offsets = [0, 64], sizes = [8, 32], strides = [1, 1]} : vector<8x96xf32> to vector<8x32xf32>
    %135 = vector.extract_strided_slice %123 {offsets = [0, 96], sizes = [8, 32], strides = [1, 1]} : vector<8x128xf32> to vector<8x32xf32>
    %136 = math.tanh %135 : vector<8x32xf32>
    %137 = arith.mulf %133, %125 : vector<8x32xf32>
    %138 = arith.mulf %132, %136 : vector<8x32xf32>
    %139 = arith.addf %137, %138 : vector<8x32xf32>
    %140 = math.tanh %139 : vector<8x32xf32>
    %141 = arith.mulf %134, %140 : vector<8x32xf32>
    %c1_84 = arith.constant 1 : index
    %c0_85 = arith.constant 0 : index
    %c0_86 = arith.constant 0 : index
    %142 = vector.load %arg9[%c1_84, %c0_85, %c0_86] : memref<2x8x32xf32, #tpu.memory_space<vmem>>, vector<1x8x32xf32>
    %143 = vector.shape_cast %142 : vector<1x8x32xf32> to vector<8x32xf32>
    %144 = vector.shape_cast %141 : vector<8x32xf32> to vector<1x8x32xf32>
    tpu.vector_store %arg9[%c1_84, %c0_85, %c0_86], %144 {strides = array<i32>} : memref<2x8x32xf32, #tpu.memory_space<vmem>>, vector<1x8x32xf32>,
    %c1_87 = arith.constant 1 : index
    %c0_88 = arith.constant 0 : index
    %c0_89 = arith.constant 0 : index
    %145 = vector.load %arg10[%c1_87, %c0_88, %c0_89] : memref<2x8x32xf32, #tpu.memory_space<vmem>>, vector<1x8x32xf32>
    %146 = vector.shape_cast %145 : vector<1x8x32xf32> to vector<8x32xf32>
    %147 = vector.shape_cast %139 : vector<8x32xf32> to vector<1x8x32xf32>
    tpu.vector_store %arg10[%c1_87, %c0_88, %c0_89], %147 {strides = array<i32>} : memref<2x8x32xf32, #tpu.memory_space<vmem>>, vector<1x8x32xf32>,
    %148 = arith.index_cast %c1_i32 : i32 to index
    %c0_90 = arith.constant 0 : index
    %c0_91 = arith.constant 0 : index
    %149 = vector.load %arg8[%148, %c0_90, %c0_91] : memref<8x8x32xf32, #tpu.memory_space<vmem>>, vector<1x8x32xf32>
    %150 = vector.shape_cast %149 : vector<1x8x32xf32> to vector<8x32xf32>
    %151 = vector.shape_cast %141 : vector<8x32xf32> to vector<1x8x32xf32>
    tpu.vector_store %arg8[%148, %c0_90, %c0_91], %151 {strides = array<i32>} : memref<8x8x32xf32, #tpu.memory_space<vmem>>, vector<1x8x32xf32>,
    %c2_i32 = arith.constant 2 : i32
    %152 = arith.index_cast %c2_i32 : i32 to index
    %c0_92 = arith.constant 0 : index
    %c0_93 = arith.constant 0 : index
    %153 = vector.load %arg11[%152, %c0_92, %c0_93] : memref<8x8x128xf32, #tpu.memory_space<vmem>>, vector<1x8x128xf32>
    %154 = vector.shape_cast %153 : vector<1x8x128xf32> to vector<8x128xf32>
    %c0_94 = arith.constant 0 : index
    %c0_95 = arith.constant 0 : index
    %c0_96 = arith.constant 0 : index
    %155 = vector.load %arg9[%c0_94, %c0_95, %c0_96] : memref<2x8x32xf32, #tpu.memory_space<vmem>>, vector<1x8x32xf32>
    %156 = vector.shape_cast %155 : vector<1x8x32xf32> to vector<8x32xf32>
    %c0_97 = arith.constant 0 : index
    %c0_98 = arith.constant 0 : index
    %157 = vector.load %arg3[%c0_97, %c0_98] : memref<32x128xf32, #tpu.memory_space<vmem>>, vector<32x128xf32>
    %cst_99 = arith.constant dense<0.000000e+00> : vector<8x128xf32>
    %158 = tpu.matmul %156, %157, %cst_99 {dimension_numbers = #tpu.dot_dimension_numbers<[1], [0], [0], [1], [0, 0, 1, 1], [], []>} : vector<8x32xf32>, vector<32x128xf32>, vector<8x128xf32> -> vector<8x128xf32>
    %159 = arith.addf %154, %158 : vector<8x128xf32>
    %c0_100 = arith.constant 0 : index
    %c0_101 = arith.constant 0 : index
    %c0_102 = arith.constant 0 : index
    %160 = vector.load %arg10[%c0_100, %c0_101, %c0_102] : memref<2x8x32xf32, #tpu.memory_space<vmem>>, vector<1x8x32xf32>
    %161 = vector.shape_cast %160 : vector<1x8x32xf32> to vector<8x32xf32>
    %162 = vector.extract_strided_slice %159 {offsets = [0, 0], sizes = [8, 96], strides = [1, 1]} : vector<8x128xf32> to vector<8x96xf32>
    %163 = arith.negf %162 : vector<8x96xf32>
    %164 = math.exp %163 : vector<8x96xf32>
    %cst_103 = arith.constant 1.000000e+00 : f32
    %165 = vector.broadcast %cst_103 : f32 to vector<8x96xf32>
    %166 = arith.addf %165, %164 : vector<8x96xf32>
    %167 = arith.divf %165, %166 : vector<8x96xf32>
    %168 = vector.extract_strided_slice %167 {offsets = [0, 0], sizes = [8, 32], strides = [1, 1]} : vector<8x96xf32> to vector<8x32xf32>
    %169 = vector.extract_strided_slice %167 {offsets = [0, 32], sizes = [8, 32], strides = [1, 1]} : vector<8x96xf32> to vector<8x32xf32>
    %170 = vector.extract_strided_slice %167 {offsets = [0, 64], sizes = [8, 32], strides = [1, 1]} : vector<8x96xf32> to vector<8x32xf32>
    %171 = vector.extract_strided_slice %159 {offsets = [0, 96], sizes = [8, 32], strides = [1, 1]} : vector<8x128xf32> to vector<8x32xf32>
    %172 = math.tanh %171 : vector<8x32xf32>
    %173 = arith.mulf %169, %161 : vector<8x32xf32>
    %174 = arith.mulf %168, %172 : vector<8x32xf32>
    %175 = arith.addf %173, %174 : vector<8x32xf32>
    %176 = math.tanh %175 : vector<8x32xf32>
    %177 = arith.mulf %170, %176 : vector<8x32xf32>
    %c0_104 = arith.constant 0 : index
    %c0_105 = arith.constant 0 : index
    %c0_106 = arith.constant 0 : index
    %178 = vector.load %arg9[%c0_104, %c0_105, %c0_106] : memref<2x8x32xf32, #tpu.memory_space<vmem>>, vector<1x8x32xf32>
    %179 = vector.shape_cast %178 : vector<1x8x32xf32> to vector<8x32xf32>
    %180 = vector.shape_cast %177 : vector<8x32xf32> to vector<1x8x32xf32>
    tpu.vector_store %arg9[%c0_104, %c0_105, %c0_106], %180 {strides = array<i32>} : memref<2x8x32xf32, #tpu.memory_space<vmem>>, vector<1x8x32xf32>,
    %c0_107 = arith.constant 0 : index
    %c0_108 = arith.constant 0 : index
    %c0_109 = arith.constant 0 : index
    %181 = vector.load %arg10[%c0_107, %c0_108, %c0_109] : memref<2x8x32xf32, #tpu.memory_space<vmem>>, vector<1x8x32xf32>
    %182 = vector.shape_cast %181 : vector<1x8x32xf32> to vector<8x32xf32>
    %183 = vector.shape_cast %175 : vector<8x32xf32> to vector<1x8x32xf32>
    tpu.vector_store %arg10[%c0_107, %c0_108, %c0_109], %183 {strides = array<i32>} : memref<2x8x32xf32, #tpu.memory_space<vmem>>, vector<1x8x32xf32>,
    %c0_110 = arith.constant 0 : index
    %c0_111 = arith.constant 0 : index
    %184 = vector.load %arg5[%c0_110, %c0_111] : memref<32x128xf32, #tpu.memory_space<vmem>>, vector<32x128xf32>
    %cst_112 = arith.constant dense<0.000000e+00> : vector<8x128xf32>
    %185 = tpu.matmul %177, %184, %cst_112 {dimension_numbers = #tpu.dot_dimension_numbers<[1], [0], [0], [1], [0, 0, 1, 1], [], []>} : vector<8x32xf32>, vector<32x128xf32>, vector<8x128xf32> -> vector<8x128xf32>
    %c1_113 = arith.constant 1 : index
    %c0_114 = arith.constant 0 : index
    %c0_115 = arith.constant 0 : index
    %186 = vector.load %arg9[%c1_113, %c0_114, %c0_115] : memref<2x8x32xf32, #tpu.memory_space<vmem>>, vector<1x8x32xf32>
    %187 = vector.shape_cast %186 : vector<1x8x32xf32> to vector<8x32xf32>
    %c0_116 = arith.constant 0 : index
    %c0_117 = arith.constant 0 : index
    %188 = vector.load %arg6[%c0_116, %c0_117] : memref<32x128xf32, #tpu.memory_space<vmem>>, vector<32x128xf32>
    %cst_118 = arith.constant dense<0.000000e+00> : vector<8x128xf32>
    %189 = tpu.matmul %187, %188, %cst_118 {dimension_numbers = #tpu.dot_dimension_numbers<[1], [0], [0], [1], [0, 0, 1, 1], [], []>} : vector<8x32xf32>, vector<32x128xf32>, vector<8x128xf32> -> vector<8x128xf32>
    %190 = arith.addf %185, %189 : vector<8x128xf32>
    %c0_119 = arith.constant 0 : index
    %c0_120 = arith.constant 0 : index
    %191 = vector.load %arg7[%c0_119, %c0_120] : memref<1x128xf32, #tpu.memory_space<vmem>>, vector<1x128xf32>
    %192 = vector.broadcast %191 : vector<1x128xf32> to vector<8x128xf32>
    %193 = arith.addf %190, %192 : vector<8x128xf32>
    %c1_121 = arith.constant 1 : index
    %c0_122 = arith.constant 0 : index
    %c0_123 = arith.constant 0 : index
    %194 = vector.load %arg10[%c1_121, %c0_122, %c0_123] : memref<2x8x32xf32, #tpu.memory_space<vmem>>, vector<1x8x32xf32>
    %195 = vector.shape_cast %194 : vector<1x8x32xf32> to vector<8x32xf32>
    %196 = vector.extract_strided_slice %193 {offsets = [0, 0], sizes = [8, 96], strides = [1, 1]} : vector<8x128xf32> to vector<8x96xf32>
    %197 = arith.negf %196 : vector<8x96xf32>
    %198 = math.exp %197 : vector<8x96xf32>
    %cst_124 = arith.constant 1.000000e+00 : f32
    %199 = vector.broadcast %cst_124 : f32 to vector<8x96xf32>
    %200 = arith.addf %199, %198 : vector<8x96xf32>
    %201 = arith.divf %199, %200 : vector<8x96xf32>
    %202 = vector.extract_strided_slice %201 {offsets = [0, 0], sizes = [8, 32], strides = [1, 1]} : vector<8x96xf32> to vector<8x32xf32>
    %203 = vector.extract_strided_slice %201 {offsets = [0, 32], sizes = [8, 32], strides = [1, 1]} : vector<8x96xf32> to vector<8x32xf32>
    %204 = vector.extract_strided_slice %201 {offsets = [0, 64], sizes = [8, 32], strides = [1, 1]} : vector<8x96xf32> to vector<8x32xf32>
    %205 = vector.extract_strided_slice %193 {offsets = [0, 96], sizes = [8, 32], strides = [1, 1]} : vector<8x128xf32> to vector<8x32xf32>
    %206 = math.tanh %205 : vector<8x32xf32>
    %207 = arith.mulf %203, %195 : vector<8x32xf32>
    %208 = arith.mulf %202, %206 : vector<8x32xf32>
    %209 = arith.addf %207, %208 : vector<8x32xf32>
    %210 = math.tanh %209 : vector<8x32xf32>
    %211 = arith.mulf %204, %210 : vector<8x32xf32>
    %c1_125 = arith.constant 1 : index
    %c0_126 = arith.constant 0 : index
    %c0_127 = arith.constant 0 : index
    %212 = vector.load %arg9[%c1_125, %c0_126, %c0_127] : memref<2x8x32xf32, #tpu.memory_space<vmem>>, vector<1x8x32xf32>
    %213 = vector.shape_cast %212 : vector<1x8x32xf32> to vector<8x32xf32>
    %214 = vector.shape_cast %211 : vector<8x32xf32> to vector<1x8x32xf32>
    tpu.vector_store %arg9[%c1_125, %c0_126, %c0_127], %214 {strides = array<i32>} : memref<2x8x32xf32, #tpu.memory_space<vmem>>, vector<1x8x32xf32>,
    %c1_128 = arith.constant 1 : index
    %c0_129 = arith.constant 0 : index
    %c0_130 = arith.constant 0 : index
    %215 = vector.load %arg10[%c1_128, %c0_129, %c0_130] : memref<2x8x32xf32, #tpu.memory_space<vmem>>, vector<1x8x32xf32>
    %216 = vector.shape_cast %215 : vector<1x8x32xf32> to vector<8x32xf32>
    %217 = vector.shape_cast %209 : vector<8x32xf32> to vector<1x8x32xf32>
    tpu.vector_store %arg10[%c1_128, %c0_129, %c0_130], %217 {strides = array<i32>} : memref<2x8x32xf32, #tpu.memory_space<vmem>>, vector<1x8x32xf32>,
    %218 = arith.index_cast %c2_i32 : i32 to index
    %c0_131 = arith.constant 0 : index
    %c0_132 = arith.constant 0 : index
    %219 = vector.load %arg8[%218, %c0_131, %c0_132] : memref<8x8x32xf32, #tpu.memory_space<vmem>>, vector<1x8x32xf32>
    %220 = vector.shape_cast %219 : vector<1x8x32xf32> to vector<8x32xf32>
    %221 = vector.shape_cast %211 : vector<8x32xf32> to vector<1x8x32xf32>
    tpu.vector_store %arg8[%218, %c0_131, %c0_132], %221 {strides = array<i32>} : memref<8x8x32xf32, #tpu.memory_space<vmem>>, vector<1x8x32xf32>,
    %c3_i32 = arith.constant 3 : i32
    %222 = arith.index_cast %c3_i32 : i32 to index
    %c0_133 = arith.constant 0 : index
    %c0_134 = arith.constant 0 : index
    %223 = vector.load %arg11[%222, %c0_133, %c0_134] : memref<8x8x128xf32, #tpu.memory_space<vmem>>, vector<1x8x128xf32>
    %224 = vector.shape_cast %223 : vector<1x8x128xf32> to vector<8x128xf32>
    %c0_135 = arith.constant 0 : index
    %c0_136 = arith.constant 0 : index
    %c0_137 = arith.constant 0 : index
    %225 = vector.load %arg9[%c0_135, %c0_136, %c0_137] : memref<2x8x32xf32, #tpu.memory_space<vmem>>, vector<1x8x32xf32>
    %226 = vector.shape_cast %225 : vector<1x8x32xf32> to vector<8x32xf32>
    %c0_138 = arith.constant 0 : index
    %c0_139 = arith.constant 0 : index
    %227 = vector.load %arg3[%c0_138, %c0_139] : memref<32x128xf32, #tpu.memory_space<vmem>>, vector<32x128xf32>
    %cst_140 = arith.constant dense<0.000000e+00> : vector<8x128xf32>
    %228 = tpu.matmul %226, %227, %cst_140 {dimension_numbers = #tpu.dot_dimension_numbers<[1], [0], [0], [1], [0, 0, 1, 1], [], []>} : vector<8x32xf32>, vector<32x128xf32>, vector<8x128xf32> -> vector<8x128xf32>
    %229 = arith.addf %224, %228 : vector<8x128xf32>
    %c0_141 = arith.constant 0 : index
    %c0_142 = arith.constant 0 : index
    %c0_143 = arith.constant 0 : index
    %230 = vector.load %arg10[%c0_141, %c0_142, %c0_143] : memref<2x8x32xf32, #tpu.memory_space<vmem>>, vector<1x8x32xf32>
    %231 = vector.shape_cast %230 : vector<1x8x32xf32> to vector<8x32xf32>
    %232 = vector.extract_strided_slice %229 {offsets = [0, 0], sizes = [8, 96], strides = [1, 1]} : vector<8x128xf32> to vector<8x96xf32>
    %233 = arith.negf %232 : vector<8x96xf32>
    %234 = math.exp %233 : vector<8x96xf32>
    %cst_144 = arith.constant 1.000000e+00 : f32
    %235 = vector.broadcast %cst_144 : f32 to vector<8x96xf32>
    %236 = arith.addf %235, %234 : vector<8x96xf32>
    %237 = arith.divf %235, %236 : vector<8x96xf32>
    %238 = vector.extract_strided_slice %237 {offsets = [0, 0], sizes = [8, 32], strides = [1, 1]} : vector<8x96xf32> to vector<8x32xf32>
    %239 = vector.extract_strided_slice %237 {offsets = [0, 32], sizes = [8, 32], strides = [1, 1]} : vector<8x96xf32> to vector<8x32xf32>
    %240 = vector.extract_strided_slice %237 {offsets = [0, 64], sizes = [8, 32], strides = [1, 1]} : vector<8x96xf32> to vector<8x32xf32>
    %241 = vector.extract_strided_slice %229 {offsets = [0, 96], sizes = [8, 32], strides = [1, 1]} : vector<8x128xf32> to vector<8x32xf32>
    %242 = math.tanh %241 : vector<8x32xf32>
    %243 = arith.mulf %239, %231 : vector<8x32xf32>
    %244 = arith.mulf %238, %242 : vector<8x32xf32>
    %245 = arith.addf %243, %244 : vector<8x32xf32>
    %246 = math.tanh %245 : vector<8x32xf32>
    %247 = arith.mulf %240, %246 : vector<8x32xf32>
    %c0_145 = arith.constant 0 : index
    %c0_146 = arith.constant 0 : index
    %c0_147 = arith.constant 0 : index
    %248 = vector.load %arg9[%c0_145, %c0_146, %c0_147] : memref<2x8x32xf32, #tpu.memory_space<vmem>>, vector<1x8x32xf32>
    %249 = vector.shape_cast %248 : vector<1x8x32xf32> to vector<8x32xf32>
    %250 = vector.shape_cast %247 : vector<8x32xf32> to vector<1x8x32xf32>
    tpu.vector_store %arg9[%c0_145, %c0_146, %c0_147], %250 {strides = array<i32>} : memref<2x8x32xf32, #tpu.memory_space<vmem>>, vector<1x8x32xf32>,
    %c0_148 = arith.constant 0 : index
    %c0_149 = arith.constant 0 : index
    %c0_150 = arith.constant 0 : index
    %251 = vector.load %arg10[%c0_148, %c0_149, %c0_150] : memref<2x8x32xf32, #tpu.memory_space<vmem>>, vector<1x8x32xf32>
    %252 = vector.shape_cast %251 : vector<1x8x32xf32> to vector<8x32xf32>
    %253 = vector.shape_cast %245 : vector<8x32xf32> to vector<1x8x32xf32>
    tpu.vector_store %arg10[%c0_148, %c0_149, %c0_150], %253 {strides = array<i32>} : memref<2x8x32xf32, #tpu.memory_space<vmem>>, vector<1x8x32xf32>,
    %c0_151 = arith.constant 0 : index
    %c0_152 = arith.constant 0 : index
    %254 = vector.load %arg5[%c0_151, %c0_152] : memref<32x128xf32, #tpu.memory_space<vmem>>, vector<32x128xf32>
    %cst_153 = arith.constant dense<0.000000e+00> : vector<8x128xf32>
    %255 = tpu.matmul %247, %254, %cst_153 {dimension_numbers = #tpu.dot_dimension_numbers<[1], [0], [0], [1], [0, 0, 1, 1], [], []>} : vector<8x32xf32>, vector<32x128xf32>, vector<8x128xf32> -> vector<8x128xf32>
    %c1_154 = arith.constant 1 : index
    %c0_155 = arith.constant 0 : index
    %c0_156 = arith.constant 0 : index
    %256 = vector.load %arg9[%c1_154, %c0_155, %c0_156] : memref<2x8x32xf32, #tpu.memory_space<vmem>>, vector<1x8x32xf32>
    %257 = vector.shape_cast %256 : vector<1x8x32xf32> to vector<8x32xf32>
    %c0_157 = arith.constant 0 : index
    %c0_158 = arith.constant 0 : index
    %258 = vector.load %arg6[%c0_157, %c0_158] : memref<32x128xf32, #tpu.memory_space<vmem>>, vector<32x128xf32>
    %cst_159 = arith.constant dense<0.000000e+00> : vector<8x128xf32>
    %259 = tpu.matmul %257, %258, %cst_159 {dimension_numbers = #tpu.dot_dimension_numbers<[1], [0], [0], [1], [0, 0, 1, 1], [], []>} : vector<8x32xf32>, vector<32x128xf32>, vector<8x128xf32> -> vector<8x128xf32>
    %260 = arith.addf %255, %259 : vector<8x128xf32>
    %c0_160 = arith.constant 0 : index
    %c0_161 = arith.constant 0 : index
    %261 = vector.load %arg7[%c0_160, %c0_161] : memref<1x128xf32, #tpu.memory_space<vmem>>, vector<1x128xf32>
    %262 = vector.broadcast %261 : vector<1x128xf32> to vector<8x128xf32>
    %263 = arith.addf %260, %262 : vector<8x128xf32>
    %c1_162 = arith.constant 1 : index
    %c0_163 = arith.constant 0 : index
    %c0_164 = arith.constant 0 : index
    %264 = vector.load %arg10[%c1_162, %c0_163, %c0_164] : memref<2x8x32xf32, #tpu.memory_space<vmem>>, vector<1x8x32xf32>
    %265 = vector.shape_cast %264 : vector<1x8x32xf32> to vector<8x32xf32>
    %266 = vector.extract_strided_slice %263 {offsets = [0, 0], sizes = [8, 96], strides = [1, 1]} : vector<8x128xf32> to vector<8x96xf32>
    %267 = arith.negf %266 : vector<8x96xf32>
    %268 = math.exp %267 : vector<8x96xf32>
    %cst_165 = arith.constant 1.000000e+00 : f32
    %269 = vector.broadcast %cst_165 : f32 to vector<8x96xf32>
    %270 = arith.addf %269, %268 : vector<8x96xf32>
    %271 = arith.divf %269, %270 : vector<8x96xf32>
    %272 = vector.extract_strided_slice %271 {offsets = [0, 0], sizes = [8, 32], strides = [1, 1]} : vector<8x96xf32> to vector<8x32xf32>
    %273 = vector.extract_strided_slice %271 {offsets = [0, 32], sizes = [8, 32], strides = [1, 1]} : vector<8x96xf32> to vector<8x32xf32>
    %274 = vector.extract_strided_slice %271 {offsets = [0, 64], sizes = [8, 32], strides = [1, 1]} : vector<8x96xf32> to vector<8x32xf32>
    %275 = vector.extract_strided_slice %263 {offsets = [0, 96], sizes = [8, 32], strides = [1, 1]} : vector<8x128xf32> to vector<8x32xf32>
    %276 = math.tanh %275 : vector<8x32xf32>
    %277 = arith.mulf %273, %265 : vector<8x32xf32>
    %278 = arith.mulf %272, %276 : vector<8x32xf32>
    %279 = arith.addf %277, %278 : vector<8x32xf32>
    %280 = math.tanh %279 : vector<8x32xf32>
    %281 = arith.mulf %274, %280 : vector<8x32xf32>
    %c1_166 = arith.constant 1 : index
    %c0_167 = arith.constant 0 : index
    %c0_168 = arith.constant 0 : index
    %282 = vector.load %arg9[%c1_166, %c0_167, %c0_168] : memref<2x8x32xf32, #tpu.memory_space<vmem>>, vector<1x8x32xf32>
    %283 = vector.shape_cast %282 : vector<1x8x32xf32> to vector<8x32xf32>
    %284 = vector.shape_cast %281 : vector<8x32xf32> to vector<1x8x32xf32>
    tpu.vector_store %arg9[%c1_166, %c0_167, %c0_168], %284 {strides = array<i32>} : memref<2x8x32xf32, #tpu.memory_space<vmem>>, vector<1x8x32xf32>,
    %c1_169 = arith.constant 1 : index
    %c0_170 = arith.constant 0 : index
    %c0_171 = arith.constant 0 : index
    %285 = vector.load %arg10[%c1_169, %c0_170, %c0_171] : memref<2x8x32xf32, #tpu.memory_space<vmem>>, vector<1x8x32xf32>
    %286 = vector.shape_cast %285 : vector<1x8x32xf32> to vector<8x32xf32>
    %287 = vector.shape_cast %279 : vector<8x32xf32> to vector<1x8x32xf32>
    tpu.vector_store %arg10[%c1_169, %c0_170, %c0_171], %287 {strides = array<i32>} : memref<2x8x32xf32, #tpu.memory_space<vmem>>, vector<1x8x32xf32>,
    %288 = arith.index_cast %c3_i32 : i32 to index
    %c0_172 = arith.constant 0 : index
    %c0_173 = arith.constant 0 : index
    %289 = vector.load %arg8[%288, %c0_172, %c0_173] : memref<8x8x32xf32, #tpu.memory_space<vmem>>, vector<1x8x32xf32>
    %290 = vector.shape_cast %289 : vector<1x8x32xf32> to vector<8x32xf32>
    %291 = vector.shape_cast %281 : vector<8x32xf32> to vector<1x8x32xf32>
    tpu.vector_store %arg8[%288, %c0_172, %c0_173], %291 {strides = array<i32>} : memref<8x8x32xf32, #tpu.memory_space<vmem>>, vector<1x8x32xf32>,
    %c4_i32 = arith.constant 4 : i32
    %292 = arith.index_cast %c4_i32 : i32 to index
    %c0_174 = arith.constant 0 : index
    %c0_175 = arith.constant 0 : index
    %293 = vector.load %arg11[%292, %c0_174, %c0_175] : memref<8x8x128xf32, #tpu.memory_space<vmem>>, vector<1x8x128xf32>
    %294 = vector.shape_cast %293 : vector<1x8x128xf32> to vector<8x128xf32>
    %c0_176 = arith.constant 0 : index
    %c0_177 = arith.constant 0 : index
    %c0_178 = arith.constant 0 : index
    %295 = vector.load %arg9[%c0_176, %c0_177, %c0_178] : memref<2x8x32xf32, #tpu.memory_space<vmem>>, vector<1x8x32xf32>
    %296 = vector.shape_cast %295 : vector<1x8x32xf32> to vector<8x32xf32>
    %c0_179 = arith.constant 0 : index
    %c0_180 = arith.constant 0 : index
    %297 = vector.load %arg3[%c0_179, %c0_180] : memref<32x128xf32, #tpu.memory_space<vmem>>, vector<32x128xf32>
    %cst_181 = arith.constant dense<0.000000e+00> : vector<8x128xf32>
    %298 = tpu.matmul %296, %297, %cst_181 {dimension_numbers = #tpu.dot_dimension_numbers<[1], [0], [0], [1], [0, 0, 1, 1], [], []>} : vector<8x32xf32>, vector<32x128xf32>, vector<8x128xf32> -> vector<8x128xf32>
    %299 = arith.addf %294, %298 : vector<8x128xf32>
    %c0_182 = arith.constant 0 : index
    %c0_183 = arith.constant 0 : index
    %c0_184 = arith.constant 0 : index
    %300 = vector.load %arg10[%c0_182, %c0_183, %c0_184] : memref<2x8x32xf32, #tpu.memory_space<vmem>>, vector<1x8x32xf32>
    %301 = vector.shape_cast %300 : vector<1x8x32xf32> to vector<8x32xf32>
    %302 = vector.extract_strided_slice %299 {offsets = [0, 0], sizes = [8, 96], strides = [1, 1]} : vector<8x128xf32> to vector<8x96xf32>
    %303 = arith.negf %302 : vector<8x96xf32>
    %304 = math.exp %303 : vector<8x96xf32>
    %cst_185 = arith.constant 1.000000e+00 : f32
    %305 = vector.broadcast %cst_185 : f32 to vector<8x96xf32>
    %306 = arith.addf %305, %304 : vector<8x96xf32>
    %307 = arith.divf %305, %306 : vector<8x96xf32>
    %308 = vector.extract_strided_slice %307 {offsets = [0, 0], sizes = [8, 32], strides = [1, 1]} : vector<8x96xf32> to vector<8x32xf32>
    %309 = vector.extract_strided_slice %307 {offsets = [0, 32], sizes = [8, 32], strides = [1, 1]} : vector<8x96xf32> to vector<8x32xf32>
    %310 = vector.extract_strided_slice %307 {offsets = [0, 64], sizes = [8, 32], strides = [1, 1]} : vector<8x96xf32> to vector<8x32xf32>
    %311 = vector.extract_strided_slice %299 {offsets = [0, 96], sizes = [8, 32], strides = [1, 1]} : vector<8x128xf32> to vector<8x32xf32>
    %312 = math.tanh %311 : vector<8x32xf32>
    %313 = arith.mulf %309, %301 : vector<8x32xf32>
    %314 = arith.mulf %308, %312 : vector<8x32xf32>
    %315 = arith.addf %313, %314 : vector<8x32xf32>
    %316 = math.tanh %315 : vector<8x32xf32>
    %317 = arith.mulf %310, %316 : vector<8x32xf32>
    %c0_186 = arith.constant 0 : index
    %c0_187 = arith.constant 0 : index
    %c0_188 = arith.constant 0 : index
    %318 = vector.load %arg9[%c0_186, %c0_187, %c0_188] : memref<2x8x32xf32, #tpu.memory_space<vmem>>, vector<1x8x32xf32>
    %319 = vector.shape_cast %318 : vector<1x8x32xf32> to vector<8x32xf32>
    %320 = vector.shape_cast %317 : vector<8x32xf32> to vector<1x8x32xf32>
    tpu.vector_store %arg9[%c0_186, %c0_187, %c0_188], %320 {strides = array<i32>} : memref<2x8x32xf32, #tpu.memory_space<vmem>>, vector<1x8x32xf32>,
    %c0_189 = arith.constant 0 : index
    %c0_190 = arith.constant 0 : index
    %c0_191 = arith.constant 0 : index
    %321 = vector.load %arg10[%c0_189, %c0_190, %c0_191] : memref<2x8x32xf32, #tpu.memory_space<vmem>>, vector<1x8x32xf32>
    %322 = vector.shape_cast %321 : vector<1x8x32xf32> to vector<8x32xf32>
    %323 = vector.shape_cast %315 : vector<8x32xf32> to vector<1x8x32xf32>
    tpu.vector_store %arg10[%c0_189, %c0_190, %c0_191], %323 {strides = array<i32>} : memref<2x8x32xf32, #tpu.memory_space<vmem>>, vector<1x8x32xf32>,
    %c0_192 = arith.constant 0 : index
    %c0_193 = arith.constant 0 : index
    %324 = vector.load %arg5[%c0_192, %c0_193] : memref<32x128xf32, #tpu.memory_space<vmem>>, vector<32x128xf32>
    %cst_194 = arith.constant dense<0.000000e+00> : vector<8x128xf32>
    %325 = tpu.matmul %317, %324, %cst_194 {dimension_numbers = #tpu.dot_dimension_numbers<[1], [0], [0], [1], [0, 0, 1, 1], [], []>} : vector<8x32xf32>, vector<32x128xf32>, vector<8x128xf32> -> vector<8x128xf32>
    %c1_195 = arith.constant 1 : index
    %c0_196 = arith.constant 0 : index
    %c0_197 = arith.constant 0 : index
    %326 = vector.load %arg9[%c1_195, %c0_196, %c0_197] : memref<2x8x32xf32, #tpu.memory_space<vmem>>, vector<1x8x32xf32>
    %327 = vector.shape_cast %326 : vector<1x8x32xf32> to vector<8x32xf32>
    %c0_198 = arith.constant 0 : index
    %c0_199 = arith.constant 0 : index
    %328 = vector.load %arg6[%c0_198, %c0_199] : memref<32x128xf32, #tpu.memory_space<vmem>>, vector<32x128xf32>
    %cst_200 = arith.constant dense<0.000000e+00> : vector<8x128xf32>
    %329 = tpu.matmul %327, %328, %cst_200 {dimension_numbers = #tpu.dot_dimension_numbers<[1], [0], [0], [1], [0, 0, 1, 1], [], []>} : vector<8x32xf32>, vector<32x128xf32>, vector<8x128xf32> -> vector<8x128xf32>
    %330 = arith.addf %325, %329 : vector<8x128xf32>
    %c0_201 = arith.constant 0 : index
    %c0_202 = arith.constant 0 : index
    %331 = vector.load %arg7[%c0_201, %c0_202] : memref<1x128xf32, #tpu.memory_space<vmem>>, vector<1x128xf32>
    %332 = vector.broadcast %331 : vector<1x128xf32> to vector<8x128xf32>
    %333 = arith.addf %330, %332 : vector<8x128xf32>
    %c1_203 = arith.constant 1 : index
    %c0_204 = arith.constant 0 : index
    %c0_205 = arith.constant 0 : index
    %334 = vector.load %arg10[%c1_203, %c0_204, %c0_205] : memref<2x8x32xf32, #tpu.memory_space<vmem>>, vector<1x8x32xf32>
    %335 = vector.shape_cast %334 : vector<1x8x32xf32> to vector<8x32xf32>
    %336 = vector.extract_strided_slice %333 {offsets = [0, 0], sizes = [8, 96], strides = [1, 1]} : vector<8x128xf32> to vector<8x96xf32>
    %337 = arith.negf %336 : vector<8x96xf32>
    %338 = math.exp %337 : vector<8x96xf32>
    %cst_206 = arith.constant 1.000000e+00 : f32
    %339 = vector.broadcast %cst_206 : f32 to vector<8x96xf32>
    %340 = arith.addf %339, %338 : vector<8x96xf32>
    %341 = arith.divf %339, %340 : vector<8x96xf32>
    %342 = vector.extract_strided_slice %341 {offsets = [0, 0], sizes = [8, 32], strides = [1, 1]} : vector<8x96xf32> to vector<8x32xf32>
    %343 = vector.extract_strided_slice %341 {offsets = [0, 32], sizes = [8, 32], strides = [1, 1]} : vector<8x96xf32> to vector<8x32xf32>
    %344 = vector.extract_strided_slice %341 {offsets = [0, 64], sizes = [8, 32], strides = [1, 1]} : vector<8x96xf32> to vector<8x32xf32>
    %345 = vector.extract_strided_slice %333 {offsets = [0, 96], sizes = [8, 32], strides = [1, 1]} : vector<8x128xf32> to vector<8x32xf32>
    %346 = math.tanh %345 : vector<8x32xf32>
    %347 = arith.mulf %343, %335 : vector<8x32xf32>
    %348 = arith.mulf %342, %346 : vector<8x32xf32>
    %349 = arith.addf %347, %348 : vector<8x32xf32>
    %350 = math.tanh %349 : vector<8x32xf32>
    %351 = arith.mulf %344, %350 : vector<8x32xf32>
    %c1_207 = arith.constant 1 : index
    %c0_208 = arith.constant 0 : index
    %c0_209 = arith.constant 0 : index
    %352 = vector.load %arg9[%c1_207, %c0_208, %c0_209] : memref<2x8x32xf32, #tpu.memory_space<vmem>>, vector<1x8x32xf32>
    %353 = vector.shape_cast %352 : vector<1x8x32xf32> to vector<8x32xf32>
    %354 = vector.shape_cast %351 : vector<8x32xf32> to vector<1x8x32xf32>
    tpu.vector_store %arg9[%c1_207, %c0_208, %c0_209], %354 {strides = array<i32>} : memref<2x8x32xf32, #tpu.memory_space<vmem>>, vector<1x8x32xf32>,
    %c1_210 = arith.constant 1 : index
    %c0_211 = arith.constant 0 : index
    %c0_212 = arith.constant 0 : index
    %355 = vector.load %arg10[%c1_210, %c0_211, %c0_212] : memref<2x8x32xf32, #tpu.memory_space<vmem>>, vector<1x8x32xf32>
    %356 = vector.shape_cast %355 : vector<1x8x32xf32> to vector<8x32xf32>
    %357 = vector.shape_cast %349 : vector<8x32xf32> to vector<1x8x32xf32>
    tpu.vector_store %arg10[%c1_210, %c0_211, %c0_212], %357 {strides = array<i32>} : memref<2x8x32xf32, #tpu.memory_space<vmem>>, vector<1x8x32xf32>,
    %358 = arith.index_cast %c4_i32 : i32 to index
    %c0_213 = arith.constant 0 : index
    %c0_214 = arith.constant 0 : index
    %359 = vector.load %arg8[%358, %c0_213, %c0_214] : memref<8x8x32xf32, #tpu.memory_space<vmem>>, vector<1x8x32xf32>
    %360 = vector.shape_cast %359 : vector<1x8x32xf32> to vector<8x32xf32>
    %361 = vector.shape_cast %351 : vector<8x32xf32> to vector<1x8x32xf32>
    tpu.vector_store %arg8[%358, %c0_213, %c0_214], %361 {strides = array<i32>} : memref<8x8x32xf32, #tpu.memory_space<vmem>>, vector<1x8x32xf32>,
    %c5_i32 = arith.constant 5 : i32
    %362 = arith.index_cast %c5_i32 : i32 to index
    %c0_215 = arith.constant 0 : index
    %c0_216 = arith.constant 0 : index
    %363 = vector.load %arg11[%362, %c0_215, %c0_216] : memref<8x8x128xf32, #tpu.memory_space<vmem>>, vector<1x8x128xf32>
    %364 = vector.shape_cast %363 : vector<1x8x128xf32> to vector<8x128xf32>
    %c0_217 = arith.constant 0 : index
    %c0_218 = arith.constant 0 : index
    %c0_219 = arith.constant 0 : index
    %365 = vector.load %arg9[%c0_217, %c0_218, %c0_219] : memref<2x8x32xf32, #tpu.memory_space<vmem>>, vector<1x8x32xf32>
    %366 = vector.shape_cast %365 : vector<1x8x32xf32> to vector<8x32xf32>
    %c0_220 = arith.constant 0 : index
    %c0_221 = arith.constant 0 : index
    %367 = vector.load %arg3[%c0_220, %c0_221] : memref<32x128xf32, #tpu.memory_space<vmem>>, vector<32x128xf32>
    %cst_222 = arith.constant dense<0.000000e+00> : vector<8x128xf32>
    %368 = tpu.matmul %366, %367, %cst_222 {dimension_numbers = #tpu.dot_dimension_numbers<[1], [0], [0], [1], [0, 0, 1, 1], [], []>} : vector<8x32xf32>, vector<32x128xf32>, vector<8x128xf32> -> vector<8x128xf32>
    %369 = arith.addf %364, %368 : vector<8x128xf32>
    %c0_223 = arith.constant 0 : index
    %c0_224 = arith.constant 0 : index
    %c0_225 = arith.constant 0 : index
    %370 = vector.load %arg10[%c0_223, %c0_224, %c0_225] : memref<2x8x32xf32, #tpu.memory_space<vmem>>, vector<1x8x32xf32>
    %371 = vector.shape_cast %370 : vector<1x8x32xf32> to vector<8x32xf32>
    %372 = vector.extract_strided_slice %369 {offsets = [0, 0], sizes = [8, 96], strides = [1, 1]} : vector<8x128xf32> to vector<8x96xf32>
    %373 = arith.negf %372 : vector<8x96xf32>
    %374 = math.exp %373 : vector<8x96xf32>
    %cst_226 = arith.constant 1.000000e+00 : f32
    %375 = vector.broadcast %cst_226 : f32 to vector<8x96xf32>
    %376 = arith.addf %375, %374 : vector<8x96xf32>
    %377 = arith.divf %375, %376 : vector<8x96xf32>
    %378 = vector.extract_strided_slice %377 {offsets = [0, 0], sizes = [8, 32], strides = [1, 1]} : vector<8x96xf32> to vector<8x32xf32>
    %379 = vector.extract_strided_slice %377 {offsets = [0, 32], sizes = [8, 32], strides = [1, 1]} : vector<8x96xf32> to vector<8x32xf32>
    %380 = vector.extract_strided_slice %377 {offsets = [0, 64], sizes = [8, 32], strides = [1, 1]} : vector<8x96xf32> to vector<8x32xf32>
    %381 = vector.extract_strided_slice %369 {offsets = [0, 96], sizes = [8, 32], strides = [1, 1]} : vector<8x128xf32> to vector<8x32xf32>
    %382 = math.tanh %381 : vector<8x32xf32>
    %383 = arith.mulf %379, %371 : vector<8x32xf32>
    %384 = arith.mulf %378, %382 : vector<8x32xf32>
    %385 = arith.addf %383, %384 : vector<8x32xf32>
    %386 = math.tanh %385 : vector<8x32xf32>
    %387 = arith.mulf %380, %386 : vector<8x32xf32>
    %c0_227 = arith.constant 0 : index
    %c0_228 = arith.constant 0 : index
    %c0_229 = arith.constant 0 : index
    %388 = vector.load %arg9[%c0_227, %c0_228, %c0_229] : memref<2x8x32xf32, #tpu.memory_space<vmem>>, vector<1x8x32xf32>
    %389 = vector.shape_cast %388 : vector<1x8x32xf32> to vector<8x32xf32>
    %390 = vector.shape_cast %387 : vector<8x32xf32> to vector<1x8x32xf32>
    tpu.vector_store %arg9[%c0_227, %c0_228, %c0_229], %390 {strides = array<i32>} : memref<2x8x32xf32, #tpu.memory_space<vmem>>, vector<1x8x32xf32>,
    %c0_230 = arith.constant 0 : index
    %c0_231 = arith.constant 0 : index
    %c0_232 = arith.constant 0 : index
    %391 = vector.load %arg10[%c0_230, %c0_231, %c0_232] : memref<2x8x32xf32, #tpu.memory_space<vmem>>, vector<1x8x32xf32>
    %392 = vector.shape_cast %391 : vector<1x8x32xf32> to vector<8x32xf32>
    %393 = vector.shape_cast %385 : vector<8x32xf32> to vector<1x8x32xf32>
    tpu.vector_store %arg10[%c0_230, %c0_231, %c0_232], %393 {strides = array<i32>} : memref<2x8x32xf32, #tpu.memory_space<vmem>>, vector<1x8x32xf32>,
    %c0_233 = arith.constant 0 : index
    %c0_234 = arith.constant 0 : index
    %394 = vector.load %arg5[%c0_233, %c0_234] : memref<32x128xf32, #tpu.memory_space<vmem>>, vector<32x128xf32>
    %cst_235 = arith.constant dense<0.000000e+00> : vector<8x128xf32>
    %395 = tpu.matmul %387, %394, %cst_235 {dimension_numbers = #tpu.dot_dimension_numbers<[1], [0], [0], [1], [0, 0, 1, 1], [], []>} : vector<8x32xf32>, vector<32x128xf32>, vector<8x128xf32> -> vector<8x128xf32>
    %c1_236 = arith.constant 1 : index
    %c0_237 = arith.constant 0 : index
    %c0_238 = arith.constant 0 : index
    %396 = vector.load %arg9[%c1_236, %c0_237, %c0_238] : memref<2x8x32xf32, #tpu.memory_space<vmem>>, vector<1x8x32xf32>
    %397 = vector.shape_cast %396 : vector<1x8x32xf32> to vector<8x32xf32>
    %c0_239 = arith.constant 0 : index
    %c0_240 = arith.constant 0 : index
    %398 = vector.load %arg6[%c0_239, %c0_240] : memref<32x128xf32, #tpu.memory_space<vmem>>, vector<32x128xf32>
    %cst_241 = arith.constant dense<0.000000e+00> : vector<8x128xf32>
    %399 = tpu.matmul %397, %398, %cst_241 {dimension_numbers = #tpu.dot_dimension_numbers<[1], [0], [0], [1], [0, 0, 1, 1], [], []>} : vector<8x32xf32>, vector<32x128xf32>, vector<8x128xf32> -> vector<8x128xf32>
    %400 = arith.addf %395, %399 : vector<8x128xf32>
    %c0_242 = arith.constant 0 : index
    %c0_243 = arith.constant 0 : index
    %401 = vector.load %arg7[%c0_242, %c0_243] : memref<1x128xf32, #tpu.memory_space<vmem>>, vector<1x128xf32>
    %402 = vector.broadcast %401 : vector<1x128xf32> to vector<8x128xf32>
    %403 = arith.addf %400, %402 : vector<8x128xf32>
    %c1_244 = arith.constant 1 : index
    %c0_245 = arith.constant 0 : index
    %c0_246 = arith.constant 0 : index
    %404 = vector.load %arg10[%c1_244, %c0_245, %c0_246] : memref<2x8x32xf32, #tpu.memory_space<vmem>>, vector<1x8x32xf32>
    %405 = vector.shape_cast %404 : vector<1x8x32xf32> to vector<8x32xf32>
    %406 = vector.extract_strided_slice %403 {offsets = [0, 0], sizes = [8, 96], strides = [1, 1]} : vector<8x128xf32> to vector<8x96xf32>
    %407 = arith.negf %406 : vector<8x96xf32>
    %408 = math.exp %407 : vector<8x96xf32>
    %cst_247 = arith.constant 1.000000e+00 : f32
    %409 = vector.broadcast %cst_247 : f32 to vector<8x96xf32>
    %410 = arith.addf %409, %408 : vector<8x96xf32>
    %411 = arith.divf %409, %410 : vector<8x96xf32>
    %412 = vector.extract_strided_slice %411 {offsets = [0, 0], sizes = [8, 32], strides = [1, 1]} : vector<8x96xf32> to vector<8x32xf32>
    %413 = vector.extract_strided_slice %411 {offsets = [0, 32], sizes = [8, 32], strides = [1, 1]} : vector<8x96xf32> to vector<8x32xf32>
    %414 = vector.extract_strided_slice %411 {offsets = [0, 64], sizes = [8, 32], strides = [1, 1]} : vector<8x96xf32> to vector<8x32xf32>
    %415 = vector.extract_strided_slice %403 {offsets = [0, 96], sizes = [8, 32], strides = [1, 1]} : vector<8x128xf32> to vector<8x32xf32>
    %416 = math.tanh %415 : vector<8x32xf32>
    %417 = arith.mulf %413, %405 : vector<8x32xf32>
    %418 = arith.mulf %412, %416 : vector<8x32xf32>
    %419 = arith.addf %417, %418 : vector<8x32xf32>
    %420 = math.tanh %419 : vector<8x32xf32>
    %421 = arith.mulf %414, %420 : vector<8x32xf32>
    %c1_248 = arith.constant 1 : index
    %c0_249 = arith.constant 0 : index
    %c0_250 = arith.constant 0 : index
    %422 = vector.load %arg9[%c1_248, %c0_249, %c0_250] : memref<2x8x32xf32, #tpu.memory_space<vmem>>, vector<1x8x32xf32>
    %423 = vector.shape_cast %422 : vector<1x8x32xf32> to vector<8x32xf32>
    %424 = vector.shape_cast %421 : vector<8x32xf32> to vector<1x8x32xf32>
    tpu.vector_store %arg9[%c1_248, %c0_249, %c0_250], %424 {strides = array<i32>} : memref<2x8x32xf32, #tpu.memory_space<vmem>>, vector<1x8x32xf32>,
    %c1_251 = arith.constant 1 : index
    %c0_252 = arith.constant 0 : index
    %c0_253 = arith.constant 0 : index
    %425 = vector.load %arg10[%c1_251, %c0_252, %c0_253] : memref<2x8x32xf32, #tpu.memory_space<vmem>>, vector<1x8x32xf32>
    %426 = vector.shape_cast %425 : vector<1x8x32xf32> to vector<8x32xf32>
    %427 = vector.shape_cast %419 : vector<8x32xf32> to vector<1x8x32xf32>
    tpu.vector_store %arg10[%c1_251, %c0_252, %c0_253], %427 {strides = array<i32>} : memref<2x8x32xf32, #tpu.memory_space<vmem>>, vector<1x8x32xf32>,
    %428 = arith.index_cast %c5_i32 : i32 to index
    %c0_254 = arith.constant 0 : index
    %c0_255 = arith.constant 0 : index
    %429 = vector.load %arg8[%428, %c0_254, %c0_255] : memref<8x8x32xf32, #tpu.memory_space<vmem>>, vector<1x8x32xf32>
    %430 = vector.shape_cast %429 : vector<1x8x32xf32> to vector<8x32xf32>
    %431 = vector.shape_cast %421 : vector<8x32xf32> to vector<1x8x32xf32>
    tpu.vector_store %arg8[%428, %c0_254, %c0_255], %431 {strides = array<i32>} : memref<8x8x32xf32, #tpu.memory_space<vmem>>, vector<1x8x32xf32>,
    %c6_i32 = arith.constant 6 : i32
    %432 = arith.index_cast %c6_i32 : i32 to index
    %c0_256 = arith.constant 0 : index
    %c0_257 = arith.constant 0 : index
    %433 = vector.load %arg11[%432, %c0_256, %c0_257] : memref<8x8x128xf32, #tpu.memory_space<vmem>>, vector<1x8x128xf32>
    %434 = vector.shape_cast %433 : vector<1x8x128xf32> to vector<8x128xf32>
    %c0_258 = arith.constant 0 : index
    %c0_259 = arith.constant 0 : index
    %c0_260 = arith.constant 0 : index
    %435 = vector.load %arg9[%c0_258, %c0_259, %c0_260] : memref<2x8x32xf32, #tpu.memory_space<vmem>>, vector<1x8x32xf32>
    %436 = vector.shape_cast %435 : vector<1x8x32xf32> to vector<8x32xf32>
    %c0_261 = arith.constant 0 : index
    %c0_262 = arith.constant 0 : index
    %437 = vector.load %arg3[%c0_261, %c0_262] : memref<32x128xf32, #tpu.memory_space<vmem>>, vector<32x128xf32>
    %cst_263 = arith.constant dense<0.000000e+00> : vector<8x128xf32>
    %438 = tpu.matmul %436, %437, %cst_263 {dimension_numbers = #tpu.dot_dimension_numbers<[1], [0], [0], [1], [0, 0, 1, 1], [], []>} : vector<8x32xf32>, vector<32x128xf32>, vector<8x128xf32> -> vector<8x128xf32>
    %439 = arith.addf %434, %438 : vector<8x128xf32>
    %c0_264 = arith.constant 0 : index
    %c0_265 = arith.constant 0 : index
    %c0_266 = arith.constant 0 : index
    %440 = vector.load %arg10[%c0_264, %c0_265, %c0_266] : memref<2x8x32xf32, #tpu.memory_space<vmem>>, vector<1x8x32xf32>
    %441 = vector.shape_cast %440 : vector<1x8x32xf32> to vector<8x32xf32>
    %442 = vector.extract_strided_slice %439 {offsets = [0, 0], sizes = [8, 96], strides = [1, 1]} : vector<8x128xf32> to vector<8x96xf32>
    %443 = arith.negf %442 : vector<8x96xf32>
    %444 = math.exp %443 : vector<8x96xf32>
    %cst_267 = arith.constant 1.000000e+00 : f32
    %445 = vector.broadcast %cst_267 : f32 to vector<8x96xf32>
    %446 = arith.addf %445, %444 : vector<8x96xf32>
    %447 = arith.divf %445, %446 : vector<8x96xf32>
    %448 = vector.extract_strided_slice %447 {offsets = [0, 0], sizes = [8, 32], strides = [1, 1]} : vector<8x96xf32> to vector<8x32xf32>
    %449 = vector.extract_strided_slice %447 {offsets = [0, 32], sizes = [8, 32], strides = [1, 1]} : vector<8x96xf32> to vector<8x32xf32>
    %450 = vector.extract_strided_slice %447 {offsets = [0, 64], sizes = [8, 32], strides = [1, 1]} : vector<8x96xf32> to vector<8x32xf32>
    %451 = vector.extract_strided_slice %439 {offsets = [0, 96], sizes = [8, 32], strides = [1, 1]} : vector<8x128xf32> to vector<8x32xf32>
    %452 = math.tanh %451 : vector<8x32xf32>
    %453 = arith.mulf %449, %441 : vector<8x32xf32>
    %454 = arith.mulf %448, %452 : vector<8x32xf32>
    %455 = arith.addf %453, %454 : vector<8x32xf32>
    %456 = math.tanh %455 : vector<8x32xf32>
    %457 = arith.mulf %450, %456 : vector<8x32xf32>
    %c0_268 = arith.constant 0 : index
    %c0_269 = arith.constant 0 : index
    %c0_270 = arith.constant 0 : index
    %458 = vector.load %arg9[%c0_268, %c0_269, %c0_270] : memref<2x8x32xf32, #tpu.memory_space<vmem>>, vector<1x8x32xf32>
    %459 = vector.shape_cast %458 : vector<1x8x32xf32> to vector<8x32xf32>
    %460 = vector.shape_cast %457 : vector<8x32xf32> to vector<1x8x32xf32>
    tpu.vector_store %arg9[%c0_268, %c0_269, %c0_270], %460 {strides = array<i32>} : memref<2x8x32xf32, #tpu.memory_space<vmem>>, vector<1x8x32xf32>,
    %c0_271 = arith.constant 0 : index
    %c0_272 = arith.constant 0 : index
    %c0_273 = arith.constant 0 : index
    %461 = vector.load %arg10[%c0_271, %c0_272, %c0_273] : memref<2x8x32xf32, #tpu.memory_space<vmem>>, vector<1x8x32xf32>
    %462 = vector.shape_cast %461 : vector<1x8x32xf32> to vector<8x32xf32>
    %463 = vector.shape_cast %455 : vector<8x32xf32> to vector<1x8x32xf32>
    tpu.vector_store %arg10[%c0_271, %c0_272, %c0_273], %463 {strides = array<i32>} : memref<2x8x32xf32, #tpu.memory_space<vmem>>, vector<1x8x32xf32>,
    %c0_274 = arith.constant 0 : index
    %c0_275 = arith.constant 0 : index
    %464 = vector.load %arg5[%c0_274, %c0_275] : memref<32x128xf32, #tpu.memory_space<vmem>>, vector<32x128xf32>
    %cst_276 = arith.constant dense<0.000000e+00> : vector<8x128xf32>
    %465 = tpu.matmul %457, %464, %cst_276 {dimension_numbers = #tpu.dot_dimension_numbers<[1], [0], [0], [1], [0, 0, 1, 1], [], []>} : vector<8x32xf32>, vector<32x128xf32>, vector<8x128xf32> -> vector<8x128xf32>
    %c1_277 = arith.constant 1 : index
    %c0_278 = arith.constant 0 : index
    %c0_279 = arith.constant 0 : index
    %466 = vector.load %arg9[%c1_277, %c0_278, %c0_279] : memref<2x8x32xf32, #tpu.memory_space<vmem>>, vector<1x8x32xf32>
    %467 = vector.shape_cast %466 : vector<1x8x32xf32> to vector<8x32xf32>
    %c0_280 = arith.constant 0 : index
    %c0_281 = arith.constant 0 : index
    %468 = vector.load %arg6[%c0_280, %c0_281] : memref<32x128xf32, #tpu.memory_space<vmem>>, vector<32x128xf32>
    %cst_282 = arith.constant dense<0.000000e+00> : vector<8x128xf32>
    %469 = tpu.matmul %467, %468, %cst_282 {dimension_numbers = #tpu.dot_dimension_numbers<[1], [0], [0], [1], [0, 0, 1, 1], [], []>} : vector<8x32xf32>, vector<32x128xf32>, vector<8x128xf32> -> vector<8x128xf32>
    %470 = arith.addf %465, %469 : vector<8x128xf32>
    %c0_283 = arith.constant 0 : index
    %c0_284 = arith.constant 0 : index
    %471 = vector.load %arg7[%c0_283, %c0_284] : memref<1x128xf32, #tpu.memory_space<vmem>>, vector<1x128xf32>
    %472 = vector.broadcast %471 : vector<1x128xf32> to vector<8x128xf32>
    %473 = arith.addf %470, %472 : vector<8x128xf32>
    %c1_285 = arith.constant 1 : index
    %c0_286 = arith.constant 0 : index
    %c0_287 = arith.constant 0 : index
    %474 = vector.load %arg10[%c1_285, %c0_286, %c0_287] : memref<2x8x32xf32, #tpu.memory_space<vmem>>, vector<1x8x32xf32>
    %475 = vector.shape_cast %474 : vector<1x8x32xf32> to vector<8x32xf32>
    %476 = vector.extract_strided_slice %473 {offsets = [0, 0], sizes = [8, 96], strides = [1, 1]} : vector<8x128xf32> to vector<8x96xf32>
    %477 = arith.negf %476 : vector<8x96xf32>
    %478 = math.exp %477 : vector<8x96xf32>
    %cst_288 = arith.constant 1.000000e+00 : f32
    %479 = vector.broadcast %cst_288 : f32 to vector<8x96xf32>
    %480 = arith.addf %479, %478 : vector<8x96xf32>
    %481 = arith.divf %479, %480 : vector<8x96xf32>
    %482 = vector.extract_strided_slice %481 {offsets = [0, 0], sizes = [8, 32], strides = [1, 1]} : vector<8x96xf32> to vector<8x32xf32>
    %483 = vector.extract_strided_slice %481 {offsets = [0, 32], sizes = [8, 32], strides = [1, 1]} : vector<8x96xf32> to vector<8x32xf32>
    %484 = vector.extract_strided_slice %481 {offsets = [0, 64], sizes = [8, 32], strides = [1, 1]} : vector<8x96xf32> to vector<8x32xf32>
    %485 = vector.extract_strided_slice %473 {offsets = [0, 96], sizes = [8, 32], strides = [1, 1]} : vector<8x128xf32> to vector<8x32xf32>
    %486 = math.tanh %485 : vector<8x32xf32>
    %487 = arith.mulf %483, %475 : vector<8x32xf32>
    %488 = arith.mulf %482, %486 : vector<8x32xf32>
    %489 = arith.addf %487, %488 : vector<8x32xf32>
    %490 = math.tanh %489 : vector<8x32xf32>
    %491 = arith.mulf %484, %490 : vector<8x32xf32>
    %c1_289 = arith.constant 1 : index
    %c0_290 = arith.constant 0 : index
    %c0_291 = arith.constant 0 : index
    %492 = vector.load %arg9[%c1_289, %c0_290, %c0_291] : memref<2x8x32xf32, #tpu.memory_space<vmem>>, vector<1x8x32xf32>
    %493 = vector.shape_cast %492 : vector<1x8x32xf32> to vector<8x32xf32>
    %494 = vector.shape_cast %491 : vector<8x32xf32> to vector<1x8x32xf32>
    tpu.vector_store %arg9[%c1_289, %c0_290, %c0_291], %494 {strides = array<i32>} : memref<2x8x32xf32, #tpu.memory_space<vmem>>, vector<1x8x32xf32>,
    %c1_292 = arith.constant 1 : index
    %c0_293 = arith.constant 0 : index
    %c0_294 = arith.constant 0 : index
    %495 = vector.load %arg10[%c1_292, %c0_293, %c0_294] : memref<2x8x32xf32, #tpu.memory_space<vmem>>, vector<1x8x32xf32>
    %496 = vector.shape_cast %495 : vector<1x8x32xf32> to vector<8x32xf32>
    %497 = vector.shape_cast %489 : vector<8x32xf32> to vector<1x8x32xf32>
    tpu.vector_store %arg10[%c1_292, %c0_293, %c0_294], %497 {strides = array<i32>} : memref<2x8x32xf32, #tpu.memory_space<vmem>>, vector<1x8x32xf32>,
    %498 = arith.index_cast %c6_i32 : i32 to index
    %c0_295 = arith.constant 0 : index
    %c0_296 = arith.constant 0 : index
    %499 = vector.load %arg8[%498, %c0_295, %c0_296] : memref<8x8x32xf32, #tpu.memory_space<vmem>>, vector<1x8x32xf32>
    %500 = vector.shape_cast %499 : vector<1x8x32xf32> to vector<8x32xf32>
    %501 = vector.shape_cast %491 : vector<8x32xf32> to vector<1x8x32xf32>
    tpu.vector_store %arg8[%498, %c0_295, %c0_296], %501 {strides = array<i32>} : memref<8x8x32xf32, #tpu.memory_space<vmem>>, vector<1x8x32xf32>,
    %c7_i32 = arith.constant 7 : i32
    %502 = arith.index_cast %c7_i32 : i32 to index
    %c0_297 = arith.constant 0 : index
    %c0_298 = arith.constant 0 : index
    %503 = vector.load %arg11[%502, %c0_297, %c0_298] : memref<8x8x128xf32, #tpu.memory_space<vmem>>, vector<1x8x128xf32>
    %504 = vector.shape_cast %503 : vector<1x8x128xf32> to vector<8x128xf32>
    %c0_299 = arith.constant 0 : index
    %c0_300 = arith.constant 0 : index
    %c0_301 = arith.constant 0 : index
    %505 = vector.load %arg9[%c0_299, %c0_300, %c0_301] : memref<2x8x32xf32, #tpu.memory_space<vmem>>, vector<1x8x32xf32>
    %506 = vector.shape_cast %505 : vector<1x8x32xf32> to vector<8x32xf32>
    %c0_302 = arith.constant 0 : index
    %c0_303 = arith.constant 0 : index
    %507 = vector.load %arg3[%c0_302, %c0_303] : memref<32x128xf32, #tpu.memory_space<vmem>>, vector<32x128xf32>
    %cst_304 = arith.constant dense<0.000000e+00> : vector<8x128xf32>
    %508 = tpu.matmul %506, %507, %cst_304 {dimension_numbers = #tpu.dot_dimension_numbers<[1], [0], [0], [1], [0, 0, 1, 1], [], []>} : vector<8x32xf32>, vector<32x128xf32>, vector<8x128xf32> -> vector<8x128xf32>
    %509 = arith.addf %504, %508 : vector<8x128xf32>
    %c0_305 = arith.constant 0 : index
    %c0_306 = arith.constant 0 : index
    %c0_307 = arith.constant 0 : index
    %510 = vector.load %arg10[%c0_305, %c0_306, %c0_307] : memref<2x8x32xf32, #tpu.memory_space<vmem>>, vector<1x8x32xf32>
    %511 = vector.shape_cast %510 : vector<1x8x32xf32> to vector<8x32xf32>
    %512 = vector.extract_strided_slice %509 {offsets = [0, 0], sizes = [8, 96], strides = [1, 1]} : vector<8x128xf32> to vector<8x96xf32>
    %513 = arith.negf %512 : vector<8x96xf32>
    %514 = math.exp %513 : vector<8x96xf32>
    %cst_308 = arith.constant 1.000000e+00 : f32
    %515 = vector.broadcast %cst_308 : f32 to vector<8x96xf32>
    %516 = arith.addf %515, %514 : vector<8x96xf32>
    %517 = arith.divf %515, %516 : vector<8x96xf32>
    %518 = vector.extract_strided_slice %517 {offsets = [0, 0], sizes = [8, 32], strides = [1, 1]} : vector<8x96xf32> to vector<8x32xf32>
    %519 = vector.extract_strided_slice %517 {offsets = [0, 32], sizes = [8, 32], strides = [1, 1]} : vector<8x96xf32> to vector<8x32xf32>
    %520 = vector.extract_strided_slice %517 {offsets = [0, 64], sizes = [8, 32], strides = [1, 1]} : vector<8x96xf32> to vector<8x32xf32>
    %521 = vector.extract_strided_slice %509 {offsets = [0, 96], sizes = [8, 32], strides = [1, 1]} : vector<8x128xf32> to vector<8x32xf32>
    %522 = math.tanh %521 : vector<8x32xf32>
    %523 = arith.mulf %519, %511 : vector<8x32xf32>
    %524 = arith.mulf %518, %522 : vector<8x32xf32>
    %525 = arith.addf %523, %524 : vector<8x32xf32>
    %526 = math.tanh %525 : vector<8x32xf32>
    %527 = arith.mulf %520, %526 : vector<8x32xf32>
    %c0_309 = arith.constant 0 : index
    %c0_310 = arith.constant 0 : index
    %c0_311 = arith.constant 0 : index
    %528 = vector.load %arg9[%c0_309, %c0_310, %c0_311] : memref<2x8x32xf32, #tpu.memory_space<vmem>>, vector<1x8x32xf32>
    %529 = vector.shape_cast %528 : vector<1x8x32xf32> to vector<8x32xf32>
    %530 = vector.shape_cast %527 : vector<8x32xf32> to vector<1x8x32xf32>
    tpu.vector_store %arg9[%c0_309, %c0_310, %c0_311], %530 {strides = array<i32>} : memref<2x8x32xf32, #tpu.memory_space<vmem>>, vector<1x8x32xf32>,
    %c0_312 = arith.constant 0 : index
    %c0_313 = arith.constant 0 : index
    %c0_314 = arith.constant 0 : index
    %531 = vector.load %arg10[%c0_312, %c0_313, %c0_314] : memref<2x8x32xf32, #tpu.memory_space<vmem>>, vector<1x8x32xf32>
    %532 = vector.shape_cast %531 : vector<1x8x32xf32> to vector<8x32xf32>
    %533 = vector.shape_cast %525 : vector<8x32xf32> to vector<1x8x32xf32>
    tpu.vector_store %arg10[%c0_312, %c0_313, %c0_314], %533 {strides = array<i32>} : memref<2x8x32xf32, #tpu.memory_space<vmem>>, vector<1x8x32xf32>,
    %c0_315 = arith.constant 0 : index
    %c0_316 = arith.constant 0 : index
    %534 = vector.load %arg5[%c0_315, %c0_316] : memref<32x128xf32, #tpu.memory_space<vmem>>, vector<32x128xf32>
    %cst_317 = arith.constant dense<0.000000e+00> : vector<8x128xf32>
    %535 = tpu.matmul %527, %534, %cst_317 {dimension_numbers = #tpu.dot_dimension_numbers<[1], [0], [0], [1], [0, 0, 1, 1], [], []>} : vector<8x32xf32>, vector<32x128xf32>, vector<8x128xf32> -> vector<8x128xf32>
    %c1_318 = arith.constant 1 : index
    %c0_319 = arith.constant 0 : index
    %c0_320 = arith.constant 0 : index
    %536 = vector.load %arg9[%c1_318, %c0_319, %c0_320] : memref<2x8x32xf32, #tpu.memory_space<vmem>>, vector<1x8x32xf32>
    %537 = vector.shape_cast %536 : vector<1x8x32xf32> to vector<8x32xf32>
    %c0_321 = arith.constant 0 : index
    %c0_322 = arith.constant 0 : index
    %538 = vector.load %arg6[%c0_321, %c0_322] : memref<32x128xf32, #tpu.memory_space<vmem>>, vector<32x128xf32>
    %cst_323 = arith.constant dense<0.000000e+00> : vector<8x128xf32>
    %539 = tpu.matmul %537, %538, %cst_323 {dimension_numbers = #tpu.dot_dimension_numbers<[1], [0], [0], [1], [0, 0, 1, 1], [], []>} : vector<8x32xf32>, vector<32x128xf32>, vector<8x128xf32> -> vector<8x128xf32>
    %540 = arith.addf %535, %539 : vector<8x128xf32>
    %c0_324 = arith.constant 0 : index
    %c0_325 = arith.constant 0 : index
    %541 = vector.load %arg7[%c0_324, %c0_325] : memref<1x128xf32, #tpu.memory_space<vmem>>, vector<1x128xf32>
    %542 = vector.broadcast %541 : vector<1x128xf32> to vector<8x128xf32>
    %543 = arith.addf %540, %542 : vector<8x128xf32>
    %c1_326 = arith.constant 1 : index
    %c0_327 = arith.constant 0 : index
    %c0_328 = arith.constant 0 : index
    %544 = vector.load %arg10[%c1_326, %c0_327, %c0_328] : memref<2x8x32xf32, #tpu.memory_space<vmem>>, vector<1x8x32xf32>
    %545 = vector.shape_cast %544 : vector<1x8x32xf32> to vector<8x32xf32>
    %546 = vector.extract_strided_slice %543 {offsets = [0, 0], sizes = [8, 96], strides = [1, 1]} : vector<8x128xf32> to vector<8x96xf32>
    %547 = arith.negf %546 : vector<8x96xf32>
    %548 = math.exp %547 : vector<8x96xf32>
    %cst_329 = arith.constant 1.000000e+00 : f32
    %549 = vector.broadcast %cst_329 : f32 to vector<8x96xf32>
    %550 = arith.addf %549, %548 : vector<8x96xf32>
    %551 = arith.divf %549, %550 : vector<8x96xf32>
    %552 = vector.extract_strided_slice %551 {offsets = [0, 0], sizes = [8, 32], strides = [1, 1]} : vector<8x96xf32> to vector<8x32xf32>
    %553 = vector.extract_strided_slice %551 {offsets = [0, 32], sizes = [8, 32], strides = [1, 1]} : vector<8x96xf32> to vector<8x32xf32>
    %554 = vector.extract_strided_slice %551 {offsets = [0, 64], sizes = [8, 32], strides = [1, 1]} : vector<8x96xf32> to vector<8x32xf32>
    %555 = vector.extract_strided_slice %543 {offsets = [0, 96], sizes = [8, 32], strides = [1, 1]} : vector<8x128xf32> to vector<8x32xf32>
    %556 = math.tanh %555 : vector<8x32xf32>
    %557 = arith.mulf %553, %545 : vector<8x32xf32>
    %558 = arith.mulf %552, %556 : vector<8x32xf32>
    %559 = arith.addf %557, %558 : vector<8x32xf32>
    %560 = math.tanh %559 : vector<8x32xf32>
    %561 = arith.mulf %554, %560 : vector<8x32xf32>
    %c1_330 = arith.constant 1 : index
    %c0_331 = arith.constant 0 : index
    %c0_332 = arith.constant 0 : index
    %562 = vector.load %arg9[%c1_330, %c0_331, %c0_332] : memref<2x8x32xf32, #tpu.memory_space<vmem>>, vector<1x8x32xf32>
    %563 = vector.shape_cast %562 : vector<1x8x32xf32> to vector<8x32xf32>
    %564 = vector.shape_cast %561 : vector<8x32xf32> to vector<1x8x32xf32>
    tpu.vector_store %arg9[%c1_330, %c0_331, %c0_332], %564 {strides = array<i32>} : memref<2x8x32xf32, #tpu.memory_space<vmem>>, vector<1x8x32xf32>,
    %c1_333 = arith.constant 1 : index
    %c0_334 = arith.constant 0 : index
    %c0_335 = arith.constant 0 : index
    %565 = vector.load %arg10[%c1_333, %c0_334, %c0_335] : memref<2x8x32xf32, #tpu.memory_space<vmem>>, vector<1x8x32xf32>
    %566 = vector.shape_cast %565 : vector<1x8x32xf32> to vector<8x32xf32>
    %567 = vector.shape_cast %559 : vector<8x32xf32> to vector<1x8x32xf32>
    tpu.vector_store %arg10[%c1_333, %c0_334, %c0_335], %567 {strides = array<i32>} : memref<2x8x32xf32, #tpu.memory_space<vmem>>, vector<1x8x32xf32>,
    %568 = arith.index_cast %c7_i32 : i32 to index
    %c0_336 = arith.constant 0 : index
    %c0_337 = arith.constant 0 : index
    %569 = vector.load %arg8[%568, %c0_336, %c0_337] : memref<8x8x32xf32, #tpu.memory_space<vmem>>, vector<1x8x32xf32>
    %570 = vector.shape_cast %569 : vector<1x8x32xf32> to vector<8x32xf32>
    %571 = vector.shape_cast %561 : vector<8x32xf32> to vector<1x8x32xf32>
    tpu.vector_store %arg8[%568, %c0_336, %c0_337], %571 {strides = array<i32>} : memref<8x8x32xf32, #tpu.memory_space<vmem>>, vector<1x8x32xf32>,
    %c8_i32 = arith.constant 8 : i32
    return
  }
  func.func @transform_0(%arg0: i32) -> (i32, i32, i32) {
    %c0_i32 = arith.constant 0 : i32
    %c0_i32_0 = arith.constant 0 : i32
    %c0_i32_1 = arith.constant 0 : i32
    return %arg0, %c0_i32, %c0_i32_0 : i32, i32, i32
  }
  func.func @transform_1(%arg0: i32) -> (i32, i32) {
    %c0_i32 = arith.constant 0 : i32
    %c0_i32_0 = arith.constant 0 : i32
    %c0_i32_1 = arith.constant 0 : i32
    return %c0_i32, %c0_i32_0 : i32, i32
  }
  func.func @transform_2(%arg0: i32) -> (i32, i32) {
    %c0_i32 = arith.constant 0 : i32
    %c0_i32_0 = arith.constant 0 : i32
    %c0_i32_1 = arith.constant 0 : i32
    return %c0_i32, %c0_i32_0 : i32, i32
  }
  func.func @transform_3(%arg0: i32) -> (i32, i32) {
    %c0_i32 = arith.constant 0 : i32
    %c0_i32_0 = arith.constant 0 : i32
    %c0_i32_1 = arith.constant 0 : i32
    return %c0_i32, %c0_i32_0 : i32, i32
  }
  func.func @transform_4(%arg0: i32) -> (i32, i32) {
    %c0_i32 = arith.constant 0 : i32
    %c0_i32_0 = arith.constant 0 : i32
    %c0_i32_1 = arith.constant 0 : i32
    return %c0_i32, %c0_i32_0 : i32, i32
  }
  func.func @transform_5(%arg0: i32) -> (i32, i32) {
    %c0_i32 = arith.constant 0 : i32
    %c0_i32_0 = arith.constant 0 : i32
    %c0_i32_1 = arith.constant 0 : i32
    return %c0_i32, %c0_i32_0 : i32, i32
  }
  func.func @transform_6(%arg0: i32) -> (i32, i32) {
    %c0_i32 = arith.constant 0 : i32
    %c0_i32_0 = arith.constant 0 : i32
    %c0_i32_1 = arith.constant 0 : i32
    return %c0_i32, %c0_i32_0 : i32, i32
  }
  func.func @transform_7(%arg0: i32) -> (i32, i32, i32) {
    %c0_i32 = arith.constant 0 : i32
    %c0_i32_0 = arith.constant 0 : i32
    %c0_i32_1 = arith.constant 0 : i32
    return %arg0, %c0_i32, %c0_i32_0 : i32, i32, i32
  }
}

</mosaic_0001>

<bundles_post_ra>
// kernel: tpu_custom_call.1
= control target key start
LH: loop header
LB: loop body
LE: loop exit
PB: predicated region body
PF: predicated region fallthrough
CT: control target
= control target key end

     0   :  { %12 = vsyncpa [#allocation6], 0  ;;  %s4304_s0 = inlined_call_operand.hbm [shape: f32[8,8,16], index: 0, kind: input, shape index: {}]   ;;  %s4305_s1 = inlined_call_operand.hbm [shape: f32[16,128], index: 1, kind: input, shape index: {}]   ;;  %s4306_s2 = inlined_call_operand.hbm [shape: f32[32,128], index: 2, kind: input, shape index: {}]   ;;  %s4307_s3 = inlined_call_operand.vmem [shape: f32[1,128], index: 3, kind: input, shape index: {}]   ;;  %s4308_s4 = inlined_call_operand.hbm [shape: f32[32,128], index: 4, kind: input, shape index: {}]   ;;  %s4309_s5 = inlined_call_operand.hbm [shape: f32[32,128], index: 5, kind: input, shape index: {}]   ;;  %s4310_s6 = inlined_call_operand.vmem [shape: f32[1,128], index: 6, kind: input, shape index: {}]   ;;  %s4311_s7 = inlined_call_operand.hbm [shape: f32[8,8,32], index: 7, kind: output, shape index: {}]  }
   0x1   :  { %13 = vsyncpa [#allocation9], 0 }
   0x2   :  { %14 = vsyncpa [#allocation12], 0 }
   0x3   :  { %15 = vsyncpa [#allocation7], 0  ;;  %s3761_s24 = smov [#allocation8]   ;;  %s3762_s26 = smov [#allocation11]  }
   0x4   :  { %s33_s25 = sshll.u32 %s3761_s24, 4  ;;  %s59_s27 = sshll.u32 %s3762_s26, 4  ;;  %s34_s25 = int_to_ptr.vmem [resolvable:$true] %s33_s25  ;;  %s3815_s27 = int_to_ptr.vmem [resolvable:$true] %s59_s27 }
   0x5   :  { %s3621_s30 = scalar_lea.hbm %s4305_s1, 256 }
   0x6   :  { %p3622_p0 = scmp.ne.s32.totalorder %s4305_s1, %s3621_s30  ;;  %p3625_p1 = scmp.lt.u32.totalorder %s3621_s30, %s4305_s1 }
   0x8   :  { %p3627_p2 = pnand %p3625_p1, %p3622_p0 }
   0xa   :  { %3630 = shalt.err (!%p3627_p2)
}
   0xb   :  { %s3631_s12 = scalar_lea.vmem %s34_s25, 256  ;;  %p3636_p4 = scmp.lt.s32.totalorder %s34_s25, %s34_s25 }
   0xc   :  { %p3632_p3 = scmp.ne.s32.totalorder %s34_s25, %s3631_s12  ;;  %p3637_p5 = scmp.lt.s32.totalorder %s3631_s12, %s3631_s12 }
   0xe   :  { %p3638_p6 = por %p3637_p5, %p3636_p4 }
  0x10   :  { %p3639_p7 = pnand %p3638_p6, %p3632_p3 }
  0x12   :  { %3642 = shalt.err (!%p3639_p7)
}
  0x13   :  { %s3763_s13 = smov 128   ;;  %s3764_s14 = smov 8  }
  0x14   :  { %39 = dma.hbm_to_vmem [thread:$0]  %s4305_s1, 256, %s34_s25, [#allocation9], %s3763_s13, %s3763_s13, %s3764_s14  }
  0x15   :  { %s3643_s19 = scalar_lea.hbm %s4308_s4, 512 }
  0x16   :  { %p3644_p8 = scmp.ne.s32.totalorder %s4308_s4, %s3643_s19  ;;  %p3647_p9 = scmp.lt.u32.totalorder %s3643_s19, %s4308_s4 }
  0x18   :  { %p3649_p10 = pnand %p3647_p9, %p3644_p8 }
  0x1a   :  { %3652 = shalt.err (!%p3649_p10)
}
  0x1b   :  { %s3653_s24 = scalar_lea.vmem %s3815_s27, 512  ;;  %p3658_p12 = scmp.lt.s32.totalorder %s3815_s27, %s3815_s27 }
  0x1c   :  { %p3654_p11 = scmp.ne.s32.totalorder %s3815_s27, %s3653_s24  ;;  %p3659_p13 = scmp.lt.s32.totalorder %s3653_s24, %s3653_s24 }
  0x1e   :  { %p3660_p0 = por %p3659_p13, %p3658_p12 }
  0x20   :  { %p3661_p1 = pnand %p3660_p0, %p3654_p11 }
  0x22   :  { %3664 = shalt.err (!%p3661_p1)
}
  0x23   :  { %65 = dma.hbm_to_vmem [thread:$0]  %s4308_s4, 512, %s3815_s27, [#allocation12], %s3763_s13, %s3763_s13, %s3764_s14  }
  0x24   :  { %s3765_s26 = smov [#allocation5]   ;;  %s3766_s29 = smov [#allocation10]  }
  0x25   :  { %s21_s28 = sshll.u32 %s3765_s26, 4  ;;  %s45_s30 = sshll.u32 %s3766_s29, 4  ;;  %s22_s28 = int_to_ptr.vmem [resolvable:$true] %s21_s28  ;;  %s3852_s30 = int_to_ptr.vmem [resolvable:$true] %s45_s30 }
  0x26   :  { %s3665_s10 = scalar_lea.hbm %s4304_s0, 1024 }
  0x27   :  { %p3666_p2 = scmp.ne.s32.totalorder %s4304_s0, %s3665_s10  ;;  %p3669_p3 = scmp.lt.u32.totalorder %s3665_s10, %s4304_s0 }
  0x29   :  { %p3671_p4 = pnand %p3669_p3, %p3666_p2 }
  0x2b   :  { %3674 = shalt.err (!%p3671_p4)
}
  0x2c   :  { %s3675_s4 = scalar_lea.vmem %s22_s28, 1024  ;;  %p3680_p6 = scmp.lt.s32.totalorder %s22_s28, %s22_s28 }
  0x2d   :  { %p3676_p5 = scmp.ne.s32.totalorder %s22_s28, %s3675_s4  ;;  %p3681_p7 = scmp.lt.s32.totalorder %s3675_s4, %s3675_s4 }
  0x2f   :  { %p3682_p8 = por %p3681_p7, %p3680_p6 }
  0x31   :  { %p3683_p9 = pnand %p3682_p8, %p3676_p5 }
  0x33   :  { %3686 = shalt.err (!%p3683_p9)
}
  0x34   :  { %27 = dma.hbm_to_vmem [thread:$0]  %s4304_s0, 1024, %s22_s28, [#allocation6], %s3763_s13, %s3763_s13, %s3764_s14  }
  0x35   :  { %s3687_s20 = scalar_lea.hbm %s4306_s2, 512 }
  0x36   :  { %p3688_p10 = scmp.ne.s32.totalorder %s4306_s2, %s3687_s20  ;;  %p3691_p11 = scmp.lt.u32.totalorder %s3687_s20, %s4306_s2 }
  0x38   :  { %p3693_p12 = pnand %p3691_p11, %p3688_p10 }
  0x3a   :  { %3696 = shalt.err (!%p3693_p12)
}
  0x3b   :  { %s3697_s1 = scalar_lea.vmem %s3852_s30, 512  ;;  %p3702_p0 = scmp.lt.s32.totalorder %s3852_s30, %s3852_s30 }
  0x3c   :  { %p3698_p13 = scmp.ne.s32.totalorder %s3852_s30, %s3697_s1  ;;  %p3703_p1 = scmp.lt.s32.totalorder %s3697_s1, %s3697_s1 }
  0x3e   :  { %p3704_p2 = por %p3703_p1, %p3702_p0 }
  0x40   :  { %p3705_p3 = pnand %p3704_p2, %p3698_p13 }
  0x42   :  { %3708 = shalt.err (!%p3705_p3)
}
  0x43   :  { %51 = dma.hbm_to_vmem [thread:$0]  %s4306_s2, 512, %s3852_s30, [#allocation9], %s3763_s13, %s3763_s13, %s3764_s14  }
  0x44   :  { %s3767_s26 = smov [#allocation13]   ;;  %s3709_s9 = scalar_lea.hbm %s4309_s5, 512 }
  0x45   :  { %s71_s28 = sshll.u32 %s3767_s26, 4  ;;  %p3710_p4 = scmp.ne.s32.totalorder %s4309_s5, %s3709_s9  ;;  %s72_s28 = int_to_ptr.vmem [resolvable:$true] %s71_s28 }
  0x46   :  { %p3713_p5 = scmp.lt.u32.totalorder %s3709_s9, %s4309_s5 }
  0x48   :  { %p3715_p6 = pnand %p3713_p5, %p3710_p4 }
  0x4a   :  { %3718 = shalt.err (!%p3715_p6)
}
  0x4b   :  { %s3719_s16 = scalar_lea.vmem %s72_s28, 512  ;;  %p3724_p8 = scmp.lt.s32.totalorder %s72_s28, %s72_s28 }
  0x4c   :  { %p3720_p7 = scmp.ne.s32.totalorder %s72_s28, %s3719_s16  ;;  %p3725_p9 = scmp.lt.s32.totalorder %s3719_s16, %s3719_s16 }
  0x4e   :  { %p3726_p10 = por %p3725_p9, %p3724_p8 }
  0x50   :  { %p3727_p11 = pnand %p3726_p10, %p3720_p7 }
  0x52   :  { %3730 = shalt.err (!%p3727_p11)
}
  0x53   :  { %77 = dma.hbm_to_vmem [thread:$0]  %s4309_s5, 512, %s72_s28, [#allocation12], %s3763_s13, %s3763_s13, %s3764_s14  }
  0x54   :  { %3753 = dma.done.wait [#allocation6], 1024  }
  0x55   :  { %3754 = vsyncadd [#allocation6], 4294966272 }
  0x56   :  { %3755 = dma.done.wait [#allocation9], 768  }
  0x57   :  { %3756 = vsyncadd [#allocation9], 4294966528 }
  0x58   :  { %3757 = dma.done.wait [#allocation12], 1024  }
  0x59   :  { %3758 = vsyncadd [#allocation12], 4294966272  ;;  %v3768_v0 = vmov 0.0|0.0   ;;  %vm3769_vm0 = vmmov 0   ;;  %v3770_v1 = vmov 0.0   ;;  %vm99_vm1 = vcmask 261120  }
  0x5a   :  { %3334 = vmatprep.subr.bf16.mxu1 %v3768_v0  ;;  %3074 = vmatprep.mubr.msk.f32.mxu1 %vm3769_vm0, %v3770_v1  ;;  %100 = vst.msk [vmem:[#allocation2] sm:$0xff] %vm99_vm1, %v3770_v1  ;;  %101 = vst.msk [vmem:[#allocation2 + $0x8] sm:$0xff] %vm99_vm1, %v3770_v1  ;;  %vm121_vm2 = vcmask 130048   ;;  %v112_v2 = vld [vmem:[#allocation8] sm:$0xff]  ;;  %v113_v3 = vld [vmem:[#allocation8 + $0x8] sm:$0xff]  ;;  %s3771_s27 = smov 32  }
  0x5b   :  { %102 = vst.msk [vmem:[#allocation3] sm:$0xff] %vm99_vm1, %v3770_v1  ;;  %103 = vst.msk [vmem:[#allocation3 + $0x8] sm:$0xff] %vm99_vm1, %v3770_v1  ;;  %v261_v4 = vld [vmem:[#allocation10] sm:$0xff]  ;;  %v3330_v5 = vpack.c.bf16 %v113_v3, %v112_v2  ;;  %v262_v6 = vld [vmem:[#allocation10 + $0x8] sm:$0xff]  ;;  %s3772_s17 = smov 96   ;;  %s3773_s18 = smov 64  }
  0x5c   :  { %v104_v7 = vld [vmem:[#allocation5] sm:$0xff]  ;;  %v3915_v8 = vpack.c.bf16 %v262_v6, %v261_v4  ;;  %v264_v10 = vld [vmem:[#allocation10 + $0x18] sm:$0xff]  ;;  %v379_v33 = vld [vmem:[#allocation11] sm:$0xff] }
  0x5d   :  { %3054 = vmatprep.mubr.msk.f32.mxu0 %vm121_vm2, %v104_v7  ;;  %v263_v9 = vld [vmem:[#allocation10 + $0x10] sm:$0xff]  ;;  %3331 = vmatprep.subr.bf16.mxu0 %v3330_v5  ;;  %v105_v11 = vld [vmem:[#allocation5 + $0x8] sm:$0xff]  ;;  %v380_v34 = vld [vmem:[#allocation11 + $0x8] sm:$0xff] }
  0x5e   :  { %3336 = vmatpush3.bf16.msra.mxu1 %v3915_v8  ;;  %3333 = vmatpush3.bf16.msra.mxu0 %v3330_v5  ;;  %v3919_v12 = vpack.c.bf16 %v264_v10, %v263_v9  ;;  %v3932_v14 = vld [vmem:[%s4307_s3] ss:$0 sm:$0xff]  ;;  %v106_v35 = vld [vmem:[#allocation5 + $0x10] sm:$0xff]  ;;  %v3940_v36 = vpack.c.bf16 %v380_v34, %v379_v33  ;;  %v107_v37 = vld [vmem:[#allocation5 + $0x18] sm:$0xff] }
  0x5f   :  { %3337 = vmatprep.subr.bf16.mxu1 %v3768_v0  ;;  %3346 = vmatprep.subr.bf16.mxu0 %v3768_v0  ;;  %v108_v38 = vld [vmem:[#allocation5 + $0x20] sm:$0xff]  ;;  %v385_v39 = vld [vmem:[#allocation13] sm:$0xff]  ;;  %v386_v40 = vld [vmem:[#allocation13 + $0x8] sm:$0xff] }
  0x60   :  { %v381_v41 = vld [vmem:[#allocation11 + $0x10] sm:$0xff]  ;;  %v109_v42 = vld [vmem:[#allocation5 + $0x28] sm:$0xff]  ;;  %v3946_v43 = vpack.c.bf16 %v386_v40, %v385_v39  ;;  %v110_v46 = vld [vmem:[#allocation5 + $0x30] sm:$0xff] }
  0x61   :  { %3055 = vmatmul.mubr.msk.f32.vlgmr.msra.gmra.mrb[0].mxu0 %vm121_vm2, %v105_v11  ;;  %v260_v13 = vld [vmem:[#allocation2] sm:$0xff]  ;;  %v382_v44 = vld [vmem:[#allocation11 + $0x18] sm:$0xff]  ;;  %v111_v50 = vld [vmem:[#allocation5 + $0x38] sm:$0xff] }
  0x62   :  { %3339 = vmatpush3.bf16.msra.mxu1 %v3919_v12  ;;  %v340_v22 = vld [vmem:[#allocation3] sm:$0xff]  ;;  %3057 = vmatprep.mubr.msk.f32.mxu0 %vm121_vm2, %v106_v35  ;;  %v3949_v45 = vpack.c.bf16 %v382_v44, %v381_v41  ;;  %v387_v47 = vld [vmem:[#allocation13 + $0x10] sm:$0xff]  ;;  %v388_v48 = vld [vmem:[#allocation13 + $0x18] sm:$0xff] }
  0x63   :  { %3340 = vmatprep.subr.bf16.mxu1 %v3768_v0  ;;  %3348 = vmatpush3.bf16.msra.mxu0 %v3940_v36  ;;  %v3952_v49 = vpack.c.bf16 %v388_v48, %v387_v47  ;;  %v384_v52 = vld [vmem:[#allocation2 + $0x8] sm:$0xff]  ;;  %v4005_v5 = vld [vmem:[%s4310_s6] ss:$0 sm:$0xff] }
  0x64   :  { %3349 = vmatprep.subr.bf16.mxu0 %v3768_v0 }
  0x65   :  { %3075 = vmatmul.mubr.msk.f32.vlgmr.msra.gmra.mrb[0].mxu1 %vm99_vm1, %v260_v13  ;;  %3058 = vmatmul.mubr.msk.f32.gmra.mrb[2].mxu0 %vm121_vm2, %v107_v37 }
  0x66   :  { %3085 = vmatprep.mubr.msk.f32.mxu1 %vm3769_vm0, %v3770_v1  ;;  %3060 = vmatprep.mubr.msk.f32.mxu0 %vm121_vm2, %v108_v38 }
  0x67   :  { %3342 = vmatpush3.bf16.msra.mxu1 %v3946_v43  ;;  %3351 = vmatpush3.bf16.msra.mxu0 %v3949_v45 }
  0x68   :  { %3343 = vmatprep.subr.bf16.mxu1 %v3768_v0  ;;  %3358 = vmatprep.subr.bf16.mxu0 %v3768_v0 }
  0x69   :  { %3061 = vmatmul.mubr.msk.f32.gmra.mrb[4].mxu0 %vm121_vm2, %v109_v42 }
  0x6a   :  { %3063 = vmatprep.mubr.msk.f32.mxu0 %vm121_vm2, %v110_v46 }
  0x6b   :  { %3345 = vmatpush3.bf16.msra.mxu1 %v3952_v49 }
  0x6c   :  { %3352 = vmatprep.subr.bf16.mxu1 %v3768_v0 }
  0x6d   :  { %3064 = vmatmul.mubr.msk.f32.gmra.mrb[6].mxu0 %vm121_vm2, %v111_v50 }
  0x6e   :  { %3096 = vmatprep.mubr.msk.f32.mxu0 %vm3769_vm0, %v3770_v1  ;;  %3086 = vmatmul.mubr.msk.f32.vlgmr.msra.gmra.mrb[2].mxu1 %vm99_vm1, %v384_v52 }
  0x6f   :  { %3354 = vmatpush3.bf16.msra.mxu1 %v3915_v8  ;;  %3107 = vmatprep.mubr.msk.f32.mxu1 %vm3769_vm0, %v3770_v1 }
  0x70   :  { %3355 = vmatprep.subr.bf16.mxu1 %v3768_v0 }
  0x73   :  { %3357 = vmatpush3.bf16.msra.mxu1 %v3919_v12 }
  0x74   :  { %3364 = vmatprep.subr.bf16.mxu1 %v3768_v0 }
 0x134   :  { %v3934_v15 = vpop.f32.mrb[0].mxu0 }
 0x135   :  { %v212_v16 = vpop.f32.mrb[1].mxu0  ;;  %v218_v10 = vadd.f32 %v3934_v15, %v3932_v14 }
 0x136   :  { %v213_v17 = vadd.f32 %v3932_v14, %v212_v16 }
 0x138   :  { %v335_v18 = vpop.f32.mrb[0].mxu1  ;;  %v3975_v56 = vpop.f32.mrb[2].mxu0 }
 0x139   :  { %v339_v19 = vadd.f32 %v335_v18, %v213_v17  ;;  %v3076_v20 = vpop.f32.mrb[1].mxu1  ;;  %v3977_v57 = vpop.f32.mrb[3].mxu0  ;;  %v543_v18 = vld [vmem:[#allocation3 + $0x8] sm:$0xff] }
 0x13b   :  { %3492 = vtanh.f32 %v339_v19  ;;  %v2873_v23 = vmul.f32 -1.442695, %v339_v19 }
 0x13c   :  { %v3979_v58 = vpop.f32.mrb[4].mxu0 }
 0x13d   :  { %3494 = vpow2.f32 %v2873_v23  ;;  %v3981_v59 = vpop.f32.mrb[5].mxu0 }
 0x140   :  { %v3983_v60 = vpop.f32.mrb[6].mxu0 }
 0x141   :  { %v3985_v61 = vpop.f32.mrb[7].mxu0  ;;  %v458_v62 = vpop.f32.mrb[2].mxu1 }
 0x142   :  { %v3087_v63 = vpop.f32.mrb[3].mxu1 }
 0x145   :  { %v3493_v21 = vpop.eup %3492 }
 0x146   :  { %354 = vrot.lane.b32.xlu0 %v3493_v21, %s3771_s27 }
 0x147   :  { %v3495_v24 = vpop.eup %3494 }
 0x148   :  { %v344_v25 = vadd.f32 1.0, %v3495_v24 }
 0x14a   :  { %349 = vrot.lane.b32.xlu0 %v340_v22, %s3771_s27  ;;  %3496 = vrcp.f32 %v344_v25 }
 0x154   :  { %v3497_v26 = vpop.eup %3496 }
 0x1b8   :  { %v355_v27 = vpop.permute.xlu0 %354 }
 0x1b9   :  { %v357_v28 = vmul.f32 %v3497_v26, %v355_v27 }
 0x1bb   :  { %359 = vrot.lane.b32.xlu1 %v357_v28, %s3771_s27 }
 0x1bc   :  { %v350_v29 = vpop.permute.xlu0 %349 }
 0x1bd   :  { %v352_v30 = vmul.f32 %v3497_v26, %v350_v29 }
 0x22d   :  { %v360_v31 = vpop.permute.xlu1 %359 }
 0x22e   :  { %v362_v32 = vadd.f32 %v360_v31, %v352_v30 }
 0x230   :  { %3498 = vtanh.f32 %v362_v32 }
 0x23a   :  { %v3499_v51 = vpop.eup %3498 }
 0x23b   :  { %365 = vrot.lane.b32.xlu1 %v3499_v51, %s3771_s27 }
 0x23f   :  { %375 = vrot.lane.b32.xlu1 %v362_v32, %s3772_s17 }
 0x2ad   :  { %v366_v53 = vpop.permute.xlu1 %365 }
 0x2ae   :  { %v368_v54 = vmul.f32 %v3497_v26, %v366_v53 }
 0x2b0   :  { %370 = vrot.lane.b32.xlu0 %v368_v54, %s3773_s18 }
 0x2b1   :  { %v376_v55 = vpop.permute.xlu1 %375 }
 0x2b2   :  { %378 = vst.msk [vmem:[#allocation3] sm:$0xff] %vm99_vm1, %v376_v55 }
 0x2b9   :  { %v664_v20 = vld [vmem:[#allocation3] sm:$0xff] }
 0x322   :  { %v371_v2 = vpop.permute.xlu0 %370 }
 0x323   :  { %373 = vst.msk [vmem:[#allocation2] sm:$0xff] %vm99_vm1, %v371_v2  ;;  %3097 = vmatmul.mubr.msk.f32.vlgmr.msra.gmra.mrb[8].mxu0 %vm99_vm1, %v371_v2 }
 0x324   :  { %3360 = vmatpush3.bf16.msra.mxu0 %v3946_v43  ;;  %3118 = vmatprep.mubr.msk.f32.mxu0 %vm3769_vm0, %v3770_v1 }
 0x325   :  { %3361 = vmatprep.subr.bf16.mxu0 %v3768_v0 }
 0x328   :  { %3363 = vmatpush3.bf16.msra.mxu0 %v3952_v49 }
 0x329   :  { %3370 = vmatprep.subr.bf16.mxu0 %v3768_v0 }
 0x32a   :  { %v585_v3 = vld [vmem:[#allocation2] sm:$0xff] }
 0x32b   :  { %3108 = vmatmul.mubr.msk.f32.vlgmr.msra.gmra.mrb[4].mxu1 %vm99_vm1, %v585_v3 }
 0x32c   :  { %3366 = vmatpush3.bf16.msra.mxu1 %v3940_v36  ;;  %3129 = vmatprep.mubr.msk.f32.mxu1 %vm3769_vm0, %v3770_v1 }
 0x32d   :  { %3367 = vmatprep.subr.bf16.mxu1 %v3768_v0 }
 0x330   :  { %3369 = vmatpush3.bf16.msra.mxu1 %v3949_v45 }
 0x331   :  { %3376 = vmatprep.subr.bf16.mxu1 %v3768_v0 }
 0x3f6   :  { %v530_v4 = vpop.f32.mrb[8].mxu0 }
 0x3f7   :  { %v531_v6 = vadd.f32 %v530_v4, %v458_v62  ;;  %v3098_v7 = vpop.f32.mrb[9].mxu0 }
 0x3f8   :  { %v223_v7 = vadd.f32 %v3932_v14, %v3977_v57 }
 0x3f9   :  { %v541_v9 = vadd.f32 %v4005_v5, %v531_v6 }
 0x3fb   :  { %3500 = vtanh.f32 %v541_v9  ;;  %v2877_v21 = vmul.f32 -1.442695, %v541_v9 }
 0x3fe   :  { %v659_v11 = vpop.f32.mrb[4].mxu1 }
 0x3ff   :  { %v663_v13 = vadd.f32 %v659_v11, %v218_v10  ;;  %v3109_v16 = vpop.f32.mrb[5].mxu1 }
 0x401   :  { %3502 = vtanh.f32 %v663_v13  ;;  %v2879_v22 = vmul.f32 -1.442695, %v663_v13 }
 0x402   :  { %3504 = vpow2.f32 %v2877_v21 }
 0x403   :  { %3506 = vpow2.f32 %v2879_v22 }
 0x405   :  { %v3501_v17 = vpop.eup %3500 }
 0x406   :  { %557 = vrot.lane.b32.xlu0 %v3501_v17, %s3771_s27 }
 0x40a   :  { %552 = vrot.lane.b32.xlu0 %v543_v18, %s3771_s27 }
 0x40b   :  { %v3503_v19 = vpop.eup %3502 }
 0x40c   :  { %678 = vrot.lane.b32.xlu1 %v3503_v19, %s3771_s27  ;;  %v3505_v15 = vpop.eup %3504 }
 0x40d   :  { %v547_v23 = vadd.f32 1.0, %v3505_v15  ;;  %v3507_v24 = vpop.eup %3506 }
 0x40e   :  { %673 = vrot.lane.b32.xlu0 %v664_v20, %s3771_s27  ;;  %v668_v25 = vadd.f32 1.0, %v3507_v24 }
 0x40f   :  { %3508 = vrcp.f32 %v547_v23 }
 0x410   :  { %3510 = vrcp.f32 %v668_v25 }
 0x419   :  { %v3509_v26 = vpop.eup %3508 }
 0x41a   :  { %v3511_v29 = vpop.eup %3510 }
 0x478   :  { %v558_v27 = vpop.permute.xlu0 %557 }
 0x479   :  { %v560_v28 = vmul.f32 %v3509_v26, %v558_v27 }
 0x47b   :  { %562 = vrot.lane.b32.xlu1 %v560_v28, %s3771_s27 }
 0x47c   :  { %v553_v32 = vpop.permute.xlu0 %552 }
 0x47d   :  { %v555_v33 = vmul.f32 %v3509_v26, %v553_v32 }
 0x47e   :  { %v679_v30 = vpop.permute.xlu1 %678 }
 0x47f   :  { %v681_v31 = vmul.f32 %v3511_v29, %v679_v30 }
 0x480   :  { %v674_v37 = vpop.permute.xlu0 %673 }
 0x481   :  { %683 = vrot.lane.b32.xlu1 %v681_v31, %s3771_s27  ;;  %v676_v38 = vmul.f32 %v3511_v29, %v674_v37 }
 0x4ed   :  { %v563_v34 = vpop.permute.xlu1 %562 }
 0x4ee   :  { %v565_v35 = vadd.f32 %v563_v34, %v555_v33 }
 0x4f0   :  { %3512 = vtanh.f32 %v565_v35 }
 0x4f3   :  { %v684_v39 = vpop.permute.xlu1 %683 }
 0x4f4   :  { %v686_v40 = vadd.f32 %v684_v39, %v676_v38 }
 0x4f6   :  { %3514 = vtanh.f32 %v686_v40 }
 0x4fa   :  { %v3513_v41 = vpop.eup %3512 }
 0x4fb   :  { %568 = vrot.lane.b32.xlu0 %v3513_v41, %s3771_s27 }
 0x500   :  { %v3515_v42 = vpop.eup %3514 }
 0x501   :  { %689 = vrot.lane.b32.xlu1 %v3515_v42, %s3771_s27 }
 0x56d   :  { %v569_v44 = vpop.permute.xlu0 %568 }
 0x56e   :  { %v571_v46 = vmul.f32 %v3509_v26, %v569_v44 }
 0x570   :  { %573 = vrot.lane.b32.xlu0 %v571_v46, %s3773_s18 }
 0x573   :  { %v690_v47 = vpop.permute.xlu1 %689 }
 0x574   :  { %v692_v48 = vmul.f32 %v3511_v29, %v690_v47  ;;  %578 = vrot.lane.b32.xlu0 %v565_v35, %s3772_s17 }
 0x576   :  { %694 = vrot.lane.b32.xlu1 %v692_v48, %s3773_s18 }
 0x57a   :  { %699 = vrot.lane.b32.xlu1 %v686_v40, %s3772_s17 }
 0x5e2   :  { %v574_v50 = vpop.permute.xlu0 %573 }
 0x5e3   :  { %576 = vst.msk [vmem:[#allocation2 + $0x8] sm:$0xff] %vm99_vm1, %v574_v50  ;;  %582 = vst.msk [vmem:[#allocation14] sm:$0xff] %vm99_vm1, %v574_v50 }
 0x5e6   :  { %v579_v51 = vpop.permute.xlu0 %578 }
 0x5e7   :  { %581 = vst.msk [vmem:[#allocation3 + $0x8] sm:$0xff] %vm99_vm1, %v579_v51 }
 0x5e8   :  { %v695_v52 = vpop.permute.xlu1 %694 }
 0x5e9   :  { %697 = vst.msk [vmem:[#allocation2] sm:$0xff] %vm99_vm1, %v695_v52  ;;  %3130 = vmatmul.mubr.msk.f32.vlgmr.msra.gmra.mrb[6].mxu1 %vm99_vm1, %v695_v52 }
 0x5ea   :  { %v707_v53 = vld [vmem:[#allocation2 + $0x8] sm:$0xff]  ;;  %3378 = vmatpush3.bf16.msra.mxu1 %v3946_v43  ;;  %3151 = vmatprep.mubr.msk.f32.mxu1 %vm3769_vm0, %v3770_v1 }
 0x5eb   :  { %3119 = vmatmul.mubr.msk.f32.vlgmr.msra.gmra.mrb[10].mxu0 %vm99_vm1, %v707_v53  ;;  %3379 = vmatprep.subr.bf16.mxu1 %v3768_v0 }
 0x5ec   :  { %3372 = vmatpush3.bf16.msra.mxu0 %v3915_v8  ;;  %v700_v54 = vpop.permute.xlu1 %699  ;;  %3140 = vmatprep.mubr.msk.f32.mxu0 %vm3769_vm0, %v3770_v1 }
 0x5ed   :  { %702 = vst.msk [vmem:[#allocation3] sm:$0xff] %vm99_vm1, %v700_v54  ;;  %3373 = vmatprep.subr.bf16.mxu0 %v3768_v0 }
 0x5ee   :  { %3381 = vmatpush3.bf16.msra.mxu1 %v3952_v49  ;;  %v865_v16 = vld [vmem:[#allocation3 + $0x8] sm:$0xff] }
 0x5ef   :  { %3388 = vmatprep.subr.bf16.mxu1 %v3768_v0 }
 0x5f0   :  { %3375 = vmatpush3.bf16.msra.mxu0 %v3919_v12  ;;  %v908_v55 = vld [vmem:[#allocation2] sm:$0xff] }
 0x5f1   :  { %3382 = vmatprep.subr.bf16.mxu0 %v3768_v0 }
 0x5f3   :  { %3141 = vmatmul.mubr.msk.f32.vlgmr.msra.gmra.mrb[12].mxu0 %vm99_vm1, %v908_v55 }
 0x5f4   :  { %3384 = vmatpush3.bf16.msra.mxu0 %v3940_v36  ;;  %3162 = vmatprep.mubr.msk.f32.mxu0 %vm3769_vm0, %v3770_v1  ;;  %v987_v18 = vld [vmem:[#allocation3] sm:$0xff] }
 0x5f5   :  { %3385 = vmatprep.subr.bf16.mxu0 %v3768_v0 }
 0x5f8   :  { %3387 = vmatpush3.bf16.msra.mxu0 %v3949_v45 }
 0x5f9   :  { %3394 = vmatprep.subr.bf16.mxu0 %v3768_v0 }
 0x6bc   :  { %v853_v62 = vpop.f32.mrb[6].mxu1 }
 0x6bd   :  { %v3131_v63 = vpop.f32.mrb[7].mxu1 }
 0x6be   :  { %v781_v2 = vpop.f32.mrb[10].mxu0 }
 0x6bf   :  { %v854_v3 = vadd.f32 %v853_v62, %v781_v2  ;;  %v3120_v4 = vpop.f32.mrb[11].mxu0 }
 0x6c1   :  { %v864_v6 = vadd.f32 %v4005_v5, %v854_v3  ;;  %v228_v3 = vadd.f32 %v3975_v56, %v3932_v14 }
 0x6c3   :  { %3516 = vtanh.f32 %v864_v6  ;;  %v2883_v19 = vmul.f32 -1.442695, %v864_v6 }
 0x6c6   :  { %v982_v9 = vpop.f32.mrb[12].mxu0 }
 0x6c7   :  { %v986_v10 = vadd.f32 %v982_v9, %v223_v7  ;;  %v3142_v11 = vpop.f32.mrb[13].mxu0 }
 0x6c9   :  { %3518 = vtanh.f32 %v986_v10  ;;  %v2885_v20 = vmul.f32 -1.442695, %v986_v10 }
 0x6ca   :  { %3520 = vpow2.f32 %v2883_v19 }
 0x6cb   :  { %3522 = vpow2.f32 %v2885_v20 }
 0x6cd   :  { %v3517_v13 = vpop.eup %3516 }
 0x6ce   :  { %879 = vrot.lane.b32.xlu0 %v3517_v13, %s3771_s27 }
 0x6d2   :  { %874 = vrot.lane.b32.xlu0 %v865_v16, %s3771_s27 }
 0x6d3   :  { %v3519_v17 = vpop.eup %3518 }
 0x6d4   :  { %1001 = vrot.lane.b32.xlu1 %v3519_v17, %s3771_s27  ;;  %v3521_v57 = vpop.eup %3520 }
 0x6d5   :  { %v869_v21 = vadd.f32 1.0, %v3521_v57  ;;  %v3523_v22 = vpop.eup %3522 }
 0x6d6   :  { %996 = vrot.lane.b32.xlu0 %v987_v18, %s3771_s27  ;;  %v991_v15 = vadd.f32 1.0, %v3523_v22 }
 0x6d7   :  { %3524 = vrcp.f32 %v869_v21 }
 0x6d8   :  { %3526 = vrcp.f32 %v991_v15 }
 0x6e1   :  { %v3525_v23 = vpop.eup %3524 }
 0x6e2   :  { %v3527_v26 = vpop.eup %3526 }
 0x740   :  { %v880_v24 = vpop.permute.xlu0 %879 }
 0x741   :  { %v882_v25 = vmul.f32 %v3525_v23, %v880_v24 }
 0x743   :  { %884 = vrot.lane.b32.xlu1 %v882_v25, %s3771_s27 }
 0x744   :  { %v875_v29 = vpop.permute.xlu0 %874 }
 0x745   :  { %v877_v30 = vmul.f32 %v3525_v23, %v875_v29 }
 0x746   :  { %v1002_v27 = vpop.permute.xlu1 %1001 }
 0x747   :  { %v1004_v28 = vmul.f32 %v3527_v26, %v1002_v27 }
 0x748   :  { %v997_v33 = vpop.permute.xlu0 %996 }
 0x749   :  { %1006 = vrot.lane.b32.xlu1 %v1004_v28, %s3771_s27  ;;  %v999_v34 = vmul.f32 %v3527_v26, %v997_v33 }
 0x7b5   :  { %v885_v31 = vpop.permute.xlu1 %884 }
 0x7b6   :  { %v887_v32 = vadd.f32 %v885_v31, %v877_v30 }
 0x7b8   :  { %3528 = vtanh.f32 %v887_v32 }
 0x7bb   :  { %v1007_v35 = vpop.permute.xlu1 %1006 }
 0x7bc   :  { %v1009_v37 = vadd.f32 %v1007_v35, %v999_v34 }
 0x7be   :  { %3530 = vtanh.f32 %v1009_v37 }
 0x7c2   :  { %v3529_v38 = vpop.eup %3528 }
 0x7c3   :  { %890 = vrot.lane.b32.xlu0 %v3529_v38, %s3771_s27 }
 0x7c8   :  { %v3531_v39 = vpop.eup %3530 }
 0x7c9   :  { %1012 = vrot.lane.b32.xlu1 %v3531_v39, %s3771_s27 }
 0x835   :  { %v891_v40 = vpop.permute.xlu0 %890 }
 0x836   :  { %v893_v41 = vmul.f32 %v3525_v23, %v891_v40 }
 0x838   :  { %895 = vrot.lane.b32.xlu0 %v893_v41, %s3773_s18 }
 0x83b   :  { %v1013_v42 = vpop.permute.xlu1 %1012 }
 0x83c   :  { %v1015_v44 = vmul.f32 %v3527_v26, %v1013_v42  ;;  %900 = vrot.lane.b32.xlu0 %v887_v32, %s3772_s17 }
 0x83e   :  { %1017 = vrot.lane.b32.xlu1 %v1015_v44, %s3773_s18 }
 0x842   :  { %1022 = vrot.lane.b32.xlu1 %v1009_v37, %s3772_s17 }
 0x8aa   :  { %v896_v46 = vpop.permute.xlu0 %895 }
 0x8ab   :  { %898 = vst.msk [vmem:[#allocation2 + $0x8] sm:$0xff] %vm99_vm1, %v896_v46  ;;  %905 = vst.msk [vmem:[#allocation14 + $0x8] sm:$0xff] %vm99_vm1, %v896_v46 }
 0x8ae   :  { %v901_v47 = vpop.permute.xlu0 %900 }
 0x8af   :  { %903 = vst.msk [vmem:[#allocation3 + $0x8] sm:$0xff] %vm99_vm1, %v901_v47 }
 0x8b0   :  { %v1018_v48 = vpop.permute.xlu1 %1017 }
 0x8b1   :  { %1020 = vst.msk [vmem:[#allocation2] sm:$0xff] %vm99_vm1, %v1018_v48  ;;  %3163 = vmatmul.mubr.msk.f32.vlgmr.msra.gmra.mrb[14].mxu0 %vm99_vm1, %v1018_v48 }
 0x8b2   :  { %v1030_v50 = vld [vmem:[#allocation2 + $0x8] sm:$0xff]  ;;  %3396 = vmatpush3.bf16.msra.mxu0 %v3946_v43  ;;  %3184 = vmatprep.mubr.msk.f32.mxu0 %vm3769_vm0, %v3770_v1 }
 0x8b3   :  { %3152 = vmatmul.mubr.msk.f32.vlgmr.msra.gmra.mrb[8].mxu1 %vm99_vm1, %v1030_v50  ;;  %3397 = vmatprep.subr.bf16.mxu0 %v3768_v0 }
 0x8b4   :  { %v1023_v51 = vpop.permute.xlu1 %1022  ;;  %3390 = vmatpush3.bf16.msra.mxu1 %v3915_v8  ;;  %3173 = vmatprep.mubr.msk.f32.mxu1 %vm3769_vm0, %v3770_v1 }
 0x8b5   :  { %1025 = vst.msk [vmem:[#allocation3] sm:$0xff] %vm99_vm1, %v1023_v51  ;;  %3391 = vmatprep.subr.bf16.mxu1 %v3768_v0 }
 0x8b6   :  { %3399 = vmatpush3.bf16.msra.mxu0 %v3952_v49  ;;  %v1188_v10 = vld [vmem:[#allocation3 + $0x8] sm:$0xff] }
 0x8b7   :  { %3406 = vmatprep.subr.bf16.mxu0 %v3768_v0 }
 0x8b8   :  { %3393 = vmatpush3.bf16.msra.mxu1 %v3919_v12  ;;  %v1231_v52 = vld [vmem:[#allocation2] sm:$0xff] }
 0x8b9   :  { %3400 = vmatprep.subr.bf16.mxu1 %v3768_v0 }
 0x8bb   :  { %3174 = vmatmul.mubr.msk.f32.vlgmr.msra.gmra.mrb[10].mxu1 %vm99_vm1, %v1231_v52 }
 0x8bc   :  { %3402 = vmatpush3.bf16.msra.mxu1 %v3940_v36  ;;  %3195 = vmatprep.mubr.msk.f32.mxu1 %vm3769_vm0, %v3770_v1  ;;  %v1310_v13 = vld [vmem:[#allocation3] sm:$0xff] }
 0x8bd   :  { %3403 = vmatprep.subr.bf16.mxu1 %v3768_v0 }
 0x8c0   :  { %3405 = vmatpush3.bf16.msra.mxu1 %v3949_v45 }
 0x8c1   :  { %3412 = vmatprep.subr.bf16.mxu1 %v3768_v0 }
 0x984   :  { %v1176_v53 = vpop.f32.mrb[14].mxu0 }
 0x985   :  { %v3164_v54 = vpop.f32.mrb[15].mxu0 }
 0x986   :  { %v1104_v55 = vpop.f32.mrb[8].mxu1 }
 0x987   :  { %v1177_v62 = vadd.f32 %v1176_v53, %v1104_v55  ;;  %v3153_v63 = vpop.f32.mrb[9].mxu1  ;;  %v233_v55 = vadd.f32 %v3932_v14, %v3981_v59 }
 0x989   :  { %v1187_v2 = vadd.f32 %v4005_v5, %v1177_v62 }
 0x98b   :  { %3532 = vtanh.f32 %v1187_v2  ;;  %v2889_v16 = vmul.f32 -1.442695, %v1187_v2 }
 0x98e   :  { %v1305_v4 = vpop.f32.mrb[10].mxu1 }
 0x98f   :  { %v1309_v6 = vadd.f32 %v1305_v4, %v228_v3  ;;  %v3175_v7 = vpop.f32.mrb[11].mxu1 }
 0x991   :  { %3534 = vtanh.f32 %v1309_v6  ;;  %v2891_v17 = vmul.f32 -1.442695, %v1309_v6 }
 0x992   :  { %3536 = vpow2.f32 %v2889_v16 }
 0x993   :  { %3538 = vpow2.f32 %v2891_v17 }
 0x995   :  { %v3533_v9 = vpop.eup %3532 }
 0x996   :  { %1202 = vrot.lane.b32.xlu0 %v3533_v9, %s3771_s27 }
 0x99a   :  { %1197 = vrot.lane.b32.xlu0 %v1188_v10, %s3771_s27 }
 0x99b   :  { %v3535_v11 = vpop.eup %3534 }
 0x99c   :  { %1324 = vrot.lane.b32.xlu1 %v3535_v11, %s3771_s27  ;;  %v3537_v56 = vpop.eup %3536 }
 0x99d   :  { %v1192_v18 = vadd.f32 1.0, %v3537_v56  ;;  %v3539_v19 = vpop.eup %3538 }
 0x99e   :  { %1319 = vrot.lane.b32.xlu0 %v1310_v13, %s3771_s27  ;;  %v1314_v20 = vadd.f32 1.0, %v3539_v19 }
 0x99f   :  { %3540 = vrcp.f32 %v1192_v18 }
 0x9a0   :  { %3542 = vrcp.f32 %v1314_v20 }
 0x9a9   :  { %v3541_v57 = vpop.eup %3540 }
 0x9aa   :  { %v3543_v15 = vpop.eup %3542 }
 0xa08   :  { %v1203_v21 = vpop.permute.xlu0 %1202 }
 0xa09   :  { %v1205_v22 = vmul.f32 %v3541_v57, %v1203_v21 }
 0xa0b   :  { %1207 = vrot.lane.b32.xlu1 %v1205_v22, %s3771_s27 }
 0xa0c   :  { %v1198_v25 = vpop.permute.xlu0 %1197 }
 0xa0d   :  { %v1200_v26 = vmul.f32 %v3541_v57, %v1198_v25 }
 0xa0e   :  { %v1325_v23 = vpop.permute.xlu1 %1324 }
 0xa0f   :  { %v1327_v24 = vmul.f32 %v3543_v15, %v1325_v23 }
 0xa10   :  { %v1320_v29 = vpop.permute.xlu0 %1319 }
 0xa11   :  { %1329 = vrot.lane.b32.xlu1 %v1327_v24, %s3771_s27  ;;  %v1322_v30 = vmul.f32 %v3543_v15, %v1320_v29 }
 0xa7d   :  { %v1208_v27 = vpop.permute.xlu1 %1207 }
 0xa7e   :  { %v1210_v28 = vadd.f32 %v1208_v27, %v1200_v26 }
 0xa80   :  { %3544 = vtanh.f32 %v1210_v28 }
 0xa83   :  { %v1330_v31 = vpop.permute.xlu1 %1329 }
 0xa84   :  { %v1332_v32 = vadd.f32 %v1330_v31, %v1322_v30 }
 0xa86   :  { %3546 = vtanh.f32 %v1332_v32 }
 0xa8a   :  { %v3545_v33 = vpop.eup %3544 }
 0xa8b   :  { %1213 = vrot.lane.b32.xlu0 %v3545_v33, %s3771_s27 }
 0xa90   :  { %v3547_v34 = vpop.eup %3546 }
 0xa91   :  { %1335 = vrot.lane.b32.xlu1 %v3547_v34, %s3771_s27 }
 0xafd   :  { %v1214_v35 = vpop.permute.xlu0 %1213 }
 0xafe   :  { %v1216_v37 = vmul.f32 %v3541_v57, %v1214_v35 }
 0xb00   :  { %1218 = vrot.lane.b32.xlu0 %v1216_v37, %s3773_s18 }
 0xb03   :  { %v1336_v38 = vpop.permute.xlu1 %1335 }
 0xb04   :  { %v1338_v39 = vmul.f32 %v3543_v15, %v1336_v38  ;;  %1223 = vrot.lane.b32.xlu0 %v1210_v28, %s3772_s17 }
 0xb06   :  { %1340 = vrot.lane.b32.xlu1 %v1338_v39, %s3773_s18 }
 0xb0a   :  { %1345 = vrot.lane.b32.xlu1 %v1332_v32, %s3772_s17 }
 0xb72   :  { %v1219_v40 = vpop.permute.xlu0 %1218 }
 0xb73   :  { %1221 = vst.msk [vmem:[#allocation2 + $0x8] sm:$0xff] %vm99_vm1, %v1219_v40  ;;  %1228 = vst.msk [vmem:[#allocation14 + $0x10] sm:$0xff] %vm99_vm1, %v1219_v40 }
 0xb76   :  { %v1224_v41 = vpop.permute.xlu0 %1223 }
 0xb77   :  { %1226 = vst.msk [vmem:[#allocation3 + $0x8] sm:$0xff] %vm99_vm1, %v1224_v41 }
 0xb78   :  { %v1341_v42 = vpop.permute.xlu1 %1340 }
 0xb79   :  { %1343 = vst.msk [vmem:[#allocation2] sm:$0xff] %vm99_vm1, %v1341_v42  ;;  %3196 = vmatmul.mubr.msk.f32.vlgmr.msra.gmra.mrb[12].mxu1 %vm99_vm1, %v1341_v42 }
 0xb7a   :  { %v1353_v44 = vld [vmem:[#allocation2 + $0x8] sm:$0xff]  ;;  %3414 = vmatpush3.bf16.msra.mxu1 %v3946_v43  ;;  %3217 = vmatprep.mubr.msk.f32.mxu1 %vm3769_vm0, %v3770_v1 }
 0xb7b   :  { %3185 = vmatmul.mubr.msk.f32.vlgmr.msra.gmra.mrb[16].mxu0 %vm99_vm1, %v1353_v44  ;;  %3415 = vmatprep.subr.bf16.mxu1 %v3768_v0 }
 0xb7c   :  { %3408 = vmatpush3.bf16.msra.mxu0 %v3915_v8  ;;  %v1346_v46 = vpop.permute.xlu1 %1345  ;;  %3206 = vmatprep.mubr.msk.f32.mxu0 %vm3769_vm0, %v3770_v1 }
 0xb7d   :  { %1348 = vst.msk [vmem:[#allocation3] sm:$0xff] %vm99_vm1, %v1346_v46  ;;  %3409 = vmatprep.subr.bf16.mxu0 %v3768_v0 }
 0xb7e   :  { %3417 = vmatpush3.bf16.msra.mxu1 %v3952_v49  ;;  %v1511_v4 = vld [vmem:[#allocation3 + $0x8] sm:$0xff] }
 0xb7f   :  { %3424 = vmatprep.subr.bf16.mxu1 %v3768_v0 }
 0xb80   :  { %3411 = vmatpush3.bf16.msra.mxu0 %v3919_v12  ;;  %v1554_v47 = vld [vmem:[#allocation2] sm:$0xff] }
 0xb81   :  { %3418 = vmatprep.subr.bf16.mxu0 %v3768_v0 }
 0xb83   :  { %3207 = vmatmul.mubr.msk.f32.vlgmr.msra.gmra.mrb[18].mxu0 %vm99_vm1, %v1554_v47 }
 0xb84   :  { %3420 = vmatpush3.bf16.msra.mxu0 %v3940_v36  ;;  %3228 = vmatprep.mubr.msk.f32.mxu0 %vm3769_vm0, %v3770_v1  ;;  %v1633_v7 = vld [vmem:[#allocation3] sm:$0xff] }
 0xb85   :  { %3421 = vmatprep.subr.bf16.mxu0 %v3768_v0 }
 0xb88   :  { %3423 = vmatpush3.bf16.msra.mxu0 %v3949_v45 }
 0xb89   :  { %3430 = vmatprep.subr.bf16.mxu0 %v3768_v0 }
 0xc4c   :  { %v1499_v48 = vpop.f32.mrb[12].mxu1 }
 0xc4d   :  { %v3197_v50 = vpop.f32.mrb[13].mxu1 }
 0xc4e   :  { %v1427_v51 = vpop.f32.mrb[16].mxu0 }
 0xc4f   :  { %v1500_v52 = vadd.f32 %v1499_v48, %v1427_v51  ;;  %v3186_v53 = vpop.f32.mrb[17].mxu0 }
 0xc51   :  { %v1510_v54 = vadd.f32 %v4005_v5, %v1500_v52 }
 0xc53   :  { %3548 = vtanh.f32 %v1510_v54  ;;  %v2895_v9 = vmul.f32 -1.442695, %v1510_v54 }
 0xc56   :  { %v1628_v62 = vpop.f32.mrb[18].mxu0 }
 0xc57   :  { %v1632_v63 = vadd.f32 %v1628_v62, %v233_v55  ;;  %v3208_v2 = vpop.f32.mrb[19].mxu0 }
 0xc59   :  { %3550 = vtanh.f32 %v1632_v63  ;;  %v2897_v10 = vmul.f32 -1.442695, %v1632_v63 }
 0xc5a   :  { %3552 = vpow2.f32 %v2895_v9 }
 0xc5b   :  { %3554 = vpow2.f32 %v2897_v10 }
 0xc5d   :  { %v3549_v3 = vpop.eup %3548 }
 0xc5e   :  { %1525 = vrot.lane.b32.xlu0 %v3549_v3, %s3771_s27 }
 0xc62   :  { %1520 = vrot.lane.b32.xlu0 %v1511_v4, %s3771_s27 }
 0xc63   :  { %v3551_v6 = vpop.eup %3550 }
 0xc64   :  { %1647 = vrot.lane.b32.xlu1 %v3551_v6, %s3771_s27  ;;  %v3553_v59 = vpop.eup %3552 }
 0xc65   :  { %v1515_v11 = vadd.f32 1.0, %v3553_v59  ;;  %v3555_v13 = vpop.eup %3554 }
 0xc66   :  { %1642 = vrot.lane.b32.xlu0 %v1633_v7, %s3771_s27  ;;  %v1637_v16 = vadd.f32 1.0, %v3555_v13 }
 0xc67   :  { %3556 = vrcp.f32 %v1515_v11 }
 0xc68   :  { %3558 = vrcp.f32 %v1637_v16 }
 0xc71   :  { %v3557_v17 = vpop.eup %3556 }
 0xc72   :  { %v3559_v19 = vpop.eup %3558 }
 0xcd0   :  { %v1526_v56 = vpop.permute.xlu0 %1525 }
 0xcd1   :  { %v1528_v18 = vmul.f32 %v3557_v17, %v1526_v56 }
 0xcd3   :  { %1530 = vrot.lane.b32.xlu1 %v1528_v18, %s3771_s27 }
 0xcd4   :  { %v1521_v21 = vpop.permute.xlu0 %1520 }
 0xcd5   :  { %v1523_v22 = vmul.f32 %v3557_v17, %v1521_v21 }
 0xcd6   :  { %v1648_v20 = vpop.permute.xlu1 %1647 }
 0xcd7   :  { %v1650_v57 = vmul.f32 %v3559_v19, %v1648_v20 }
 0xcd8   :  { %v1643_v24 = vpop.permute.xlu0 %1642 }
 0xcd9   :  { %1652 = vrot.lane.b32.xlu1 %v1650_v57, %s3771_s27  ;;  %v1645_v25 = vmul.f32 %v3559_v19, %v1643_v24 }
 0xd45   :  { %v1531_v15 = vpop.permute.xlu1 %1530 }
 0xd46   :  { %v1533_v23 = vadd.f32 %v1531_v15, %v1523_v22  ;;  %v2201_v15 = vld [vmem:[#allocation10] sm:$0xff] }
 0xd48   :  { %3560 = vtanh.f32 %v1533_v23 }
 0xd4b   :  { %v1653_v26 = vpop.permute.xlu1 %1652 }
 0xd4c   :  { %v1655_v27 = vadd.f32 %v1653_v26, %v1645_v25 }
 0xd4e   :  { %3562 = vtanh.f32 %v1655_v27 }
 0xd52   :  { %v3561_v28 = vpop.eup %3560 }
 0xd53   :  { %1536 = vrot.lane.b32.xlu0 %v3561_v28, %s3771_s27  ;;  %v2204_v28 = vld [vmem:[#allocation10 + $0x18] sm:$0xff] }
 0xd58   :  { %v3563_v29 = vpop.eup %3562 }
 0xd59   :  { %1658 = vrot.lane.b32.xlu1 %v3563_v29, %s3771_s27 }
 0xdc5   :  { %v1537_v30 = vpop.permute.xlu0 %1536 }
 0xdc6   :  { %v1539_v31 = vmul.f32 %v3557_v17, %v1537_v30 }
 0xdc8   :  { %1541 = vrot.lane.b32.xlu0 %v1539_v31, %s3773_s18 }
 0xdcb   :  { %v1659_v32 = vpop.permute.xlu1 %1658 }
 0xdcc   :  { %v1661_v33 = vmul.f32 %v3559_v19, %v1659_v32  ;;  %1546 = vrot.lane.b32.xlu0 %v1533_v23, %s3772_s17  ;;  %v2202_v23 = vld [vmem:[#allocation10 + $0x8] sm:$0xff] }
 0xdcd   :  { %v4189_v26 = vpack.c.bf16 %v2202_v23, %v2201_v15 }
 0xdce   :  { %1663 = vrot.lane.b32.xlu1 %v1661_v33, %s3773_s18 }
 0xdd2   :  { %1668 = vrot.lane.b32.xlu1 %v1655_v27, %s3772_s17  ;;  %v2203_v27 = vld [vmem:[#allocation10 + $0x10] sm:$0xff] }
 0xdd3   :  { %v4197_v31 = vpack.c.bf16 %v2204_v28, %v2203_v27 }
 0xe3a   :  { %v1542_v34 = vpop.permute.xlu0 %1541 }
 0xe3b   :  { %1544 = vst.msk [vmem:[#allocation2 + $0x8] sm:$0xff] %vm99_vm1, %v1542_v34  ;;  %1551 = vst.msk [vmem:[#allocation14 + $0x18] sm:$0xff] %vm99_vm1, %v1542_v34 }
 0xe3e   :  { %v1547_v35 = vpop.permute.xlu0 %1546 }
 0xe3f   :  { %1549 = vst.msk [vmem:[#allocation3 + $0x8] sm:$0xff] %vm99_vm1, %v1547_v35 }
 0xe40   :  { %v1664_v37 = vpop.permute.xlu1 %1663 }
 0xe41   :  { %1666 = vst.msk [vmem:[#allocation2] sm:$0xff] %vm99_vm1, %v1664_v37  ;;  %3229 = vmatmul.mubr.msk.f32.vlgmr.msra.gmra.mrb[20].mxu0 %vm99_vm1, %v1664_v37 }
 0xe42   :  { %v1676_v38 = vld [vmem:[#allocation2 + $0x8] sm:$0xff]  ;;  %3432 = vmatpush3.bf16.msra.mxu0 %v3946_v43  ;;  %3250 = vmatprep.mubr.msk.f32.mxu0 %vm3769_vm0, %v3770_v1 }
 0xe43   :  { %3218 = vmatmul.mubr.msk.f32.vlgmr.msra.gmra.mrb[14].mxu1 %vm99_vm1, %v1676_v38  ;;  %3433 = vmatprep.subr.bf16.mxu0 %v3768_v0 }
 0xe44   :  { %v1669_v39 = vpop.permute.xlu1 %1668  ;;  %3426 = vmatpush3.bf16.msra.mxu1 %v3915_v8  ;;  %3239 = vmatprep.mubr.msk.f32.mxu1 %vm3769_vm0, %v3770_v1 }
 0xe45   :  { %1671 = vst.msk [vmem:[#allocation3] sm:$0xff] %vm99_vm1, %v1669_v39  ;;  %3427 = vmatprep.subr.bf16.mxu1 %v3768_v0 }
 0xe46   :  { %3435 = vmatpush3.bf16.msra.mxu0 %v3952_v49 }
 0xe47   :  { %3442 = vmatprep.subr.bf16.mxu0 %v3768_v0 }
 0xe48   :  { %3429 = vmatpush3.bf16.msra.mxu1 %v3919_v12  ;;  %v1877_v43 = vld [vmem:[#allocation2] sm:$0xff] }
 0xe49   :  { %3436 = vmatprep.subr.bf16.mxu1 %v3768_v0 }
 0xe4b   :  { %3240 = vmatmul.mubr.msk.f32.vlgmr.msra.gmra.mrb[16].mxu1 %vm99_vm1, %v1877_v43  ;;  %v4212_v43 = vld [vmem:[%s4307_s3] ss:$0 sm:$0xff] }
 0xe4c   :  { %3438 = vmatpush3.bf16.msra.mxu1 %v3940_v36  ;;  %3261 = vmatprep.mubr.msk.f32.mxu1 %vm3769_vm0, %v3770_v1  ;;  %v238_v36 = vadd.f32 %v3979_v58, %v3932_v14  ;;  %v1956_v51 = vld [vmem:[#allocation3] sm:$0xff] }
 0xe4d   :  { %3439 = vmatprep.subr.bf16.mxu1 %v3768_v0 }
 0xe50   :  { %3441 = vmatpush3.bf16.msra.mxu1 %v3949_v45  ;;  %v1834_v45 = vld [vmem:[#allocation3 + $0x8] sm:$0xff] }
 0xe51   :  { %3448 = vmatprep.subr.bf16.mxu1 %v3768_v0 }
 0xf14   :  { %v1822_v8 = vpop.f32.mrb[20].mxu0 }
 0xf15   :  { %v3230_v49 = vpop.f32.mrb[21].mxu0 }
 0xf16   :  { %v1750_v40 = vpop.f32.mrb[14].mxu1 }
 0xf17   :  { %v1823_v12 = vadd.f32 %v1822_v8, %v1750_v40  ;;  %v3219_v41 = vpop.f32.mrb[15].mxu1  ;;  %v243_v8 = vadd.f32 %v4212_v43, %v3985_v61 }
 0xf19   :  { %v1833_v42 = vadd.f32 %v4005_v5, %v1823_v12 }
 0xf1b   :  { %3564 = vtanh.f32 %v1833_v42  ;;  %v2901_v52 = vmul.f32 -1.442695, %v1833_v42 }
 0xf1e   :  { %v1951_v44 = vpop.f32.mrb[16].mxu1 }
 0xf1f   :  { %v1955_v46 = vadd.f32 %v1951_v44, %v238_v36  ;;  %v3241_v47 = vpop.f32.mrb[17].mxu1 }
 0xf21   :  { %3566 = vtanh.f32 %v1955_v46  ;;  %v2903_v53 = vmul.f32 -1.442695, %v1955_v46 }
 0xf22   :  { %3568 = vpow2.f32 %v2901_v52 }
 0xf23   :  { %3570 = vpow2.f32 %v2903_v53 }
 0xf25   :  { %v3565_v48 = vpop.eup %3564 }
 0xf26   :  { %1848 = vrot.lane.b32.xlu0 %v3565_v48, %s3771_s27 }
 0xf2a   :  { %1843 = vrot.lane.b32.xlu0 %v1834_v45, %s3771_s27 }
 0xf2b   :  { %v3567_v50 = vpop.eup %3566 }
 0xf2c   :  { %1970 = vrot.lane.b32.xlu1 %v3567_v50, %s3771_s27  ;;  %v3569_v14 = vpop.eup %3568 }
 0xf2d   :  { %v1838_v58 = vadd.f32 1.0, %v3569_v14  ;;  %v3571_v54 = vpop.eup %3570 }
 0xf2e   :  { %1965 = vrot.lane.b32.xlu0 %v1956_v51, %s3771_s27  ;;  %v1960_v55 = vadd.f32 1.0, %v3571_v54 }
 0xf2f   :  { %3572 = vrcp.f32 %v1838_v58 }
 0xf30   :  { %3574 = vrcp.f32 %v1960_v55 }
 0xf39   :  { %v3573_v62 = vpop.eup %3572 }
 0xf3a   :  { %v3575_v3 = vpop.eup %3574 }
 0xf98   :  { %v1849_v63 = vpop.permute.xlu0 %1848 }
 0xf99   :  { %v1851_v2 = vmul.f32 %v3573_v62, %v1849_v63 }
 0xf9b   :  { %1853 = vrot.lane.b32.xlu1 %v1851_v2, %s3771_s27 }
 0xf9c   :  { %v1844_v7 = vpop.permute.xlu0 %1843 }
 0xf9d   :  { %v1846_v9 = vmul.f32 %v3573_v62, %v1844_v7 }
 0xf9e   :  { %v1971_v4 = vpop.permute.xlu1 %1970 }
 0xf9f   :  { %v1973_v6 = vmul.f32 %v3575_v3, %v1971_v4 }
 0xfa0   :  { %v1966_v11 = vpop.permute.xlu0 %1965 }
 0xfa1   :  { %1975 = vrot.lane.b32.xlu1 %v1973_v6, %s3771_s27  ;;  %v1968_v13 = vmul.f32 %v3575_v3, %v1966_v11 }
0x100d   :  { %v1854_v10 = vpop.permute.xlu1 %1853 }
0x100e   :  { %v1856_v59 = vadd.f32 %v1854_v10, %v1846_v9  ;;  %v2318_v9 = vld [vmem:[#allocation11] sm:$0xff]  ;;  %v2319_v10 = vld [vmem:[#allocation11 + $0x8] sm:$0xff] }
0x1010   :  { %3576 = vtanh.f32 %v1856_v59 }
0x1013   :  { %v1976_v16 = vpop.permute.xlu1 %1975 }
0x1014   :  { %v1978_v17 = vadd.f32 %v1976_v16, %v1968_v13  ;;  %v2323_v13 = vld [vmem:[#allocation13] sm:$0xff]  ;;  %v2324_v16 = vld [vmem:[#allocation13 + $0x8] sm:$0xff] }
0x1016   :  { %3578 = vtanh.f32 %v1978_v17 }
0x101a   :  { %v3577_v56 = vpop.eup %3576 }
0x101b   :  { %1859 = vrot.lane.b32.xlu0 %v3577_v56, %s3771_s27  ;;  %v2320_v56 = vld [vmem:[#allocation11 + $0x10] sm:$0xff] }
0x1020   :  { %v3579_v18 = vpop.eup %3578 }
0x1021   :  { %1981 = vrot.lane.b32.xlu1 %v3579_v18, %s3771_s27  ;;  %v2321_v18 = vld [vmem:[#allocation11 + $0x18] sm:$0xff] }
0x108d   :  { %v1860_v19 = vpop.permute.xlu0 %1859 }
0x108e   :  { %v1862_v20 = vmul.f32 %v3573_v62, %v1860_v19  ;;  %v3458_v19 = vpack.c.bf16 %v2321_v18, %v2320_v56 }
0x1090   :  { %1864 = vrot.lane.b32.xlu0 %v1862_v20, %s3773_s18  ;;  %v2325_v20 = vld [vmem:[#allocation13 + $0x10] sm:$0xff] }
0x1093   :  { %v1982_v57 = vpop.permute.xlu1 %1981 }
0x1094   :  { %v1984_v21 = vmul.f32 %v3575_v3, %v1982_v57  ;;  %1869 = vrot.lane.b32.xlu0 %v1856_v59, %s3772_s17  ;;  %v3455_v59 = vpack.c.bf16 %v2319_v10, %v2318_v9  ;;  %v2326_v57 = vld [vmem:[#allocation13 + $0x18] sm:$0xff] }
0x1096   :  { %1986 = vrot.lane.b32.xlu1 %v1984_v21, %s3773_s18  ;;  %v3452_v21 = vpack.c.bf16 %v2326_v57, %v2325_v20 }
0x109a   :  { %1991 = vrot.lane.b32.xlu1 %v1978_v17, %s3772_s17  ;;  %v3449_v17 = vpack.c.bf16 %v2324_v16, %v2323_v13 }
0x1102   :  { %v1865_v22 = vpop.permute.xlu0 %1864 }
0x1103   :  { %1867 = vst.msk [vmem:[#allocation2 + $0x8] sm:$0xff] %vm99_vm1, %v1865_v22  ;;  %1874 = vst.msk [vmem:[#allocation14 + $0x20] sm:$0xff] %vm99_vm1, %v1865_v22 }
0x1106   :  { %v1870_v24 = vpop.permute.xlu0 %1869 }
0x1107   :  { %1872 = vst.msk [vmem:[#allocation3 + $0x8] sm:$0xff] %vm99_vm1, %v1870_v24 }
0x1108   :  { %v1987_v25 = vpop.permute.xlu1 %1986 }
0x1109   :  { %1989 = vst.msk [vmem:[#allocation2] sm:$0xff] %vm99_vm1, %v1987_v25  ;;  %3262 = vmatmul.mubr.msk.f32.vlgmr.msra.gmra.mrb[18].mxu1 %vm99_vm1, %v1987_v25 }
0x110a   :  { %v1999_v29 = vld [vmem:[#allocation2 + $0x8] sm:$0xff]  ;;  %3283 = vmatprep.mubr.msk.f32.mxu1 %vm3769_vm0, %v3770_v1  ;;  %3450 = vmatpush3.bf16.msra.mxu1 %v3449_v17 }
0x110b   :  { %3251 = vmatmul.mubr.msk.f32.vlgmr.msra.gmra.mrb[22].mxu0 %vm99_vm1, %v1999_v29  ;;  %3451 = vmatprep.subr.bf16.mxu1 %v3768_v0 }
0x110c   :  { %3444 = vmatpush3.bf16.msra.mxu0 %v4189_v26  ;;  %v1992_v30 = vpop.permute.xlu1 %1991  ;;  %3272 = vmatprep.mubr.msk.f32.mxu0 %vm3769_vm0, %v3770_v1 }
0x110d   :  { %1994 = vst.msk [vmem:[#allocation3] sm:$0xff] %vm99_vm1, %v1992_v30  ;;  %3445 = vmatprep.subr.bf16.mxu0 %v3768_v0 }
0x110e   :  { %v2157_v42 = vld [vmem:[#allocation3 + $0x8] sm:$0xff]  ;;  %3453 = vmatpush3.bf16.msra.mxu1 %v3452_v21 }
0x110f   :  { %3460 = vmatprep.subr.bf16.mxu1 %v3768_v0 }
0x1110   :  { %3447 = vmatpush3.bf16.msra.mxu0 %v4197_v31  ;;  %v2200_v32 = vld [vmem:[#allocation2] sm:$0xff] }
0x1111   :  { %3454 = vmatprep.subr.bf16.mxu0 %v3768_v0 }
0x1113   :  { %3273 = vmatmul.mubr.msk.f32.vlgmr.msra.gmra.mrb[24].mxu0 %vm99_vm1, %v2200_v32 }
0x1114   :  { %3294 = vmatprep.mubr.msk.f32.mxu0 %vm3769_vm0, %v3770_v1  ;;  %v2279_v36 = vld [vmem:[#allocation3] sm:$0xff]  ;;  %3456 = vmatpush3.bf16.msra.mxu0 %v3455_v59 }
0x1115   :  { %3457 = vmatprep.subr.bf16.mxu0 %v3768_v0 }
0x1118   :  { %3459 = vmatpush3.bf16.msra.mxu0 %v3458_v19 }
0x1119   :  { %3466 = vmatprep.subr.bf16.mxu0 %v3768_v0 }
0x11dc   :  { %v2145_v33 = vpop.f32.mrb[18].mxu1 }
0x11dd   :  { %v3263_v34 = vpop.f32.mrb[19].mxu1 }
0x11de   :  { %v2073_v35 = vpop.f32.mrb[22].mxu0 }
0x11df   :  { %v2146_v37 = vadd.f32 %v2145_v33, %v2073_v35  ;;  %v3252_v38 = vpop.f32.mrb[23].mxu0  ;;  %v4255_v35 = vld [vmem:[%s4310_s6] ss:$0 sm:$0xff]  ;;  %s3774_s6 = smov [#allocation14]  }
0x11e0   :  { %s2849_s24 = sshll.u32 %s3774_s6, 4  ;;  %s2850_s24 = int_to_ptr.vmem [resolvable:$true] %s2849_s24 }
0x11e1   :  { %v2156_v39 = vadd.f32 %v4005_v5, %v2146_v37  ;;  %s3731_s1 = scalar_lea.vmem %s2850_s24, 1024  ;;  %p3736_p13 = scmp.lt.s32.totalorder %s2850_s24, %s2850_s24 }
0x11e2   :  { %p3732_p12 = scmp.ne.s32.totalorder %s2850_s24, %s3731_s1  ;;  %p3737_p0 = scmp.lt.s32.totalorder %s3731_s1, %s3731_s1 }
0x11e3   :  { %3580 = vtanh.f32 %v2156_v39  ;;  %v2907_v44 = vmul.f32 -1.442695, %v2156_v39  ;;  %v248_v39 = vadd.f32 %v4212_v43, %v3983_v60 }
0x11e4   :  { %p3738_p1 = por %p3737_p0, %p3736_p13 }
0x11e6   :  { %v2274_v49 = vpop.f32.mrb[24].mxu0  ;;  %p3739_p2 = pnand %p3738_p1, %p3732_p12 }
0x11e7   :  { %v2278_v40 = vadd.f32 %v2274_v49, %v243_v8  ;;  %v3274_v12 = vpop.f32.mrb[25].mxu0 }
0x11e9   :  { %3582 = vtanh.f32 %v2278_v40  ;;  %v2909_v46 = vmul.f32 -1.442695, %v2278_v40 }
0x11ea   :  { %3584 = vpow2.f32 %v2907_v44 }
0x11eb   :  { %3586 = vpow2.f32 %v2909_v46 }
0x11ed   :  { %v3581_v41 = vpop.eup %3580 }
0x11ee   :  { %2171 = vrot.lane.b32.xlu0 %v3581_v41, %s3771_s27 }
0x11f2   :  { %2166 = vrot.lane.b32.xlu0 %v2157_v42, %s3771_s27 }
0x11f3   :  { %v3583_v5 = vpop.eup %3582 }
0x11f4   :  { %2293 = vrot.lane.b32.xlu1 %v3583_v5, %s3771_s27  ;;  %v3585_v61 = vpop.eup %3584 }
0x11f5   :  { %v2161_v47 = vadd.f32 1.0, %v3585_v61  ;;  %v3587_v48 = vpop.eup %3586 }
0x11f6   :  { %2288 = vrot.lane.b32.xlu0 %v2279_v36, %s3771_s27  ;;  %v2283_v45 = vadd.f32 1.0, %v3587_v48 }
0x11f7   :  { %3588 = vrcp.f32 %v2161_v47 }
0x11f8   :  { %3590 = vrcp.f32 %v2283_v45 }
0x1201   :  { %v3589_v50 = vpop.eup %3588 }
0x1202   :  { %v3591_v53 = vpop.eup %3590 }
0x1260   :  { %v2172_v51 = vpop.permute.xlu0 %2171 }
0x1261   :  { %v2174_v52 = vmul.f32 %v3589_v50, %v2172_v51 }
0x1263   :  { %2176 = vrot.lane.b32.xlu1 %v2174_v52, %s3771_s27 }
0x1264   :  { %v2167_v54 = vpop.permute.xlu0 %2166 }
0x1265   :  { %v2169_v55 = vmul.f32 %v3589_v50, %v2167_v54 }
0x1266   :  { %v2294_v14 = vpop.permute.xlu1 %2293 }
0x1267   :  { %v2296_v58 = vmul.f32 %v3591_v53, %v2294_v14 }
0x1268   :  { %v2289_v2 = vpop.permute.xlu0 %2288 }
0x1269   :  { %2298 = vrot.lane.b32.xlu1 %v2296_v58, %s3771_s27  ;;  %v2291_v3 = vmul.f32 %v3591_v53, %v2289_v2 }
0x12d5   :  { %v2177_v62 = vpop.permute.xlu1 %2176 }
0x12d6   :  { %v2179_v63 = vadd.f32 %v2177_v62, %v2169_v55 }
0x12d8   :  { %3592 = vtanh.f32 %v2179_v63 }
0x12db   :  { %v2299_v4 = vpop.permute.xlu1 %2298 }
0x12dc   :  { %v2301_v6 = vadd.f32 %v2299_v4, %v2291_v3 }
0x12de   :  { %3594 = vtanh.f32 %v2301_v6 }
0x12e2   :  { %v3593_v7 = vpop.eup %3592 }
0x12e3   :  { %2182 = vrot.lane.b32.xlu0 %v3593_v7, %s3771_s27 }
0x12e8   :  { %v3595_v11 = vpop.eup %3594 }
0x12e9   :  { %2304 = vrot.lane.b32.xlu1 %v3595_v11, %s3771_s27 }
0x1355   :  { %v2183_v22 = vpop.permute.xlu0 %2182 }
0x1356   :  { %v2185_v15 = vmul.f32 %v3589_v50, %v2183_v22 }
0x1358   :  { %2187 = vrot.lane.b32.xlu0 %v2185_v15, %s3773_s18 }
0x135b   :  { %v2305_v23 = vpop.permute.xlu1 %2304 }
0x135c   :  { %v2307_v24 = vmul.f32 %v3591_v53, %v2305_v23  ;;  %2192 = vrot.lane.b32.xlu0 %v2179_v63, %s3772_s17 }
0x135e   :  { %2309 = vrot.lane.b32.xlu1 %v2307_v24, %s3773_s18 }
0x1362   :  { %2314 = vrot.lane.b32.xlu1 %v2301_v6, %s3772_s17 }
0x13ca   :  { %v2188_v25 = vpop.permute.xlu0 %2187 }
0x13cb   :  { %2190 = vst.msk [vmem:[#allocation2 + $0x8] sm:$0xff] %vm99_vm1, %v2188_v25  ;;  %2197 = vst.msk [vmem:[#allocation14 + $0x28] sm:$0xff] %vm99_vm1, %v2188_v25 }
0x13ce   :  { %v2193_v27 = vpop.permute.xlu0 %2192 }
0x13cf   :  { %2195 = vst.msk [vmem:[#allocation3 + $0x8] sm:$0xff] %vm99_vm1, %v2193_v27 }
0x13d0   :  { %v2310_v28 = vpop.permute.xlu1 %2309 }
0x13d1   :  { %2312 = vst.msk [vmem:[#allocation2] sm:$0xff] %vm99_vm1, %v2310_v28  ;;  %3295 = vmatmul.mubr.msk.f32.vlgmr.msra.gmra.mrb[26].mxu0 %vm99_vm1, %v2310_v28 }
0x13d2   :  { %v2322_v29 = vld [vmem:[#allocation2 + $0x8] sm:$0xff]  ;;  %3468 = vmatpush3.bf16.msra.mxu0 %v3449_v17  ;;  %3316 = vmatprep.mubr.msk.f32.mxu0 %vm3769_vm0, %v3770_v1 }
0x13d3   :  { %3284 = vmatmul.mubr.msk.f32.vlgmr.msra.gmra.mrb[20].mxu1 %vm99_vm1, %v2322_v29  ;;  %3469 = vmatprep.subr.bf16.mxu0 %v3768_v0 }
0x13d4   :  { %v2315_v30 = vpop.permute.xlu1 %2314  ;;  %3462 = vmatpush3.bf16.msra.mxu1 %v4189_v26  ;;  %3305 = vmatprep.mubr.msk.f32.mxu1 %vm3769_vm0, %v3770_v1 }
0x13d5   :  { %2317 = vst.msk [vmem:[#allocation3] sm:$0xff] %vm99_vm1, %v2315_v30  ;;  %3463 = vmatprep.subr.bf16.mxu1 %v3768_v0 }
0x13d6   :  { %3471 = vmatpush3.bf16.msra.mxu0 %v3452_v21  ;;  %v2480_v40 = vld [vmem:[#allocation3 + $0x8] sm:$0xff] }
0x13d8   :  { %3465 = vmatpush3.bf16.msra.mxu1 %v4197_v31  ;;  %v2523_v32 = vld [vmem:[#allocation2] sm:$0xff] }
0x13d9   :  { %3472 = vmatprep.subr.bf16.mxu1 %v3768_v0 }
0x13db   :  { %3306 = vmatmul.mubr.msk.f32.vlgmr.msra.gmra.mrb[22].mxu1 %vm99_vm1, %v2523_v32 }
0x13dc   :  { %3474 = vmatpush3.bf16.msra.mxu1 %v3455_v59  ;;  %3327 = vmatprep.mubr.msk.f32.mxu1 %vm3769_vm0, %v3770_v1  ;;  %v2602_v41 = vld [vmem:[#allocation3] sm:$0xff] }
0x13dd   :  { %3475 = vmatprep.subr.bf16.mxu1 %v3768_v0 }
0x13e0   :  { %3477 = vmatpush3.bf16.msra.mxu1 %v3458_v19 }
0x14a4   :  { %v2468_v26 = vpop.f32.mrb[26].mxu0 }
0x14a5   :  { %v3296_v33 = vpop.f32.mrb[27].mxu0 }
0x14a6   :  { %v2396_v34 = vpop.f32.mrb[20].mxu1 }
0x14a7   :  { %v2469_v31 = vadd.f32 %v2468_v26, %v2396_v34  ;;  %v3285_v37 = vpop.f32.mrb[21].mxu1 }
0x14a9   :  { %v2479_v38 = vadd.f32 %v4255_v35, %v2469_v31 }
0x14ab   :  { %3596 = vtanh.f32 %v2479_v38  ;;  %v2913_v42 = vmul.f32 -1.442695, %v2479_v38 }
0x14ae   :  { %v2597_v1 = vpop.f32.mrb[22].mxu1 }
0x14af   :  { %v2601_v8 = vadd.f32 %v2597_v1, %v248_v39  ;;  %v3307_v0 = vpop.f32.mrb[23].mxu1 }
0x14b1   :  { %3598 = vtanh.f32 %v2601_v8  ;;  %v2915_v5 = vmul.f32 -1.442695, %v2601_v8 }
0x14b2   :  { %3600 = vpow2.f32 %v2913_v42 }
0x14b3   :  { %3602 = vpow2.f32 %v2915_v5 }
0x14b5   :  { %v3597_v49 = vpop.eup %3596 }
0x14b6   :  { %2494 = vrot.lane.b32.xlu0 %v3597_v49, %s3771_s27 }
0x14ba   :  { %2489 = vrot.lane.b32.xlu0 %v2480_v40, %s3771_s27 }
0x14bb   :  { %v3599_v12 = vpop.eup %3598 }
0x14bc   :  { %2616 = vrot.lane.b32.xlu1 %v3599_v12, %s3771_s27  ;;  %v3601_v60 = vpop.eup %3600 }
0x14bd   :  { %v2484_v43 = vadd.f32 1.0, %v3601_v60  ;;  %v3603_v36 = vpop.eup %3602 }
0x14be   :  { %2611 = vrot.lane.b32.xlu0 %v2602_v41, %s3771_s27  ;;  %v2606_v44 = vadd.f32 1.0, %v3603_v36 }
0x14bf   :  { %3604 = vrcp.f32 %v2484_v43 }
0x14c0   :  { %3606 = vrcp.f32 %v2606_v44 }
0x14c9   :  { %v3605_v46 = vpop.eup %3604 }
0x14ca   :  { %v3607_v48 = vpop.eup %3606 }
0x1528   :  { %v2495_v61 = vpop.permute.xlu0 %2494 }
0x1529   :  { %v2497_v47 = vmul.f32 %v3605_v46, %v2495_v61 }
0x152b   :  { %2499 = vrot.lane.b32.xlu1 %v2497_v47, %s3771_s27 }
0x152c   :  { %v2490_v51 = vpop.permute.xlu0 %2489 }
0x152d   :  { %v2492_v52 = vmul.f32 %v3605_v46, %v2490_v51 }
0x152e   :  { %v2617_v45 = vpop.permute.xlu1 %2616 }
0x152f   :  { %v2619_v50 = vmul.f32 %v3607_v48, %v2617_v45 }
0x1530   :  { %v2612_v58 = vpop.permute.xlu0 %2611 }
0x1531   :  { %2621 = vrot.lane.b32.xlu1 %v2619_v50, %s3771_s27  ;;  %v2614_v54 = vmul.f32 %v3607_v48, %v2612_v58 }
0x159d   :  { %v2500_v53 = vpop.permute.xlu1 %2499 }
0x159e   :  { %v2502_v14 = vadd.f32 %v2500_v53, %v2492_v52 }
0x15a0   :  { %3608 = vtanh.f32 %v2502_v14 }
0x15a3   :  { %v2622_v55 = vpop.permute.xlu1 %2621 }
0x15a4   :  { %v2624_v62 = vadd.f32 %v2622_v55, %v2614_v54 }
0x15a6   :  { %3610 = vtanh.f32 %v2624_v62 }
0x15aa   :  { %v3609_v63 = vpop.eup %3608 }
0x15ab   :  { %2505 = vrot.lane.b32.xlu0 %v3609_v63, %s3771_s27 }
0x15b0   :  { %v3611_v2 = vpop.eup %3610 }
0x15b1   :  { %2627 = vrot.lane.b32.xlu1 %v3611_v2, %s3771_s27 }
0x161d   :  { %v2506_v3 = vpop.permute.xlu0 %2505 }
0x161e   :  { %v2508_v4 = vmul.f32 %v3605_v46, %v2506_v3 }
0x1620   :  { %2510 = vrot.lane.b32.xlu0 %v2508_v4, %s3773_s18 }
0x1623   :  { %v2628_v6 = vpop.permute.xlu1 %2627 }
0x1624   :  { %v2630_v7 = vmul.f32 %v3607_v48, %v2628_v6  ;;  %2515 = vrot.lane.b32.xlu0 %v2502_v14, %s3772_s17 }
0x1626   :  { %2632 = vrot.lane.b32.xlu1 %v2630_v7, %s3773_s18 }
0x1692   :  { %v2511_v9 = vpop.permute.xlu0 %2510 }
0x1693   :  { %2513 = vst.msk [vmem:[#allocation2 + $0x8] sm:$0xff] %vm99_vm1, %v2511_v9  ;;  %2520 = vst.msk [vmem:[#allocation14 + $0x30] sm:$0xff] %vm99_vm1, %v2511_v9 }
0x1696   :  { %v2516_v10 = vpop.permute.xlu0 %2515 }
0x1697   :  { %2518 = vst.msk [vmem:[#allocation3 + $0x8] sm:$0xff] %vm99_vm1, %v2516_v10 }
0x1698   :  { %v2633_v59 = vpop.permute.xlu1 %2632 }
0x1699   :  { %2635 = vst.msk [vmem:[#allocation2] sm:$0xff] %vm99_vm1, %v2633_v59  ;;  %3328 = vmatmul.mubr.msk.f32.vlgmr.msra.gmra.mrb[24].mxu1 %vm99_vm1, %v2633_v59 }
0x169a   :  { %v2645_v11 = vld [vmem:[#allocation2 + $0x8] sm:$0xff] }
0x169b   :  { %3317 = vmatmul.mubr.msk.f32.vlgmr.msra.gmra.mrb[28].mxu0 %vm99_vm1, %v2645_v11 }
0x169e   :  { %v2803_v13 = vld [vmem:[#allocation3 + $0x8] sm:$0xff] }
0x169f   :  { %2812 = vrot.lane.b32.xlu0 %v2803_v13, %s3771_s27 }
0x1711   :  { %v2813_v27 = vpop.permute.xlu0 %2812 }
0x176c   :  { %v2791_v16 = vpop.f32.mrb[24].mxu1 }
0x176d   :  { %v3329_v17 = vpop.f32.mrb[25].mxu1 }
0x176e   :  { %v2719_v56 = vpop.f32.mrb[28].mxu0 }
0x176f   :  { %v2792_v18 = vadd.f32 %v2791_v16, %v2719_v56  ;;  %v3318_v19 = vpop.f32.mrb[29].mxu0 }
0x1771   :  { %v2802_v20 = vadd.f32 %v4255_v35, %v2792_v18 }
0x1773   :  { %3612 = vtanh.f32 %v2802_v20  ;;  %v2919_v21 = vmul.f32 -1.442695, %v2802_v20 }
0x1775   :  { %3614 = vpow2.f32 %v2919_v21 }
0x177d   :  { %v3613_v57 = vpop.eup %3612 }
0x177e   :  { %2817 = vrot.lane.b32.xlu1 %v3613_v57, %s3771_s27 }
0x177f   :  { %v3615_v22 = vpop.eup %3614 }
0x1780   :  { %v2807_v15 = vadd.f32 1.0, %v3615_v22 }
0x1782   :  { %3616 = vrcp.f32 %v2807_v15 }
0x178c   :  { %v3617_v23 = vpop.eup %3616 }
0x178d   :  { %v2815_v28 = vmul.f32 %v3617_v23, %v2813_v27 }
0x17f0   :  { %v2818_v24 = vpop.permute.xlu1 %2817 }
0x17f1   :  { %v2820_v25 = vmul.f32 %v3617_v23, %v2818_v24 }
0x17f3   :  { %2822 = vrot.lane.b32.xlu1 %v2820_v25, %s3771_s27 }
0x1865   :  { %v2823_v29 = vpop.permute.xlu1 %2822 }
0x1866   :  { %v2825_v30 = vadd.f32 %v2823_v29, %v2815_v28 }
0x1868   :  { %3618 = vtanh.f32 %v2825_v30 }
0x1872   :  { %v3619_v32 = vpop.eup %3618 }
0x1873   :  { %2828 = vrot.lane.b32.xlu0 %v3619_v32, %s3771_s27 }
0x1877   :  { %2637 = vrot.lane.b32.xlu0 %v2624_v62, %s3772_s17 }
0x18e5   :  { %v2829_v26 = vpop.permute.xlu0 %2828 }
0x18e6   :  { %v2831_v33 = vmul.f32 %v3617_v23, %v2829_v26 }
0x18e8   :  { %2833 = vrot.lane.b32.xlu1 %v2831_v33, %s3773_s18 }
0x18e9   :  { %v2638_v34 = vpop.permute.xlu0 %2637 }
0x18ea   :  { %2640 = vst.msk [vmem:[#allocation3] sm:$0xff] %vm99_vm1, %v2638_v34 }
0x18ec   :  { %2838 = vrot.lane.b32.xlu1 %v2825_v30, %s3772_s17 }
0x195a   :  { %v2834_v35 = vpop.permute.xlu1 %2833 }
0x195b   :  { %2836 = vst.msk [vmem:[#allocation2 + $0x8] sm:$0xff] %vm99_vm1, %v2834_v35  ;;  %2843 = vst.msk [vmem:[#allocation14 + $0x38] sm:$0xff] %vm99_vm1, %v2834_v35 }
0x195c   :  { %3742 = shalt.err (!%p3739_p2)
}
0x195d   :  { %s3743_s26 = scalar_lea.hbm %s4311_s7, 1024 }
0x195e   :  { %p3744_p3 = scmp.ne.s32.totalorder %s4311_s7, %s3743_s26  ;;  %p3747_p4 = scmp.lt.u32.totalorder %s3743_s26, %s4311_s7 }
0x1960   :  { %p3749_p5 = pnand %p3747_p4, %p3744_p3 }
0x1962   :  { %3752 = shalt.err (!%p3749_p5)
}
0x1963   :  { %2855 = dma.vmem_to_hbm [thread:$0]  %s2850_s24, 1024, %s4311_s7, [#allocation7], %s3763_s13, %s3763_s13, %s3764_s14   ;;  %v2839_v31 = vpop.permute.xlu1 %2838 }
0x1964   :  { %2841 = vst.msk [vmem:[#allocation3 + $0x8] sm:$0xff] %vm99_vm1, %v2839_v31 }
0x1965   :  { %3759 = dma.done.wait [#allocation7], 1024  }
0x1966   :  { %3760 = vsyncadd [#allocation7], 4294966272 }
0x1967   :  { %2859 = vsyncpa [#allocation6], 1 }
0x1968   :  { %2860 = vsyncpa [#allocation9], 1 }
0x1969   :  { %2861 = vsyncpa [#allocation12], 1 }
0x196a   :  { %2862 = vsyncpa [#allocation7], 1 }

</bundles_post_ra>
